<compile_context>
chip_gen: v5e
topology: v5e:2x2
jax: 0.10.0
libtpu: 0.0.40
codegen_flags: <defaults>
</compile_context>

<pallas_src>
import functools

import jax
import jax.numpy as jnp
from jax import lax
from jax.experimental import pallas as pl
from jax.experimental.pallas import tpu as pltpu

FEATURE_DIM = 29
LSTM_H_DIM = 128
HOLDING_PERIOD = 12      # window size K required by the Linear(12, 1)
DEFAULT_TILE_N = 512


def _round_up(x, m):
    return (x + m - 1) // m * m


def _device_flags():
    """Returns (use_bf16_gate_math, is_v7x) based on the local TPU generation."""
    try:
        kind = jax.devices()[0].device_kind.lower()
    except Exception:
        kind = ""
    is_v5e = ("v5 lite" in kind) or ("v5e" in kind) or ("v5litepod" in kind)
    is_v7 = ("v7" in kind) or ("tpu7" in kind) or ("7x" in kind)
    return (not is_v5e), is_v7


def _vmem_limit_bytes(tn, T, F, H):
    """Estimate VMEM usage (lane/sublane padded) and add headroom."""
    lane = lambda n: _round_up(n, 128)
    x_blk = T * tn * lane(F) * 2                        # bf16, double-buffered
    out_blk = tn * lane(H) * 4                          # f32, double-buffered
    w_blk = (_round_up(F, 16) * lane(4 * H) * 2         # bf16 W_ih
             + _round_up(H, 16) * lane(4 * H) * 2       # bf16 W_hh
             + 8 * lane(4 * H) * 4)                     # f32 bias
    gx = T * tn * lane(4 * H) * 2                       # bf16 scratch
    hc = tn * lane(H) * (2 + 4)                         # bf16 h + f32 c
    est = 2 * (x_blk + out_blk + w_blk) + gx + hc
    return int(min(max(1.5 * est + 16 * 2**20, 32 * 2**20), 64 * 2**20))


def _lstm_ha_kernel(wll_ref, bll_ref,                   # scalar prefetch (SMEM)
                    x_ref, wih_ref, whh_ref, b_ref,     # inputs (VMEM)
                    out_ref,                            # output block (VMEM)
                    gx_scr, h_scr, c_scr,               # scratch (VMEM)
                    *, gate_dtype):
    T = x_ref.shape[0]
    H = h_scr.shape[-1]

    # VMEM-resident weights, hoisted out of all loops (already bf16 / f32).
    wih = wih_ref[...]                                   # (F, 4H) bf16
    whh = whh_ref[...]                                   # (H, 4H) bf16
    bias = b_ref[...]                                    # (1, 4H) f32

    # ---- Hoisted input projection (h-independent), one timestep at a time so the
    # f32 temporaries stay bounded; stored bf16 to halve hot-loop gx loads. ----
    for t in range(T):
        gx = jnp.dot(x_ref[t], wih, preferred_element_type=jnp.float32) + bias
        gx_scr[t] = gx.astype(jnp.bfloat16)

    h_scr[...] = jnp.zeros_like(h_scr)
    c_scr[...] = jnp.zeros_like(c_scr)
    # Accumulate the Linear(12 -> 1) weighted sum directly into the output block.
    out_ref[...] = jnp.zeros_like(out_ref) + bll_ref[0]

    def step(t, _):
        # bf16 gx + f32 MXU accumulation of h @ W_hh  -> (tn, 4H) f32
        gates = gx_scr[t] + jnp.dot(h_scr[...], whh,
                                    preferred_element_type=jnp.float32)
        gates = gates.astype(gate_dtype)
        sig = jax.nn.sigmoid(gates[:, :3 * H])           # [i | f | o] one EUP slab
        g = jnp.tanh(gates[:, 3 * H:])
        i_g = sig[:, 0 * H:1 * H]
        f_g = sig[:, 1 * H:2 * H]
        o_g = sig[:, 2 * H:3 * H]
        c = f_g * c_scr[...] + i_g * g                   # promotes to f32; c stays f32
        h = o_g * jnp.tanh(c.astype(gate_dtype))
        c_scr[...] = c
        h_scr[...] = h.astype(jnp.bfloat16)              # feeds next bf16 matmul
        out_ref[...] = out_ref[...] + wll_ref[t] * h     # f32 accumulation
        return 0

    lax.fori_loop(0, T, step, 0, unroll=True)


@functools.partial(jax.jit, static_argnames=("tn", "n_pad", "gate_dtype"))
def _lstm_ha_call(x, params, tn, n_pad, gate_dtype):
    B, S, T, F = x.shape
    N = B * S
    H = params["w_hh_t"].shape[0]

    # Single fused host-side prep pass: bf16 cast + time-major transpose + row pad
    # (half-width write; no separate f32 transpose HBM pass).
    x_tm = jnp.transpose(x.reshape(N, T, F).astype(jnp.bfloat16), (1, 0, 2))
    if n_pad != N:
        x_tm = jnp.pad(x_tm, ((0, 0), (0, n_pad - N), (0, 0)))

    kernel = functools.partial(_lstm_ha_kernel, gate_dtype=gate_dtype)
    out = pl.pallas_call(
        kernel,
        out_shape=jax.ShapeDtypeStruct((n_pad, H), jnp.float32),
        grid_spec=pltpu.PrefetchScalarGridSpec(
            num_scalar_prefetch=2,
            grid=(n_pad // tn,),
            in_specs=[
                pl.BlockSpec((T, tn, F), lambda i, wll, bll: (0, i, 0)),
                # Constant index maps -> weight blocks are never re-DMA'd.
                pl.BlockSpec((F, 4 * H), lambda i, wll, bll: (0, 0)),
                pl.BlockSpec((H, 4 * H), lambda i, wll, bll: (0, 0)),
                pl.BlockSpec((1, 4 * H), lambda i, wll, bll: (0, 0)),
            ],
            out_specs=pl.BlockSpec((tn, H), lambda i, wll, bll: (i, 0)),
            scratch_shapes=[
                pltpu.VMEM((T, tn, 4 * H), jnp.bfloat16),   # pre-projected gates
                pltpu.VMEM((tn, H), jnp.bfloat16),          # h (bf16 -> MXU)
                pltpu.VMEM((tn, H), jnp.float32),           # c (f32 accumulator)
            ],
        ),
        compiler_params=pltpu.CompilerParams(
            dimension_semantics=("parallel",),
            vmem_limit_bytes=_vmem_limit_bytes(tn, T, F, H),
        ),
    )(params["w_ll"], params["b_ll"], x_tm,
      params["w_ih_t"], params["w_hh_t"], params["bias"])

    return out[:N].reshape(B, S, H)


def lstm_ha_forward(x, params, tile_n=None, gate_dtype=None):
    """x: (batch, num_stock, T, F) -> (batch, num_stock, H) float32."""
    bf16_gates, is_v7 = _device_flags()
    if gate_dtype is None:
        # f32 gate elementwise on v5e (no bf16 VPU/EUP); bf16 on v6e / v7x.
        gate_dtype = jnp.bfloat16 if bf16_gates else jnp.float32
    if tile_n is None:
        tile_n = DEFAULT_TILE_N

    B, S, T, F = x.shape
    N = B * S
    tn = _round_up(max(16, min(int(tile_n), _round_up(N, 16))), 16)
    ntiles = pl.cdiv(N, tn)
    if is_v7 and N >= 32 and ntiles % 2 == 1:
        # Megacore balance: target an even number of grid tiles for the 2 TCs.
        ntiles += 1
        tn = _round_up(pl.cdiv(N, ntiles), 16)
        ntiles = pl.cdiv(N, tn)
        if ntiles % 2 == 1:
            ntiles += 1      # accept one fully-padded tile to stay balanced
    n_pad = ntiles * tn
    return _lstm_ha_call(x, params, tn, n_pad, gate_dtype)


# ----------------------------- parameters & reference -----------------------------

def init_torch_params(key, feature_dim=FEATURE_DIM, hidden=LSTM_H_DIM,
                      holding=HOLDING_PERIOD):
    """Synthetic weights laid out exactly like the PyTorch module's parameters."""
    k1, k2, k3, k4, k5, k6 = jax.random.split(key, 6)
    b_lstm = 1.0 / float(hidden) ** 0.5
    b_ll = 1.0 / float(holding) ** 0.5
    return {
        # nn.LSTM parameters: gate order along the 4H axis is [i, f, g, o].
        "w_ih": jax.random.uniform(k1, (4 * hidden, feature_dim), jnp.float32, -b_lstm, b_lstm),
        "w_hh": jax.random.uniform(k2, (4 * hidden, hidden), jnp.float32, -b_lstm, b_lstm),
        "b_ih": jax.random.uniform(k3, (4 * hidden,), jnp.float32, -b_lstm, b_lstm),
        "b_hh": jax.random.uniform(k4, (4 * hidden,), jnp.float32, -b_lstm, b_lstm),
        # nn.Linear(holding, 1)
        "ll_w": jax.random.uniform(k5, (1, holding), jnp.float32, -b_ll, b_ll),
        "ll_b": jax.random.uniform(k6, (1,), jnp.float32, -b_ll, b_ll),
    }


def prepare_params(tp):
    """PyTorch layout -> kernel layout: gate order permuted [i,f,g,o] -> [i,f,o,g],
    transposed for (x @ W) form, matmul operands pre-cast to bf16."""
    def reorder(w):                        # along the 4H axis (axis 0)
        i, f, g, o = jnp.split(w, 4, axis=0)
        return jnp.concatenate([i, f, o, g], axis=0)

    return {
        "w_ih_t": reorder(tp["w_ih"]).T.astype(jnp.bfloat16),                    # (F, 4H)
        "w_hh_t": reorder(tp["w_hh"]).T.astype(jnp.bfloat16),                    # (H, 4H)
        "bias": reorder(tp["b_ih"] + tp["b_hh"])[None, :].astype(jnp.float32),   # (1, 4H)
        "w_ll": tp["ll_w"][0].astype(jnp.float32),                               # (T,)
        "b_ll": tp["ll_b"].astype(jnp.float32),                                  # (1,)
    }


def ref_forward(x, tp):
    """Pure-JAX f32 reference faithful to the PyTorch forward (gate order [i,f,g,o])."""
    B, S, T, F = x.shape
    N = B * S
    H = tp["w_hh"].shape[1]
    xs = jnp.transpose(x.reshape(N, T, F).astype(jnp.float32), (1, 0, 2))   # (T, N, F)
    w_ih_t = tp["w_ih"].T.astype(jnp.float32)
    w_hh_t = tp["w_hh"].T.astype(jnp.float32)
    b = (tp["b_ih"] + tp["b_hh"]).astype(jnp.float32)

    def cell(carry, xt):
        h, c = carry
        gates = xt @ w_ih_t + h @ w_hh_t + b
        i = jax.nn.sigmoid(gates[:, 0 * H:1 * H])
        f = jax.nn.sigmoid(gates[:, 1 * H:2 * H])
        g = jnp.tanh(gates[:, 2 * H:3 * H])
        o = jax.nn.sigmoid(gates[:, 3 * H:4 * H])
        c = f * c + i * g
        h = o * jnp.tanh(c)
        return (h, c), h

    zero = jnp.zeros((N, H), jnp.float32)
    _, hs = lax.scan(cell, (zero, zero), xs)                  # (T, N, H)
    out = jnp.einsum("tnh,t->nh", hs, tp["ll_w"][0]) + tp["ll_b"][0]
    return out.reshape(B, S, H)


if __name__ == "__main__":
    key = jax.random.PRNGKey(0)
    k_x1, k_x2, k_p = jax.random.split(key, 3)
    torch_params = init_torch_params(k_p)
    params = prepare_params(torch_params)

    # Case 1: tiny N = 6 (< one tile) -> exercises row padding.
    x1 = jax.random.normal(k_x1, (2, 3, HOLDING_PERIOD, FEATURE_DIM), jnp.float32)
    out1 = jax.block_until_ready(lstm_ha_forward(x1, params))
    ref1 = ref_forward(x1, torch_params)
    assert out1.shape == (2, 3, LSTM_H_DIM), out1.shape
    e1 = jnp.abs(out1 - ref1)
    assert float(e1.max()) < 3e-2 and float(e1.mean()) < 5e-3, (float(e1.max()), float(e1.mean()))

    # Case 2: multi-tile grid (N = 72, tile 32 -> ragged padding, >= 3 tiles).
    x2 = jax.random.normal(k_x2, (4, 18, HOLDING_PERIOD, FEATURE_DIM), jnp.float32)
    out2 = jax.block_until_ready(lstm_ha_forward(x2, params, tile_n=32))
    ref2 = ref_forward(x2, torch_params)
    assert out2.shape == (4, 18, LSTM_H_DIM), out2.shape
    e2 = jnp.abs(out2 - ref2)
    assert float(e2.max()) < 3e-2 and float(e2.mean()) < 5e-3, (float(e2.max()), float(e2.mean()))

    # Case 3: explicit f32 gate-math path (v5e configuration), same inputs.
    out3 = jax.block_until_ready(lstm_ha_forward(x2, params, tile_n=32, gate_dtype=jnp.float32))
    e3 = jnp.abs(out3 - ref2)
    assert float(e3.max()) < 3e-2 and float(e3.mean()) < 5e-3, (float(e3.max()), float(e3.mean()))

    print("KERNEL_OK")
</pallas_src>

<mosaic_0001>
module attributes {stable_mosaic.version = 11 : i64} {
  func.func @_lstm_ha_kernel(%arg0: i32, %arg1: memref<12xf32, #tpu.memory_space<smem>>, %arg2: memref<1xf32, #tpu.memory_space<smem>>, %arg3: memref<12x16x29xbf16, #tpu.memory_space<vmem>>, %arg4: memref<29x512xbf16, #tpu.memory_space<vmem>>, %arg5: memref<128x512xbf16, #tpu.memory_space<vmem>>, %arg6: memref<1x512xf32, #tpu.memory_space<vmem>>, %arg7: memref<16x128xf32, #tpu.memory_space<vmem>>, %arg8: memref<12x16x512xbf16, #tpu.memory_space<vmem>>, %arg9: memref<16x128xbf16, #tpu.memory_space<vmem>>, %arg10: memref<16x128xf32, #tpu.memory_space<vmem>>) attributes {dimension_semantics = [#tpu.dimension_semantics<parallel>], iteration_bounds = array<i64: 1>, scalar_prefetch = 2 : i64, scratch_operands = 3 : i64, tpu.core_type = #tpu.core_type<tc>, window_params = [{transform_indices = @transform_0, window_bounds = array<i64: 12, 16, 29>}, {pipeline_mode = #tpu.pipeline_mode<synchronous>, transform_indices = @transform_1, window_bounds = array<i64: 29, 512>}, {pipeline_mode = #tpu.pipeline_mode<synchronous>, transform_indices = @transform_2, window_bounds = array<i64: 128, 512>}, {pipeline_mode = #tpu.pipeline_mode<synchronous>, transform_indices = @transform_3, window_bounds = array<i64: 1, 512>}, {transform_indices = @transform_4, window_bounds = array<i64: 16, 128>}]} {
    %c0 = arith.constant 0 : index
    %c0_0 = arith.constant 0 : index
    %0 = vector.load %arg4[%c0, %c0_0] : memref<29x512xbf16, #tpu.memory_space<vmem>>, vector<29x512xbf16>
    %c0_1 = arith.constant 0 : index
    %c0_2 = arith.constant 0 : index
    %1 = vector.load %arg5[%c0_1, %c0_2] : memref<128x512xbf16, #tpu.memory_space<vmem>>, vector<128x512xbf16>
    %c0_3 = arith.constant 0 : index
    %c0_4 = arith.constant 0 : index
    %2 = vector.load %arg6[%c0_3, %c0_4] : memref<1x512xf32, #tpu.memory_space<vmem>>, vector<1x512xf32>
    %c0_5 = arith.constant 0 : index
    %c0_6 = arith.constant 0 : index
    %c0_7 = arith.constant 0 : index
    %3 = vector.load %arg3[%c0_5, %c0_6, %c0_7] : memref<12x16x29xbf16, #tpu.memory_space<vmem>>, vector<1x16x29xbf16>
    %4 = vector.shape_cast %3 : vector<1x16x29xbf16> to vector<16x29xbf16>
    %cst = arith.constant dense<0.000000e+00> : vector<16x512xf32>
    %5 = tpu.matmul %4, %0, %cst {dimension_numbers = #tpu.dot_dimension_numbers<[1], [0], [0], [1], [0, 0, 1, 1], [], []>} : vector<16x29xbf16>, vector<29x512xbf16>, vector<16x512xf32> -> vector<16x512xf32>
    %6 = vector.broadcast %2 : vector<1x512xf32> to vector<16x512xf32>
    %7 = arith.addf %5, %6 : vector<16x512xf32>
    %8 = arith.truncf %7 : vector<16x512xf32> to vector<16x512xbf16>
    %c0_8 = arith.constant 0 : index
    %c0_9 = arith.constant 0 : index
    %c0_10 = arith.constant 0 : index
    %9 = vector.load %arg8[%c0_8, %c0_9, %c0_10] : memref<12x16x512xbf16, #tpu.memory_space<vmem>>, vector<1x16x512xbf16>
    %10 = vector.shape_cast %9 : vector<1x16x512xbf16> to vector<16x512xbf16>
    %11 = vector.shape_cast %8 : vector<16x512xbf16> to vector<1x16x512xbf16>
    tpu.vector_store %arg8[%c0_8, %c0_9, %c0_10], %11 {strides = array<i32>} : memref<12x16x512xbf16, #tpu.memory_space<vmem>>, vector<1x16x512xbf16>,
    %c1 = arith.constant 1 : index
    %c0_11 = arith.constant 0 : index
    %c0_12 = arith.constant 0 : index
    %12 = vector.load %arg3[%c1, %c0_11, %c0_12] : memref<12x16x29xbf16, #tpu.memory_space<vmem>>, vector<1x16x29xbf16>
    %13 = vector.shape_cast %12 : vector<1x16x29xbf16> to vector<16x29xbf16>
    %cst_13 = arith.constant dense<0.000000e+00> : vector<16x512xf32>
    %14 = tpu.matmul %13, %0, %cst_13 {dimension_numbers = #tpu.dot_dimension_numbers<[1], [0], [0], [1], [0, 0, 1, 1], [], []>} : vector<16x29xbf16>, vector<29x512xbf16>, vector<16x512xf32> -> vector<16x512xf32>
    %15 = vector.broadcast %2 : vector<1x512xf32> to vector<16x512xf32>
    %16 = arith.addf %14, %15 : vector<16x512xf32>
    %17 = arith.truncf %16 : vector<16x512xf32> to vector<16x512xbf16>
    %c1_14 = arith.constant 1 : index
    %c0_15 = arith.constant 0 : index
    %c0_16 = arith.constant 0 : index
    %18 = vector.load %arg8[%c1_14, %c0_15, %c0_16] : memref<12x16x512xbf16, #tpu.memory_space<vmem>>, vector<1x16x512xbf16>
    %19 = vector.shape_cast %18 : vector<1x16x512xbf16> to vector<16x512xbf16>
    %20 = vector.shape_cast %17 : vector<16x512xbf16> to vector<1x16x512xbf16>
    tpu.vector_store %arg8[%c1_14, %c0_15, %c0_16], %20 {strides = array<i32>} : memref<12x16x512xbf16, #tpu.memory_space<vmem>>, vector<1x16x512xbf16>,
    %c2 = arith.constant 2 : index
    %c0_17 = arith.constant 0 : index
    %c0_18 = arith.constant 0 : index
    %21 = vector.load %arg3[%c2, %c0_17, %c0_18] : memref<12x16x29xbf16, #tpu.memory_space<vmem>>, vector<1x16x29xbf16>
    %22 = vector.shape_cast %21 : vector<1x16x29xbf16> to vector<16x29xbf16>
    %cst_19 = arith.constant dense<0.000000e+00> : vector<16x512xf32>
    %23 = tpu.matmul %22, %0, %cst_19 {dimension_numbers = #tpu.dot_dimension_numbers<[1], [0], [0], [1], [0, 0, 1, 1], [], []>} : vector<16x29xbf16>, vector<29x512xbf16>, vector<16x512xf32> -> vector<16x512xf32>
    %24 = vector.broadcast %2 : vector<1x512xf32> to vector<16x512xf32>
    %25 = arith.addf %23, %24 : vector<16x512xf32>
    %26 = arith.truncf %25 : vector<16x512xf32> to vector<16x512xbf16>
    %c2_20 = arith.constant 2 : index
    %c0_21 = arith.constant 0 : index
    %c0_22 = arith.constant 0 : index
    %27 = vector.load %arg8[%c2_20, %c0_21, %c0_22] : memref<12x16x512xbf16, #tpu.memory_space<vmem>>, vector<1x16x512xbf16>
    %28 = vector.shape_cast %27 : vector<1x16x512xbf16> to vector<16x512xbf16>
    %29 = vector.shape_cast %26 : vector<16x512xbf16> to vector<1x16x512xbf16>
    tpu.vector_store %arg8[%c2_20, %c0_21, %c0_22], %29 {strides = array<i32>} : memref<12x16x512xbf16, #tpu.memory_space<vmem>>, vector<1x16x512xbf16>,
    %c3 = arith.constant 3 : index
    %c0_23 = arith.constant 0 : index
    %c0_24 = arith.constant 0 : index
    %30 = vector.load %arg3[%c3, %c0_23, %c0_24] : memref<12x16x29xbf16, #tpu.memory_space<vmem>>, vector<1x16x29xbf16>
    %31 = vector.shape_cast %30 : vector<1x16x29xbf16> to vector<16x29xbf16>
    %cst_25 = arith.constant dense<0.000000e+00> : vector<16x512xf32>
    %32 = tpu.matmul %31, %0, %cst_25 {dimension_numbers = #tpu.dot_dimension_numbers<[1], [0], [0], [1], [0, 0, 1, 1], [], []>} : vector<16x29xbf16>, vector<29x512xbf16>, vector<16x512xf32> -> vector<16x512xf32>
    %33 = vector.broadcast %2 : vector<1x512xf32> to vector<16x512xf32>
    %34 = arith.addf %32, %33 : vector<16x512xf32>
    %35 = arith.truncf %34 : vector<16x512xf32> to vector<16x512xbf16>
    %c3_26 = arith.constant 3 : index
    %c0_27 = arith.constant 0 : index
    %c0_28 = arith.constant 0 : index
    %36 = vector.load %arg8[%c3_26, %c0_27, %c0_28] : memref<12x16x512xbf16, #tpu.memory_space<vmem>>, vector<1x16x512xbf16>
    %37 = vector.shape_cast %36 : vector<1x16x512xbf16> to vector<16x512xbf16>
    %38 = vector.shape_cast %35 : vector<16x512xbf16> to vector<1x16x512xbf16>
    tpu.vector_store %arg8[%c3_26, %c0_27, %c0_28], %38 {strides = array<i32>} : memref<12x16x512xbf16, #tpu.memory_space<vmem>>, vector<1x16x512xbf16>,
    %c4 = arith.constant 4 : index
    %c0_29 = arith.constant 0 : index
    %c0_30 = arith.constant 0 : index
    %39 = vector.load %arg3[%c4, %c0_29, %c0_30] : memref<12x16x29xbf16, #tpu.memory_space<vmem>>, vector<1x16x29xbf16>
    %40 = vector.shape_cast %39 : vector<1x16x29xbf16> to vector<16x29xbf16>
    %cst_31 = arith.constant dense<0.000000e+00> : vector<16x512xf32>
    %41 = tpu.matmul %40, %0, %cst_31 {dimension_numbers = #tpu.dot_dimension_numbers<[1], [0], [0], [1], [0, 0, 1, 1], [], []>} : vector<16x29xbf16>, vector<29x512xbf16>, vector<16x512xf32> -> vector<16x512xf32>
    %42 = vector.broadcast %2 : vector<1x512xf32> to vector<16x512xf32>
    %43 = arith.addf %41, %42 : vector<16x512xf32>
    %44 = arith.truncf %43 : vector<16x512xf32> to vector<16x512xbf16>
    %c4_32 = arith.constant 4 : index
    %c0_33 = arith.constant 0 : index
    %c0_34 = arith.constant 0 : index
    %45 = vector.load %arg8[%c4_32, %c0_33, %c0_34] : memref<12x16x512xbf16, #tpu.memory_space<vmem>>, vector<1x16x512xbf16>
    %46 = vector.shape_cast %45 : vector<1x16x512xbf16> to vector<16x512xbf16>
    %47 = vector.shape_cast %44 : vector<16x512xbf16> to vector<1x16x512xbf16>
    tpu.vector_store %arg8[%c4_32, %c0_33, %c0_34], %47 {strides = array<i32>} : memref<12x16x512xbf16, #tpu.memory_space<vmem>>, vector<1x16x512xbf16>,
    %c5 = arith.constant 5 : index
    %c0_35 = arith.constant 0 : index
    %c0_36 = arith.constant 0 : index
    %48 = vector.load %arg3[%c5, %c0_35, %c0_36] : memref<12x16x29xbf16, #tpu.memory_space<vmem>>, vector<1x16x29xbf16>
    %49 = vector.shape_cast %48 : vector<1x16x29xbf16> to vector<16x29xbf16>
    %cst_37 = arith.constant dense<0.000000e+00> : vector<16x512xf32>
    %50 = tpu.matmul %49, %0, %cst_37 {dimension_numbers = #tpu.dot_dimension_numbers<[1], [0], [0], [1], [0, 0, 1, 1], [], []>} : vector<16x29xbf16>, vector<29x512xbf16>, vector<16x512xf32> -> vector<16x512xf32>
    %51 = vector.broadcast %2 : vector<1x512xf32> to vector<16x512xf32>
    %52 = arith.addf %50, %51 : vector<16x512xf32>
    %53 = arith.truncf %52 : vector<16x512xf32> to vector<16x512xbf16>
    %c5_38 = arith.constant 5 : index
    %c0_39 = arith.constant 0 : index
    %c0_40 = arith.constant 0 : index
    %54 = vector.load %arg8[%c5_38, %c0_39, %c0_40] : memref<12x16x512xbf16, #tpu.memory_space<vmem>>, vector<1x16x512xbf16>
    %55 = vector.shape_cast %54 : vector<1x16x512xbf16> to vector<16x512xbf16>
    %56 = vector.shape_cast %53 : vector<16x512xbf16> to vector<1x16x512xbf16>
    tpu.vector_store %arg8[%c5_38, %c0_39, %c0_40], %56 {strides = array<i32>} : memref<12x16x512xbf16, #tpu.memory_space<vmem>>, vector<1x16x512xbf16>,
    %c6 = arith.constant 6 : index
    %c0_41 = arith.constant 0 : index
    %c0_42 = arith.constant 0 : index
    %57 = vector.load %arg3[%c6, %c0_41, %c0_42] : memref<12x16x29xbf16, #tpu.memory_space<vmem>>, vector<1x16x29xbf16>
    %58 = vector.shape_cast %57 : vector<1x16x29xbf16> to vector<16x29xbf16>
    %cst_43 = arith.constant dense<0.000000e+00> : vector<16x512xf32>
    %59 = tpu.matmul %58, %0, %cst_43 {dimension_numbers = #tpu.dot_dimension_numbers<[1], [0], [0], [1], [0, 0, 1, 1], [], []>} : vector<16x29xbf16>, vector<29x512xbf16>, vector<16x512xf32> -> vector<16x512xf32>
    %60 = vector.broadcast %2 : vector<1x512xf32> to vector<16x512xf32>
    %61 = arith.addf %59, %60 : vector<16x512xf32>
    %62 = arith.truncf %61 : vector<16x512xf32> to vector<16x512xbf16>
    %c6_44 = arith.constant 6 : index
    %c0_45 = arith.constant 0 : index
    %c0_46 = arith.constant 0 : index
    %63 = vector.load %arg8[%c6_44, %c0_45, %c0_46] : memref<12x16x512xbf16, #tpu.memory_space<vmem>>, vector<1x16x512xbf16>
    %64 = vector.shape_cast %63 : vector<1x16x512xbf16> to vector<16x512xbf16>
    %65 = vector.shape_cast %62 : vector<16x512xbf16> to vector<1x16x512xbf16>
    tpu.vector_store %arg8[%c6_44, %c0_45, %c0_46], %65 {strides = array<i32>} : memref<12x16x512xbf16, #tpu.memory_space<vmem>>, vector<1x16x512xbf16>,
    %c7 = arith.constant 7 : index
    %c0_47 = arith.constant 0 : index
    %c0_48 = arith.constant 0 : index
    %66 = vector.load %arg3[%c7, %c0_47, %c0_48] : memref<12x16x29xbf16, #tpu.memory_space<vmem>>, vector<1x16x29xbf16>
    %67 = vector.shape_cast %66 : vector<1x16x29xbf16> to vector<16x29xbf16>
    %cst_49 = arith.constant dense<0.000000e+00> : vector<16x512xf32>
    %68 = tpu.matmul %67, %0, %cst_49 {dimension_numbers = #tpu.dot_dimension_numbers<[1], [0], [0], [1], [0, 0, 1, 1], [], []>} : vector<16x29xbf16>, vector<29x512xbf16>, vector<16x512xf32> -> vector<16x512xf32>
    %69 = vector.broadcast %2 : vector<1x512xf32> to vector<16x512xf32>
    %70 = arith.addf %68, %69 : vector<16x512xf32>
    %71 = arith.truncf %70 : vector<16x512xf32> to vector<16x512xbf16>
    %c7_50 = arith.constant 7 : index
    %c0_51 = arith.constant 0 : index
    %c0_52 = arith.constant 0 : index
    %72 = vector.load %arg8[%c7_50, %c0_51, %c0_52] : memref<12x16x512xbf16, #tpu.memory_space<vmem>>, vector<1x16x512xbf16>
    %73 = vector.shape_cast %72 : vector<1x16x512xbf16> to vector<16x512xbf16>
    %74 = vector.shape_cast %71 : vector<16x512xbf16> to vector<1x16x512xbf16>
    tpu.vector_store %arg8[%c7_50, %c0_51, %c0_52], %74 {strides = array<i32>} : memref<12x16x512xbf16, #tpu.memory_space<vmem>>, vector<1x16x512xbf16>,
    %c8 = arith.constant 8 : index
    %c0_53 = arith.constant 0 : index
    %c0_54 = arith.constant 0 : index
    %75 = vector.load %arg3[%c8, %c0_53, %c0_54] : memref<12x16x29xbf16, #tpu.memory_space<vmem>>, vector<1x16x29xbf16>
    %76 = vector.shape_cast %75 : vector<1x16x29xbf16> to vector<16x29xbf16>
    %cst_55 = arith.constant dense<0.000000e+00> : vector<16x512xf32>
    %77 = tpu.matmul %76, %0, %cst_55 {dimension_numbers = #tpu.dot_dimension_numbers<[1], [0], [0], [1], [0, 0, 1, 1], [], []>} : vector<16x29xbf16>, vector<29x512xbf16>, vector<16x512xf32> -> vector<16x512xf32>
    %78 = vector.broadcast %2 : vector<1x512xf32> to vector<16x512xf32>
    %79 = arith.addf %77, %78 : vector<16x512xf32>
    %80 = arith.truncf %79 : vector<16x512xf32> to vector<16x512xbf16>
    %c8_56 = arith.constant 8 : index
    %c0_57 = arith.constant 0 : index
    %c0_58 = arith.constant 0 : index
    %81 = vector.load %arg8[%c8_56, %c0_57, %c0_58] : memref<12x16x512xbf16, #tpu.memory_space<vmem>>, vector<1x16x512xbf16>
    %82 = vector.shape_cast %81 : vector<1x16x512xbf16> to vector<16x512xbf16>
    %83 = vector.shape_cast %80 : vector<16x512xbf16> to vector<1x16x512xbf16>
    tpu.vector_store %arg8[%c8_56, %c0_57, %c0_58], %83 {strides = array<i32>} : memref<12x16x512xbf16, #tpu.memory_space<vmem>>, vector<1x16x512xbf16>,
    %c9 = arith.constant 9 : index
    %c0_59 = arith.constant 0 : index
    %c0_60 = arith.constant 0 : index
    %84 = vector.load %arg3[%c9, %c0_59, %c0_60] : memref<12x16x29xbf16, #tpu.memory_space<vmem>>, vector<1x16x29xbf16>
    %85 = vector.shape_cast %84 : vector<1x16x29xbf16> to vector<16x29xbf16>
    %cst_61 = arith.constant dense<0.000000e+00> : vector<16x512xf32>
    %86 = tpu.matmul %85, %0, %cst_61 {dimension_numbers = #tpu.dot_dimension_numbers<[1], [0], [0], [1], [0, 0, 1, 1], [], []>} : vector<16x29xbf16>, vector<29x512xbf16>, vector<16x512xf32> -> vector<16x512xf32>
    %87 = vector.broadcast %2 : vector<1x512xf32> to vector<16x512xf32>
    %88 = arith.addf %86, %87 : vector<16x512xf32>
    %89 = arith.truncf %88 : vector<16x512xf32> to vector<16x512xbf16>
    %c9_62 = arith.constant 9 : index
    %c0_63 = arith.constant 0 : index
    %c0_64 = arith.constant 0 : index
    %90 = vector.load %arg8[%c9_62, %c0_63, %c0_64] : memref<12x16x512xbf16, #tpu.memory_space<vmem>>, vector<1x16x512xbf16>
    %91 = vector.shape_cast %90 : vector<1x16x512xbf16> to vector<16x512xbf16>
    %92 = vector.shape_cast %89 : vector<16x512xbf16> to vector<1x16x512xbf16>
    tpu.vector_store %arg8[%c9_62, %c0_63, %c0_64], %92 {strides = array<i32>} : memref<12x16x512xbf16, #tpu.memory_space<vmem>>, vector<1x16x512xbf16>,
    %c10 = arith.constant 10 : index
    %c0_65 = arith.constant 0 : index
    %c0_66 = arith.constant 0 : index
    %93 = vector.load %arg3[%c10, %c0_65, %c0_66] : memref<12x16x29xbf16, #tpu.memory_space<vmem>>, vector<1x16x29xbf16>
    %94 = vector.shape_cast %93 : vector<1x16x29xbf16> to vector<16x29xbf16>
    %cst_67 = arith.constant dense<0.000000e+00> : vector<16x512xf32>
    %95 = tpu.matmul %94, %0, %cst_67 {dimension_numbers = #tpu.dot_dimension_numbers<[1], [0], [0], [1], [0, 0, 1, 1], [], []>} : vector<16x29xbf16>, vector<29x512xbf16>, vector<16x512xf32> -> vector<16x512xf32>
    %96 = vector.broadcast %2 : vector<1x512xf32> to vector<16x512xf32>
    %97 = arith.addf %95, %96 : vector<16x512xf32>
    %98 = arith.truncf %97 : vector<16x512xf32> to vector<16x512xbf16>
    %c10_68 = arith.constant 10 : index
    %c0_69 = arith.constant 0 : index
    %c0_70 = arith.constant 0 : index
    %99 = vector.load %arg8[%c10_68, %c0_69, %c0_70] : memref<12x16x512xbf16, #tpu.memory_space<vmem>>, vector<1x16x512xbf16>
    %100 = vector.shape_cast %99 : vector<1x16x512xbf16> to vector<16x512xbf16>
    %101 = vector.shape_cast %98 : vector<16x512xbf16> to vector<1x16x512xbf16>
    tpu.vector_store %arg8[%c10_68, %c0_69, %c0_70], %101 {strides = array<i32>} : memref<12x16x512xbf16, #tpu.memory_space<vmem>>, vector<1x16x512xbf16>,
    %c11 = arith.constant 11 : index
    %c0_71 = arith.constant 0 : index
    %c0_72 = arith.constant 0 : index
    %102 = vector.load %arg3[%c11, %c0_71, %c0_72] : memref<12x16x29xbf16, #tpu.memory_space<vmem>>, vector<1x16x29xbf16>
    %103 = vector.shape_cast %102 : vector<1x16x29xbf16> to vector<16x29xbf16>
    %cst_73 = arith.constant dense<0.000000e+00> : vector<16x512xf32>
    %104 = tpu.matmul %103, %0, %cst_73 {dimension_numbers = #tpu.dot_dimension_numbers<[1], [0], [0], [1], [0, 0, 1, 1], [], []>} : vector<16x29xbf16>, vector<29x512xbf16>, vector<16x512xf32> -> vector<16x512xf32>
    %105 = vector.broadcast %2 : vector<1x512xf32> to vector<16x512xf32>
    %106 = arith.addf %104, %105 : vector<16x512xf32>
    %107 = arith.truncf %106 : vector<16x512xf32> to vector<16x512xbf16>
    %c11_74 = arith.constant 11 : index
    %c0_75 = arith.constant 0 : index
    %c0_76 = arith.constant 0 : index
    %108 = vector.load %arg8[%c11_74, %c0_75, %c0_76] : memref<12x16x512xbf16, #tpu.memory_space<vmem>>, vector<1x16x512xbf16>
    %109 = vector.shape_cast %108 : vector<1x16x512xbf16> to vector<16x512xbf16>
    %110 = vector.shape_cast %107 : vector<16x512xbf16> to vector<1x16x512xbf16>
    tpu.vector_store %arg8[%c11_74, %c0_75, %c0_76], %110 {strides = array<i32>} : memref<12x16x512xbf16, #tpu.memory_space<vmem>>, vector<1x16x512xbf16>,
    %cst_77 = arith.constant 0.000000e+00 : bf16
    %111 = vector.broadcast %cst_77 : bf16 to vector<16x128xbf16>
    %c0_78 = arith.constant 0 : index
    %c0_79 = arith.constant 0 : index
    %112 = vector.load %arg9[%c0_78, %c0_79] : memref<16x128xbf16, #tpu.memory_space<vmem>>, vector<16x128xbf16>
    tpu.vector_store %arg9[%c0_78, %c0_79], %111 {strides = array<i32>} : memref<16x128xbf16, #tpu.memory_space<vmem>>, vector<16x128xbf16>,
    %cst_80 = arith.constant 0.000000e+00 : f32
    %113 = vector.broadcast %cst_80 : f32 to vector<16x128xf32>
    %c0_81 = arith.constant 0 : index
    %c0_82 = arith.constant 0 : index
    %114 = vector.load %arg10[%c0_81, %c0_82] : memref<16x128xf32, #tpu.memory_space<vmem>>, vector<16x128xf32>
    tpu.vector_store %arg10[%c0_81, %c0_82], %113 {strides = array<i32>} : memref<16x128xf32, #tpu.memory_space<vmem>>, vector<16x128xf32>,
    %cst_83 = arith.constant 0.000000e+00 : f32
    %115 = vector.broadcast %cst_83 : f32 to vector<16x128xf32>
    %c0_84 = arith.constant 0 : index
    %116 = memref.load %arg2[%c0_84] : memref<1xf32, #tpu.memory_space<smem>>
    %117 = vector.broadcast %116 : f32 to vector<16x128xf32>
    %118 = arith.addf %115, %117 : vector<16x128xf32>
    %c0_85 = arith.constant 0 : index
    %c0_86 = arith.constant 0 : index
    %119 = vector.load %arg7[%c0_85, %c0_86] : memref<16x128xf32, #tpu.memory_space<vmem>>, vector<16x128xf32>
    tpu.vector_store %arg7[%c0_85, %c0_86], %118 {strides = array<i32>} : memref<16x128xf32, #tpu.memory_space<vmem>>, vector<16x128xf32>,
    %c0_i32 = arith.constant 0 : i32
    %120 = arith.index_cast %c0_i32 : i32 to index
    %c0_87 = arith.constant 0 : index
    %c0_88 = arith.constant 0 : index
    %121 = vector.load %arg8[%120, %c0_87, %c0_88] : memref<12x16x512xbf16, #tpu.memory_space<vmem>>, vector<1x16x512xbf16>
    %122 = vector.shape_cast %121 : vector<1x16x512xbf16> to vector<16x512xbf16>
    %c0_89 = arith.constant 0 : index
    %c0_90 = arith.constant 0 : index
    %123 = vector.load %arg9[%c0_89, %c0_90] : memref<16x128xbf16, #tpu.memory_space<vmem>>, vector<16x128xbf16>
    %cst_91 = arith.constant dense<0.000000e+00> : vector<16x512xf32>
    %124 = tpu.matmul %123, %1, %cst_91 {dimension_numbers = #tpu.dot_dimension_numbers<[1], [0], [0], [1], [0, 0, 1, 1], [], []>} : vector<16x128xbf16>, vector<128x512xbf16>, vector<16x512xf32> -> vector<16x512xf32>
    %125 = arith.extf %122 : vector<16x512xbf16> to vector<16x512xf32>
    %126 = arith.addf %125, %124 : vector<16x512xf32>
    %127 = arith.truncf %126 : vector<16x512xf32> to vector<16x512xbf16>
    %128 = vector.extract_strided_slice %127 {offsets = [0, 0], sizes = [16, 384], strides = [1, 1]} : vector<16x512xbf16> to vector<16x384xbf16>
    %129 = arith.negf %128 : vector<16x384xbf16>
    %130 = math.exp %129 : vector<16x384xbf16>
    %cst_92 = arith.constant 1.000000e+00 : bf16
    %131 = vector.broadcast %cst_92 : bf16 to vector<16x384xbf16>
    %132 = arith.addf %131, %130 : vector<16x384xbf16>
    %133 = arith.divf %131, %132 : vector<16x384xbf16>
    %134 = vector.extract_strided_slice %127 {offsets = [0, 384], sizes = [16, 128], strides = [1, 1]} : vector<16x512xbf16> to vector<16x128xbf16>
    %135 = math.tanh %134 : vector<16x128xbf16>
    %136 = vector.extract_strided_slice %133 {offsets = [0, 0], sizes = [16, 128], strides = [1, 1]} : vector<16x384xbf16> to vector<16x128xbf16>
    %137 = vector.extract_strided_slice %133 {offsets = [0, 128], sizes = [16, 128], strides = [1, 1]} : vector<16x384xbf16> to vector<16x128xbf16>
    %138 = vector.extract_strided_slice %133 {offsets = [0, 256], sizes = [16, 128], strides = [1, 1]} : vector<16x384xbf16> to vector<16x128xbf16>
    %c0_93 = arith.constant 0 : index
    %c0_94 = arith.constant 0 : index
    %139 = vector.load %arg10[%c0_93, %c0_94] : memref<16x128xf32, #tpu.memory_space<vmem>>, vector<16x128xf32>
    %140 = arith.extf %137 : vector<16x128xbf16> to vector<16x128xf32>
    %141 = arith.mulf %140, %139 : vector<16x128xf32>
    %142 = arith.mulf %136, %135 : vector<16x128xbf16>
    %143 = arith.extf %142 : vector<16x128xbf16> to vector<16x128xf32>
    %144 = arith.addf %141, %143 : vector<16x128xf32>
    %145 = arith.truncf %144 : vector<16x128xf32> to vector<16x128xbf16>
    %146 = math.tanh %145 : vector<16x128xbf16>
    %147 = arith.mulf %138, %146 : vector<16x128xbf16>
    %c0_95 = arith.constant 0 : index
    %c0_96 = arith.constant 0 : index
    %148 = vector.load %arg10[%c0_95, %c0_96] : memref<16x128xf32, #tpu.memory_space<vmem>>, vector<16x128xf32>
    tpu.vector_store %arg10[%c0_95, %c0_96], %144 {strides = array<i32>} : memref<16x128xf32, #tpu.memory_space<vmem>>, vector<16x128xf32>,
    %c0_97 = arith.constant 0 : index
    %c0_98 = arith.constant 0 : index
    %149 = vector.load %arg9[%c0_97, %c0_98] : memref<16x128xbf16, #tpu.memory_space<vmem>>, vector<16x128xbf16>
    tpu.vector_store %arg9[%c0_97, %c0_98], %147 {strides = array<i32>} : memref<16x128xbf16, #tpu.memory_space<vmem>>, vector<16x128xbf16>,
    %c0_99 = arith.constant 0 : index
    %c0_100 = arith.constant 0 : index
    %150 = vector.load %arg7[%c0_99, %c0_100] : memref<16x128xf32, #tpu.memory_space<vmem>>, vector<16x128xf32>
    %151 = arith.index_cast %c0_i32 : i32 to index
    %152 = memref.load %arg1[%151] : memref<12xf32, #tpu.memory_space<smem>>
    %153 = arith.extf %147 : vector<16x128xbf16> to vector<16x128xf32>
    %154 = vector.broadcast %152 : f32 to vector<16x128xf32>
    %155 = arith.mulf %154, %153 : vector<16x128xf32>
    %156 = arith.addf %150, %155 : vector<16x128xf32>
    %c0_101 = arith.constant 0 : index
    %c0_102 = arith.constant 0 : index
    %157 = vector.load %arg7[%c0_101, %c0_102] : memref<16x128xf32, #tpu.memory_space<vmem>>, vector<16x128xf32>
    tpu.vector_store %arg7[%c0_101, %c0_102], %156 {strides = array<i32>} : memref<16x128xf32, #tpu.memory_space<vmem>>, vector<16x128xf32>,
    %c1_i32 = arith.constant 1 : i32
    %158 = arith.index_cast %c1_i32 : i32 to index
    %c0_103 = arith.constant 0 : index
    %c0_104 = arith.constant 0 : index
    %159 = vector.load %arg8[%158, %c0_103, %c0_104] : memref<12x16x512xbf16, #tpu.memory_space<vmem>>, vector<1x16x512xbf16>
    %160 = vector.shape_cast %159 : vector<1x16x512xbf16> to vector<16x512xbf16>
    %c0_105 = arith.constant 0 : index
    %c0_106 = arith.constant 0 : index
    %161 = vector.load %arg9[%c0_105, %c0_106] : memref<16x128xbf16, #tpu.memory_space<vmem>>, vector<16x128xbf16>
    %cst_107 = arith.constant dense<0.000000e+00> : vector<16x512xf32>
    %162 = tpu.matmul %161, %1, %cst_107 {dimension_numbers = #tpu.dot_dimension_numbers<[1], [0], [0], [1], [0, 0, 1, 1], [], []>} : vector<16x128xbf16>, vector<128x512xbf16>, vector<16x512xf32> -> vector<16x512xf32>
    %163 = arith.extf %160 : vector<16x512xbf16> to vector<16x512xf32>
    %164 = arith.addf %163, %162 : vector<16x512xf32>
    %165 = arith.truncf %164 : vector<16x512xf32> to vector<16x512xbf16>
    %166 = vector.extract_strided_slice %165 {offsets = [0, 0], sizes = [16, 384], strides = [1, 1]} : vector<16x512xbf16> to vector<16x384xbf16>
    %167 = arith.negf %166 : vector<16x384xbf16>
    %168 = math.exp %167 : vector<16x384xbf16>
    %cst_108 = arith.constant 1.000000e+00 : bf16
    %169 = vector.broadcast %cst_108 : bf16 to vector<16x384xbf16>
    %170 = arith.addf %169, %168 : vector<16x384xbf16>
    %171 = arith.divf %169, %170 : vector<16x384xbf16>
    %172 = vector.extract_strided_slice %165 {offsets = [0, 384], sizes = [16, 128], strides = [1, 1]} : vector<16x512xbf16> to vector<16x128xbf16>
    %173 = math.tanh %172 : vector<16x128xbf16>
    %174 = vector.extract_strided_slice %171 {offsets = [0, 0], sizes = [16, 128], strides = [1, 1]} : vector<16x384xbf16> to vector<16x128xbf16>
    %175 = vector.extract_strided_slice %171 {offsets = [0, 128], sizes = [16, 128], strides = [1, 1]} : vector<16x384xbf16> to vector<16x128xbf16>
    %176 = vector.extract_strided_slice %171 {offsets = [0, 256], sizes = [16, 128], strides = [1, 1]} : vector<16x384xbf16> to vector<16x128xbf16>
    %c0_109 = arith.constant 0 : index
    %c0_110 = arith.constant 0 : index
    %177 = vector.load %arg10[%c0_109, %c0_110] : memref<16x128xf32, #tpu.memory_space<vmem>>, vector<16x128xf32>
    %178 = arith.extf %175 : vector<16x128xbf16> to vector<16x128xf32>
    %179 = arith.mulf %178, %177 : vector<16x128xf32>
    %180 = arith.mulf %174, %173 : vector<16x128xbf16>
    %181 = arith.extf %180 : vector<16x128xbf16> to vector<16x128xf32>
    %182 = arith.addf %179, %181 : vector<16x128xf32>
    %183 = arith.truncf %182 : vector<16x128xf32> to vector<16x128xbf16>
    %184 = math.tanh %183 : vector<16x128xbf16>
    %185 = arith.mulf %176, %184 : vector<16x128xbf16>
    %c0_111 = arith.constant 0 : index
    %c0_112 = arith.constant 0 : index
    %186 = vector.load %arg10[%c0_111, %c0_112] : memref<16x128xf32, #tpu.memory_space<vmem>>, vector<16x128xf32>
    tpu.vector_store %arg10[%c0_111, %c0_112], %182 {strides = array<i32>} : memref<16x128xf32, #tpu.memory_space<vmem>>, vector<16x128xf32>,
    %c0_113 = arith.constant 0 : index
    %c0_114 = arith.constant 0 : index
    %187 = vector.load %arg9[%c0_113, %c0_114] : memref<16x128xbf16, #tpu.memory_space<vmem>>, vector<16x128xbf16>
    tpu.vector_store %arg9[%c0_113, %c0_114], %185 {strides = array<i32>} : memref<16x128xbf16, #tpu.memory_space<vmem>>, vector<16x128xbf16>,
    %c0_115 = arith.constant 0 : index
    %c0_116 = arith.constant 0 : index
    %188 = vector.load %arg7[%c0_115, %c0_116] : memref<16x128xf32, #tpu.memory_space<vmem>>, vector<16x128xf32>
    %189 = arith.index_cast %c1_i32 : i32 to index
    %190 = memref.load %arg1[%189] : memref<12xf32, #tpu.memory_space<smem>>
    %191 = arith.extf %185 : vector<16x128xbf16> to vector<16x128xf32>
    %192 = vector.broadcast %190 : f32 to vector<16x128xf32>
    %193 = arith.mulf %192, %191 : vector<16x128xf32>
    %194 = arith.addf %188, %193 : vector<16x128xf32>
    %c0_117 = arith.constant 0 : index
    %c0_118 = arith.constant 0 : index
    %195 = vector.load %arg7[%c0_117, %c0_118] : memref<16x128xf32, #tpu.memory_space<vmem>>, vector<16x128xf32>
    tpu.vector_store %arg7[%c0_117, %c0_118], %194 {strides = array<i32>} : memref<16x128xf32, #tpu.memory_space<vmem>>, vector<16x128xf32>,
    %c2_i32 = arith.constant 2 : i32
    %196 = arith.index_cast %c2_i32 : i32 to index
    %c0_119 = arith.constant 0 : index
    %c0_120 = arith.constant 0 : index
    %197 = vector.load %arg8[%196, %c0_119, %c0_120] : memref<12x16x512xbf16, #tpu.memory_space<vmem>>, vector<1x16x512xbf16>
    %198 = vector.shape_cast %197 : vector<1x16x512xbf16> to vector<16x512xbf16>
    %c0_121 = arith.constant 0 : index
    %c0_122 = arith.constant 0 : index
    %199 = vector.load %arg9[%c0_121, %c0_122] : memref<16x128xbf16, #tpu.memory_space<vmem>>, vector<16x128xbf16>
    %cst_123 = arith.constant dense<0.000000e+00> : vector<16x512xf32>
    %200 = tpu.matmul %199, %1, %cst_123 {dimension_numbers = #tpu.dot_dimension_numbers<[1], [0], [0], [1], [0, 0, 1, 1], [], []>} : vector<16x128xbf16>, vector<128x512xbf16>, vector<16x512xf32> -> vector<16x512xf32>
    %201 = arith.extf %198 : vector<16x512xbf16> to vector<16x512xf32>
    %202 = arith.addf %201, %200 : vector<16x512xf32>
    %203 = arith.truncf %202 : vector<16x512xf32> to vector<16x512xbf16>
    %204 = vector.extract_strided_slice %203 {offsets = [0, 0], sizes = [16, 384], strides = [1, 1]} : vector<16x512xbf16> to vector<16x384xbf16>
    %205 = arith.negf %204 : vector<16x384xbf16>
    %206 = math.exp %205 : vector<16x384xbf16>
    %cst_124 = arith.constant 1.000000e+00 : bf16
    %207 = vector.broadcast %cst_124 : bf16 to vector<16x384xbf16>
    %208 = arith.addf %207, %206 : vector<16x384xbf16>
    %209 = arith.divf %207, %208 : vector<16x384xbf16>
    %210 = vector.extract_strided_slice %203 {offsets = [0, 384], sizes = [16, 128], strides = [1, 1]} : vector<16x512xbf16> to vector<16x128xbf16>
    %211 = math.tanh %210 : vector<16x128xbf16>
    %212 = vector.extract_strided_slice %209 {offsets = [0, 0], sizes = [16, 128], strides = [1, 1]} : vector<16x384xbf16> to vector<16x128xbf16>
    %213 = vector.extract_strided_slice %209 {offsets = [0, 128], sizes = [16, 128], strides = [1, 1]} : vector<16x384xbf16> to vector<16x128xbf16>
    %214 = vector.extract_strided_slice %209 {offsets = [0, 256], sizes = [16, 128], strides = [1, 1]} : vector<16x384xbf16> to vector<16x128xbf16>
    %c0_125 = arith.constant 0 : index
    %c0_126 = arith.constant 0 : index
    %215 = vector.load %arg10[%c0_125, %c0_126] : memref<16x128xf32, #tpu.memory_space<vmem>>, vector<16x128xf32>
    %216 = arith.extf %213 : vector<16x128xbf16> to vector<16x128xf32>
    %217 = arith.mulf %216, %215 : vector<16x128xf32>
    %218 = arith.mulf %212, %211 : vector<16x128xbf16>
    %219 = arith.extf %218 : vector<16x128xbf16> to vector<16x128xf32>
    %220 = arith.addf %217, %219 : vector<16x128xf32>
    %221 = arith.truncf %220 : vector<16x128xf32> to vector<16x128xbf16>
    %222 = math.tanh %221 : vector<16x128xbf16>
    %223 = arith.mulf %214, %222 : vector<16x128xbf16>
    %c0_127 = arith.constant 0 : index
    %c0_128 = arith.constant 0 : index
    %224 = vector.load %arg10[%c0_127, %c0_128] : memref<16x128xf32, #tpu.memory_space<vmem>>, vector<16x128xf32>
    tpu.vector_store %arg10[%c0_127, %c0_128], %220 {strides = array<i32>} : memref<16x128xf32, #tpu.memory_space<vmem>>, vector<16x128xf32>,
    %c0_129 = arith.constant 0 : index
    %c0_130 = arith.constant 0 : index
    %225 = vector.load %arg9[%c0_129, %c0_130] : memref<16x128xbf16, #tpu.memory_space<vmem>>, vector<16x128xbf16>
    tpu.vector_store %arg9[%c0_129, %c0_130], %223 {strides = array<i32>} : memref<16x128xbf16, #tpu.memory_space<vmem>>, vector<16x128xbf16>,
    %c0_131 = arith.constant 0 : index
    %c0_132 = arith.constant 0 : index
    %226 = vector.load %arg7[%c0_131, %c0_132] : memref<16x128xf32, #tpu.memory_space<vmem>>, vector<16x128xf32>
    %227 = arith.index_cast %c2_i32 : i32 to index
    %228 = memref.load %arg1[%227] : memref<12xf32, #tpu.memory_space<smem>>
    %229 = arith.extf %223 : vector<16x128xbf16> to vector<16x128xf32>
    %230 = vector.broadcast %228 : f32 to vector<16x128xf32>
    %231 = arith.mulf %230, %229 : vector<16x128xf32>
    %232 = arith.addf %226, %231 : vector<16x128xf32>
    %c0_133 = arith.constant 0 : index
    %c0_134 = arith.constant 0 : index
    %233 = vector.load %arg7[%c0_133, %c0_134] : memref<16x128xf32, #tpu.memory_space<vmem>>, vector<16x128xf32>
    tpu.vector_store %arg7[%c0_133, %c0_134], %232 {strides = array<i32>} : memref<16x128xf32, #tpu.memory_space<vmem>>, vector<16x128xf32>,
    %c3_i32 = arith.constant 3 : i32
    %234 = arith.index_cast %c3_i32 : i32 to index
    %c0_135 = arith.constant 0 : index
    %c0_136 = arith.constant 0 : index
    %235 = vector.load %arg8[%234, %c0_135, %c0_136] : memref<12x16x512xbf16, #tpu.memory_space<vmem>>, vector<1x16x512xbf16>
    %236 = vector.shape_cast %235 : vector<1x16x512xbf16> to vector<16x512xbf16>
    %c0_137 = arith.constant 0 : index
    %c0_138 = arith.constant 0 : index
    %237 = vector.load %arg9[%c0_137, %c0_138] : memref<16x128xbf16, #tpu.memory_space<vmem>>, vector<16x128xbf16>
    %cst_139 = arith.constant dense<0.000000e+00> : vector<16x512xf32>
    %238 = tpu.matmul %237, %1, %cst_139 {dimension_numbers = #tpu.dot_dimension_numbers<[1], [0], [0], [1], [0, 0, 1, 1], [], []>} : vector<16x128xbf16>, vector<128x512xbf16>, vector<16x512xf32> -> vector<16x512xf32>
    %239 = arith.extf %236 : vector<16x512xbf16> to vector<16x512xf32>
    %240 = arith.addf %239, %238 : vector<16x512xf32>
    %241 = arith.truncf %240 : vector<16x512xf32> to vector<16x512xbf16>
    %242 = vector.extract_strided_slice %241 {offsets = [0, 0], sizes = [16, 384], strides = [1, 1]} : vector<16x512xbf16> to vector<16x384xbf16>
    %243 = arith.negf %242 : vector<16x384xbf16>
    %244 = math.exp %243 : vector<16x384xbf16>
    %cst_140 = arith.constant 1.000000e+00 : bf16
    %245 = vector.broadcast %cst_140 : bf16 to vector<16x384xbf16>
    %246 = arith.addf %245, %244 : vector<16x384xbf16>
    %247 = arith.divf %245, %246 : vector<16x384xbf16>
    %248 = vector.extract_strided_slice %241 {offsets = [0, 384], sizes = [16, 128], strides = [1, 1]} : vector<16x512xbf16> to vector<16x128xbf16>
    %249 = math.tanh %248 : vector<16x128xbf16>
    %250 = vector.extract_strided_slice %247 {offsets = [0, 0], sizes = [16, 128], strides = [1, 1]} : vector<16x384xbf16> to vector<16x128xbf16>
    %251 = vector.extract_strided_slice %247 {offsets = [0, 128], sizes = [16, 128], strides = [1, 1]} : vector<16x384xbf16> to vector<16x128xbf16>
    %252 = vector.extract_strided_slice %247 {offsets = [0, 256], sizes = [16, 128], strides = [1, 1]} : vector<16x384xbf16> to vector<16x128xbf16>
    %c0_141 = arith.constant 0 : index
    %c0_142 = arith.constant 0 : index
    %253 = vector.load %arg10[%c0_141, %c0_142] : memref<16x128xf32, #tpu.memory_space<vmem>>, vector<16x128xf32>
    %254 = arith.extf %251 : vector<16x128xbf16> to vector<16x128xf32>
    %255 = arith.mulf %254, %253 : vector<16x128xf32>
    %256 = arith.mulf %250, %249 : vector<16x128xbf16>
    %257 = arith.extf %256 : vector<16x128xbf16> to vector<16x128xf32>
    %258 = arith.addf %255, %257 : vector<16x128xf32>
    %259 = arith.truncf %258 : vector<16x128xf32> to vector<16x128xbf16>
    %260 = math.tanh %259 : vector<16x128xbf16>
    %261 = arith.mulf %252, %260 : vector<16x128xbf16>
    %c0_143 = arith.constant 0 : index
    %c0_144 = arith.constant 0 : index
    %262 = vector.load %arg10[%c0_143, %c0_144] : memref<16x128xf32, #tpu.memory_space<vmem>>, vector<16x128xf32>
    tpu.vector_store %arg10[%c0_143, %c0_144], %258 {strides = array<i32>} : memref<16x128xf32, #tpu.memory_space<vmem>>, vector<16x128xf32>,
    %c0_145 = arith.constant 0 : index
    %c0_146 = arith.constant 0 : index
    %263 = vector.load %arg9[%c0_145, %c0_146] : memref<16x128xbf16, #tpu.memory_space<vmem>>, vector<16x128xbf16>
    tpu.vector_store %arg9[%c0_145, %c0_146], %261 {strides = array<i32>} : memref<16x128xbf16, #tpu.memory_space<vmem>>, vector<16x128xbf16>,
    %c0_147 = arith.constant 0 : index
    %c0_148 = arith.constant 0 : index
    %264 = vector.load %arg7[%c0_147, %c0_148] : memref<16x128xf32, #tpu.memory_space<vmem>>, vector<16x128xf32>
    %265 = arith.index_cast %c3_i32 : i32 to index
    %266 = memref.load %arg1[%265] : memref<12xf32, #tpu.memory_space<smem>>
    %267 = arith.extf %261 : vector<16x128xbf16> to vector<16x128xf32>
    %268 = vector.broadcast %266 : f32 to vector<16x128xf32>
    %269 = arith.mulf %268, %267 : vector<16x128xf32>
    %270 = arith.addf %264, %269 : vector<16x128xf32>
    %c0_149 = arith.constant 0 : index
    %c0_150 = arith.constant 0 : index
    %271 = vector.load %arg7[%c0_149, %c0_150] : memref<16x128xf32, #tpu.memory_space<vmem>>, vector<16x128xf32>
    tpu.vector_store %arg7[%c0_149, %c0_150], %270 {strides = array<i32>} : memref<16x128xf32, #tpu.memory_space<vmem>>, vector<16x128xf32>,
    %c4_i32 = arith.constant 4 : i32
    %272 = arith.index_cast %c4_i32 : i32 to index
    %c0_151 = arith.constant 0 : index
    %c0_152 = arith.constant 0 : index
    %273 = vector.load %arg8[%272, %c0_151, %c0_152] : memref<12x16x512xbf16, #tpu.memory_space<vmem>>, vector<1x16x512xbf16>
    %274 = vector.shape_cast %273 : vector<1x16x512xbf16> to vector<16x512xbf16>
    %c0_153 = arith.constant 0 : index
    %c0_154 = arith.constant 0 : index
    %275 = vector.load %arg9[%c0_153, %c0_154] : memref<16x128xbf16, #tpu.memory_space<vmem>>, vector<16x128xbf16>
    %cst_155 = arith.constant dense<0.000000e+00> : vector<16x512xf32>
    %276 = tpu.matmul %275, %1, %cst_155 {dimension_numbers = #tpu.dot_dimension_numbers<[1], [0], [0], [1], [0, 0, 1, 1], [], []>} : vector<16x128xbf16>, vector<128x512xbf16>, vector<16x512xf32> -> vector<16x512xf32>
    %277 = arith.extf %274 : vector<16x512xbf16> to vector<16x512xf32>
    %278 = arith.addf %277, %276 : vector<16x512xf32>
    %279 = arith.truncf %278 : vector<16x512xf32> to vector<16x512xbf16>
    %280 = vector.extract_strided_slice %279 {offsets = [0, 0], sizes = [16, 384], strides = [1, 1]} : vector<16x512xbf16> to vector<16x384xbf16>
    %281 = arith.negf %280 : vector<16x384xbf16>
    %282 = math.exp %281 : vector<16x384xbf16>
    %cst_156 = arith.constant 1.000000e+00 : bf16
    %283 = vector.broadcast %cst_156 : bf16 to vector<16x384xbf16>
    %284 = arith.addf %283, %282 : vector<16x384xbf16>
    %285 = arith.divf %283, %284 : vector<16x384xbf16>
    %286 = vector.extract_strided_slice %279 {offsets = [0, 384], sizes = [16, 128], strides = [1, 1]} : vector<16x512xbf16> to vector<16x128xbf16>
    %287 = math.tanh %286 : vector<16x128xbf16>
    %288 = vector.extract_strided_slice %285 {offsets = [0, 0], sizes = [16, 128], strides = [1, 1]} : vector<16x384xbf16> to vector<16x128xbf16>
    %289 = vector.extract_strided_slice %285 {offsets = [0, 128], sizes = [16, 128], strides = [1, 1]} : vector<16x384xbf16> to vector<16x128xbf16>
    %290 = vector.extract_strided_slice %285 {offsets = [0, 256], sizes = [16, 128], strides = [1, 1]} : vector<16x384xbf16> to vector<16x128xbf16>
    %c0_157 = arith.constant 0 : index
    %c0_158 = arith.constant 0 : index
    %291 = vector.load %arg10[%c0_157, %c0_158] : memref<16x128xf32, #tpu.memory_space<vmem>>, vector<16x128xf32>
    %292 = arith.extf %289 : vector<16x128xbf16> to vector<16x128xf32>
    %293 = arith.mulf %292, %291 : vector<16x128xf32>
    %294 = arith.mulf %288, %287 : vector<16x128xbf16>
    %295 = arith.extf %294 : vector<16x128xbf16> to vector<16x128xf32>
    %296 = arith.addf %293, %295 : vector<16x128xf32>
    %297 = arith.truncf %296 : vector<16x128xf32> to vector<16x128xbf16>
    %298 = math.tanh %297 : vector<16x128xbf16>
    %299 = arith.mulf %290, %298 : vector<16x128xbf16>
    %c0_159 = arith.constant 0 : index
    %c0_160 = arith.constant 0 : index
    %300 = vector.load %arg10[%c0_159, %c0_160] : memref<16x128xf32, #tpu.memory_space<vmem>>, vector<16x128xf32>
    tpu.vector_store %arg10[%c0_159, %c0_160], %296 {strides = array<i32>} : memref<16x128xf32, #tpu.memory_space<vmem>>, vector<16x128xf32>,
    %c0_161 = arith.constant 0 : index
    %c0_162 = arith.constant 0 : index
    %301 = vector.load %arg9[%c0_161, %c0_162] : memref<16x128xbf16, #tpu.memory_space<vmem>>, vector<16x128xbf16>
    tpu.vector_store %arg9[%c0_161, %c0_162], %299 {strides = array<i32>} : memref<16x128xbf16, #tpu.memory_space<vmem>>, vector<16x128xbf16>,
    %c0_163 = arith.constant 0 : index
    %c0_164 = arith.constant 0 : index
    %302 = vector.load %arg7[%c0_163, %c0_164] : memref<16x128xf32, #tpu.memory_space<vmem>>, vector<16x128xf32>
    %303 = arith.index_cast %c4_i32 : i32 to index
    %304 = memref.load %arg1[%303] : memref<12xf32, #tpu.memory_space<smem>>
    %305 = arith.extf %299 : vector<16x128xbf16> to vector<16x128xf32>
    %306 = vector.broadcast %304 : f32 to vector<16x128xf32>
    %307 = arith.mulf %306, %305 : vector<16x128xf32>
    %308 = arith.addf %302, %307 : vector<16x128xf32>
    %c0_165 = arith.constant 0 : index
    %c0_166 = arith.constant 0 : index
    %309 = vector.load %arg7[%c0_165, %c0_166] : memref<16x128xf32, #tpu.memory_space<vmem>>, vector<16x128xf32>
    tpu.vector_store %arg7[%c0_165, %c0_166], %308 {strides = array<i32>} : memref<16x128xf32, #tpu.memory_space<vmem>>, vector<16x128xf32>,
    %c5_i32 = arith.constant 5 : i32
    %310 = arith.index_cast %c5_i32 : i32 to index
    %c0_167 = arith.constant 0 : index
    %c0_168 = arith.constant 0 : index
    %311 = vector.load %arg8[%310, %c0_167, %c0_168] : memref<12x16x512xbf16, #tpu.memory_space<vmem>>, vector<1x16x512xbf16>
    %312 = vector.shape_cast %311 : vector<1x16x512xbf16> to vector<16x512xbf16>
    %c0_169 = arith.constant 0 : index
    %c0_170 = arith.constant 0 : index
    %313 = vector.load %arg9[%c0_169, %c0_170] : memref<16x128xbf16, #tpu.memory_space<vmem>>, vector<16x128xbf16>
    %cst_171 = arith.constant dense<0.000000e+00> : vector<16x512xf32>
    %314 = tpu.matmul %313, %1, %cst_171 {dimension_numbers = #tpu.dot_dimension_numbers<[1], [0], [0], [1], [0, 0, 1, 1], [], []>} : vector<16x128xbf16>, vector<128x512xbf16>, vector<16x512xf32> -> vector<16x512xf32>
    %315 = arith.extf %312 : vector<16x512xbf16> to vector<16x512xf32>
    %316 = arith.addf %315, %314 : vector<16x512xf32>
    %317 = arith.truncf %316 : vector<16x512xf32> to vector<16x512xbf16>
    %318 = vector.extract_strided_slice %317 {offsets = [0, 0], sizes = [16, 384], strides = [1, 1]} : vector<16x512xbf16> to vector<16x384xbf16>
    %319 = arith.negf %318 : vector<16x384xbf16>
    %320 = math.exp %319 : vector<16x384xbf16>
    %cst_172 = arith.constant 1.000000e+00 : bf16
    %321 = vector.broadcast %cst_172 : bf16 to vector<16x384xbf16>
    %322 = arith.addf %321, %320 : vector<16x384xbf16>
    %323 = arith.divf %321, %322 : vector<16x384xbf16>
    %324 = vector.extract_strided_slice %317 {offsets = [0, 384], sizes = [16, 128], strides = [1, 1]} : vector<16x512xbf16> to vector<16x128xbf16>
    %325 = math.tanh %324 : vector<16x128xbf16>
    %326 = vector.extract_strided_slice %323 {offsets = [0, 0], sizes = [16, 128], strides = [1, 1]} : vector<16x384xbf16> to vector<16x128xbf16>
    %327 = vector.extract_strided_slice %323 {offsets = [0, 128], sizes = [16, 128], strides = [1, 1]} : vector<16x384xbf16> to vector<16x128xbf16>
    %328 = vector.extract_strided_slice %323 {offsets = [0, 256], sizes = [16, 128], strides = [1, 1]} : vector<16x384xbf16> to vector<16x128xbf16>
    %c0_173 = arith.constant 0 : index
    %c0_174 = arith.constant 0 : index
    %329 = vector.load %arg10[%c0_173, %c0_174] : memref<16x128xf32, #tpu.memory_space<vmem>>, vector<16x128xf32>
    %330 = arith.extf %327 : vector<16x128xbf16> to vector<16x128xf32>
    %331 = arith.mulf %330, %329 : vector<16x128xf32>
    %332 = arith.mulf %326, %325 : vector<16x128xbf16>
    %333 = arith.extf %332 : vector<16x128xbf16> to vector<16x128xf32>
    %334 = arith.addf %331, %333 : vector<16x128xf32>
    %335 = arith.truncf %334 : vector<16x128xf32> to vector<16x128xbf16>
    %336 = math.tanh %335 : vector<16x128xbf16>
    %337 = arith.mulf %328, %336 : vector<16x128xbf16>
    %c0_175 = arith.constant 0 : index
    %c0_176 = arith.constant 0 : index
    %338 = vector.load %arg10[%c0_175, %c0_176] : memref<16x128xf32, #tpu.memory_space<vmem>>, vector<16x128xf32>
    tpu.vector_store %arg10[%c0_175, %c0_176], %334 {strides = array<i32>} : memref<16x128xf32, #tpu.memory_space<vmem>>, vector<16x128xf32>,
    %c0_177 = arith.constant 0 : index
    %c0_178 = arith.constant 0 : index
    %339 = vector.load %arg9[%c0_177, %c0_178] : memref<16x128xbf16, #tpu.memory_space<vmem>>, vector<16x128xbf16>
    tpu.vector_store %arg9[%c0_177, %c0_178], %337 {strides = array<i32>} : memref<16x128xbf16, #tpu.memory_space<vmem>>, vector<16x128xbf16>,
    %c0_179 = arith.constant 0 : index
    %c0_180 = arith.constant 0 : index
    %340 = vector.load %arg7[%c0_179, %c0_180] : memref<16x128xf32, #tpu.memory_space<vmem>>, vector<16x128xf32>
    %341 = arith.index_cast %c5_i32 : i32 to index
    %342 = memref.load %arg1[%341] : memref<12xf32, #tpu.memory_space<smem>>
    %343 = arith.extf %337 : vector<16x128xbf16> to vector<16x128xf32>
    %344 = vector.broadcast %342 : f32 to vector<16x128xf32>
    %345 = arith.mulf %344, %343 : vector<16x128xf32>
    %346 = arith.addf %340, %345 : vector<16x128xf32>
    %c0_181 = arith.constant 0 : index
    %c0_182 = arith.constant 0 : index
    %347 = vector.load %arg7[%c0_181, %c0_182] : memref<16x128xf32, #tpu.memory_space<vmem>>, vector<16x128xf32>
    tpu.vector_store %arg7[%c0_181, %c0_182], %346 {strides = array<i32>} : memref<16x128xf32, #tpu.memory_space<vmem>>, vector<16x128xf32>,
    %c6_i32 = arith.constant 6 : i32
    %348 = arith.index_cast %c6_i32 : i32 to index
    %c0_183 = arith.constant 0 : index
    %c0_184 = arith.constant 0 : index
    %349 = vector.load %arg8[%348, %c0_183, %c0_184] : memref<12x16x512xbf16, #tpu.memory_space<vmem>>, vector<1x16x512xbf16>
    %350 = vector.shape_cast %349 : vector<1x16x512xbf16> to vector<16x512xbf16>
    %c0_185 = arith.constant 0 : index
    %c0_186 = arith.constant 0 : index
    %351 = vector.load %arg9[%c0_185, %c0_186] : memref<16x128xbf16, #tpu.memory_space<vmem>>, vector<16x128xbf16>
    %cst_187 = arith.constant dense<0.000000e+00> : vector<16x512xf32>
    %352 = tpu.matmul %351, %1, %cst_187 {dimension_numbers = #tpu.dot_dimension_numbers<[1], [0], [0], [1], [0, 0, 1, 1], [], []>} : vector<16x128xbf16>, vector<128x512xbf16>, vector<16x512xf32> -> vector<16x512xf32>
    %353 = arith.extf %350 : vector<16x512xbf16> to vector<16x512xf32>
    %354 = arith.addf %353, %352 : vector<16x512xf32>
    %355 = arith.truncf %354 : vector<16x512xf32> to vector<16x512xbf16>
    %356 = vector.extract_strided_slice %355 {offsets = [0, 0], sizes = [16, 384], strides = [1, 1]} : vector<16x512xbf16> to vector<16x384xbf16>
    %357 = arith.negf %356 : vector<16x384xbf16>
    %358 = math.exp %357 : vector<16x384xbf16>
    %cst_188 = arith.constant 1.000000e+00 : bf16
    %359 = vector.broadcast %cst_188 : bf16 to vector<16x384xbf16>
    %360 = arith.addf %359, %358 : vector<16x384xbf16>
    %361 = arith.divf %359, %360 : vector<16x384xbf16>
    %362 = vector.extract_strided_slice %355 {offsets = [0, 384], sizes = [16, 128], strides = [1, 1]} : vector<16x512xbf16> to vector<16x128xbf16>
    %363 = math.tanh %362 : vector<16x128xbf16>
    %364 = vector.extract_strided_slice %361 {offsets = [0, 0], sizes = [16, 128], strides = [1, 1]} : vector<16x384xbf16> to vector<16x128xbf16>
    %365 = vector.extract_strided_slice %361 {offsets = [0, 128], sizes = [16, 128], strides = [1, 1]} : vector<16x384xbf16> to vector<16x128xbf16>
    %366 = vector.extract_strided_slice %361 {offsets = [0, 256], sizes = [16, 128], strides = [1, 1]} : vector<16x384xbf16> to vector<16x128xbf16>
    %c0_189 = arith.constant 0 : index
    %c0_190 = arith.constant 0 : index
    %367 = vector.load %arg10[%c0_189, %c0_190] : memref<16x128xf32, #tpu.memory_space<vmem>>, vector<16x128xf32>
    %368 = arith.extf %365 : vector<16x128xbf16> to vector<16x128xf32>
    %369 = arith.mulf %368, %367 : vector<16x128xf32>
    %370 = arith.mulf %364, %363 : vector<16x128xbf16>
    %371 = arith.extf %370 : vector<16x128xbf16> to vector<16x128xf32>
    %372 = arith.addf %369, %371 : vector<16x128xf32>
    %373 = arith.truncf %372 : vector<16x128xf32> to vector<16x128xbf16>
    %374 = math.tanh %373 : vector<16x128xbf16>
    %375 = arith.mulf %366, %374 : vector<16x128xbf16>
    %c0_191 = arith.constant 0 : index
    %c0_192 = arith.constant 0 : index
    %376 = vector.load %arg10[%c0_191, %c0_192] : memref<16x128xf32, #tpu.memory_space<vmem>>, vector<16x128xf32>
    tpu.vector_store %arg10[%c0_191, %c0_192], %372 {strides = array<i32>} : memref<16x128xf32, #tpu.memory_space<vmem>>, vector<16x128xf32>,
    %c0_193 = arith.constant 0 : index
    %c0_194 = arith.constant 0 : index
    %377 = vector.load %arg9[%c0_193, %c0_194] : memref<16x128xbf16, #tpu.memory_space<vmem>>, vector<16x128xbf16>
    tpu.vector_store %arg9[%c0_193, %c0_194], %375 {strides = array<i32>} : memref<16x128xbf16, #tpu.memory_space<vmem>>, vector<16x128xbf16>,
    %c0_195 = arith.constant 0 : index
    %c0_196 = arith.constant 0 : index
    %378 = vector.load %arg7[%c0_195, %c0_196] : memref<16x128xf32, #tpu.memory_space<vmem>>, vector<16x128xf32>
    %379 = arith.index_cast %c6_i32 : i32 to index
    %380 = memref.load %arg1[%379] : memref<12xf32, #tpu.memory_space<smem>>
    %381 = arith.extf %375 : vector<16x128xbf16> to vector<16x128xf32>
    %382 = vector.broadcast %380 : f32 to vector<16x128xf32>
    %383 = arith.mulf %382, %381 : vector<16x128xf32>
    %384 = arith.addf %378, %383 : vector<16x128xf32>
    %c0_197 = arith.constant 0 : index
    %c0_198 = arith.constant 0 : index
    %385 = vector.load %arg7[%c0_197, %c0_198] : memref<16x128xf32, #tpu.memory_space<vmem>>, vector<16x128xf32>
    tpu.vector_store %arg7[%c0_197, %c0_198], %384 {strides = array<i32>} : memref<16x128xf32, #tpu.memory_space<vmem>>, vector<16x128xf32>,
    %c7_i32 = arith.constant 7 : i32
    %386 = arith.index_cast %c7_i32 : i32 to index
    %c0_199 = arith.constant 0 : index
    %c0_200 = arith.constant 0 : index
    %387 = vector.load %arg8[%386, %c0_199, %c0_200] : memref<12x16x512xbf16, #tpu.memory_space<vmem>>, vector<1x16x512xbf16>
    %388 = vector.shape_cast %387 : vector<1x16x512xbf16> to vector<16x512xbf16>
    %c0_201 = arith.constant 0 : index
    %c0_202 = arith.constant 0 : index
    %389 = vector.load %arg9[%c0_201, %c0_202] : memref<16x128xbf16, #tpu.memory_space<vmem>>, vector<16x128xbf16>
    %cst_203 = arith.constant dense<0.000000e+00> : vector<16x512xf32>
    %390 = tpu.matmul %389, %1, %cst_203 {dimension_numbers = #tpu.dot_dimension_numbers<[1], [0], [0], [1], [0, 0, 1, 1], [], []>} : vector<16x128xbf16>, vector<128x512xbf16>, vector<16x512xf32> -> vector<16x512xf32>
    %391 = arith.extf %388 : vector<16x512xbf16> to vector<16x512xf32>
    %392 = arith.addf %391, %390 : vector<16x512xf32>
    %393 = arith.truncf %392 : vector<16x512xf32> to vector<16x512xbf16>
    %394 = vector.extract_strided_slice %393 {offsets = [0, 0], sizes = [16, 384], strides = [1, 1]} : vector<16x512xbf16> to vector<16x384xbf16>
    %395 = arith.negf %394 : vector<16x384xbf16>
    %396 = math.exp %395 : vector<16x384xbf16>
    %cst_204 = arith.constant 1.000000e+00 : bf16
    %397 = vector.broadcast %cst_204 : bf16 to vector<16x384xbf16>
    %398 = arith.addf %397, %396 : vector<16x384xbf16>
    %399 = arith.divf %397, %398 : vector<16x384xbf16>
    %400 = vector.extract_strided_slice %393 {offsets = [0, 384], sizes = [16, 128], strides = [1, 1]} : vector<16x512xbf16> to vector<16x128xbf16>
    %401 = math.tanh %400 : vector<16x128xbf16>
    %402 = vector.extract_strided_slice %399 {offsets = [0, 0], sizes = [16, 128], strides = [1, 1]} : vector<16x384xbf16> to vector<16x128xbf16>
    %403 = vector.extract_strided_slice %399 {offsets = [0, 128], sizes = [16, 128], strides = [1, 1]} : vector<16x384xbf16> to vector<16x128xbf16>
    %404 = vector.extract_strided_slice %399 {offsets = [0, 256], sizes = [16, 128], strides = [1, 1]} : vector<16x384xbf16> to vector<16x128xbf16>
    %c0_205 = arith.constant 0 : index
    %c0_206 = arith.constant 0 : index
    %405 = vector.load %arg10[%c0_205, %c0_206] : memref<16x128xf32, #tpu.memory_space<vmem>>, vector<16x128xf32>
    %406 = arith.extf %403 : vector<16x128xbf16> to vector<16x128xf32>
    %407 = arith.mulf %406, %405 : vector<16x128xf32>
    %408 = arith.mulf %402, %401 : vector<16x128xbf16>
    %409 = arith.extf %408 : vector<16x128xbf16> to vector<16x128xf32>
    %410 = arith.addf %407, %409 : vector<16x128xf32>
    %411 = arith.truncf %410 : vector<16x128xf32> to vector<16x128xbf16>
    %412 = math.tanh %411 : vector<16x128xbf16>
    %413 = arith.mulf %404, %412 : vector<16x128xbf16>
    %c0_207 = arith.constant 0 : index
    %c0_208 = arith.constant 0 : index
    %414 = vector.load %arg10[%c0_207, %c0_208] : memref<16x128xf32, #tpu.memory_space<vmem>>, vector<16x128xf32>
    tpu.vector_store %arg10[%c0_207, %c0_208], %410 {strides = array<i32>} : memref<16x128xf32, #tpu.memory_space<vmem>>, vector<16x128xf32>,
    %c0_209 = arith.constant 0 : index
    %c0_210 = arith.constant 0 : index
    %415 = vector.load %arg9[%c0_209, %c0_210] : memref<16x128xbf16, #tpu.memory_space<vmem>>, vector<16x128xbf16>
    tpu.vector_store %arg9[%c0_209, %c0_210], %413 {strides = array<i32>} : memref<16x128xbf16, #tpu.memory_space<vmem>>, vector<16x128xbf16>,
    %c0_211 = arith.constant 0 : index
    %c0_212 = arith.constant 0 : index
    %416 = vector.load %arg7[%c0_211, %c0_212] : memref<16x128xf32, #tpu.memory_space<vmem>>, vector<16x128xf32>
    %417 = arith.index_cast %c7_i32 : i32 to index
    %418 = memref.load %arg1[%417] : memref<12xf32, #tpu.memory_space<smem>>
    %419 = arith.extf %413 : vector<16x128xbf16> to vector<16x128xf32>
    %420 = vector.broadcast %418 : f32 to vector<16x128xf32>
    %421 = arith.mulf %420, %419 : vector<16x128xf32>
    %422 = arith.addf %416, %421 : vector<16x128xf32>
    %c0_213 = arith.constant 0 : index
    %c0_214 = arith.constant 0 : index
    %423 = vector.load %arg7[%c0_213, %c0_214] : memref<16x128xf32, #tpu.memory_space<vmem>>, vector<16x128xf32>
    tpu.vector_store %arg7[%c0_213, %c0_214], %422 {strides = array<i32>} : memref<16x128xf32, #tpu.memory_space<vmem>>, vector<16x128xf32>,
    %c8_i32 = arith.constant 8 : i32
    %424 = arith.index_cast %c8_i32 : i32 to index
    %c0_215 = arith.constant 0 : index
    %c0_216 = arith.constant 0 : index
    %425 = vector.load %arg8[%424, %c0_215, %c0_216] : memref<12x16x512xbf16, #tpu.memory_space<vmem>>, vector<1x16x512xbf16>
    %426 = vector.shape_cast %425 : vector<1x16x512xbf16> to vector<16x512xbf16>
    %c0_217 = arith.constant 0 : index
    %c0_218 = arith.constant 0 : index
    %427 = vector.load %arg9[%c0_217, %c0_218] : memref<16x128xbf16, #tpu.memory_space<vmem>>, vector<16x128xbf16>
    %cst_219 = arith.constant dense<0.000000e+00> : vector<16x512xf32>
    %428 = tpu.matmul %427, %1, %cst_219 {dimension_numbers = #tpu.dot_dimension_numbers<[1], [0], [0], [1], [0, 0, 1, 1], [], []>} : vector<16x128xbf16>, vector<128x512xbf16>, vector<16x512xf32> -> vector<16x512xf32>
    %429 = arith.extf %426 : vector<16x512xbf16> to vector<16x512xf32>
    %430 = arith.addf %429, %428 : vector<16x512xf32>
    %431 = arith.truncf %430 : vector<16x512xf32> to vector<16x512xbf16>
    %432 = vector.extract_strided_slice %431 {offsets = [0, 0], sizes = [16, 384], strides = [1, 1]} : vector<16x512xbf16> to vector<16x384xbf16>
    %433 = arith.negf %432 : vector<16x384xbf16>
    %434 = math.exp %433 : vector<16x384xbf16>
    %cst_220 = arith.constant 1.000000e+00 : bf16
    %435 = vector.broadcast %cst_220 : bf16 to vector<16x384xbf16>
    %436 = arith.addf %435, %434 : vector<16x384xbf16>
    %437 = arith.divf %435, %436 : vector<16x384xbf16>
    %438 = vector.extract_strided_slice %431 {offsets = [0, 384], sizes = [16, 128], strides = [1, 1]} : vector<16x512xbf16> to vector<16x128xbf16>
    %439 = math.tanh %438 : vector<16x128xbf16>
    %440 = vector.extract_strided_slice %437 {offsets = [0, 0], sizes = [16, 128], strides = [1, 1]} : vector<16x384xbf16> to vector<16x128xbf16>
    %441 = vector.extract_strided_slice %437 {offsets = [0, 128], sizes = [16, 128], strides = [1, 1]} : vector<16x384xbf16> to vector<16x128xbf16>
    %442 = vector.extract_strided_slice %437 {offsets = [0, 256], sizes = [16, 128], strides = [1, 1]} : vector<16x384xbf16> to vector<16x128xbf16>
    %c0_221 = arith.constant 0 : index
    %c0_222 = arith.constant 0 : index
    %443 = vector.load %arg10[%c0_221, %c0_222] : memref<16x128xf32, #tpu.memory_space<vmem>>, vector<16x128xf32>
    %444 = arith.extf %441 : vector<16x128xbf16> to vector<16x128xf32>
    %445 = arith.mulf %444, %443 : vector<16x128xf32>
    %446 = arith.mulf %440, %439 : vector<16x128xbf16>
    %447 = arith.extf %446 : vector<16x128xbf16> to vector<16x128xf32>
    %448 = arith.addf %445, %447 : vector<16x128xf32>
    %449 = arith.truncf %448 : vector<16x128xf32> to vector<16x128xbf16>
    %450 = math.tanh %449 : vector<16x128xbf16>
    %451 = arith.mulf %442, %450 : vector<16x128xbf16>
    %c0_223 = arith.constant 0 : index
    %c0_224 = arith.constant 0 : index
    %452 = vector.load %arg10[%c0_223, %c0_224] : memref<16x128xf32, #tpu.memory_space<vmem>>, vector<16x128xf32>
    tpu.vector_store %arg10[%c0_223, %c0_224], %448 {strides = array<i32>} : memref<16x128xf32, #tpu.memory_space<vmem>>, vector<16x128xf32>,
    %c0_225 = arith.constant 0 : index
    %c0_226 = arith.constant 0 : index
    %453 = vector.load %arg9[%c0_225, %c0_226] : memref<16x128xbf16, #tpu.memory_space<vmem>>, vector<16x128xbf16>
    tpu.vector_store %arg9[%c0_225, %c0_226], %451 {strides = array<i32>} : memref<16x128xbf16, #tpu.memory_space<vmem>>, vector<16x128xbf16>,
    %c0_227 = arith.constant 0 : index
    %c0_228 = arith.constant 0 : index
    %454 = vector.load %arg7[%c0_227, %c0_228] : memref<16x128xf32, #tpu.memory_space<vmem>>, vector<16x128xf32>
    %455 = arith.index_cast %c8_i32 : i32 to index
    %456 = memref.load %arg1[%455] : memref<12xf32, #tpu.memory_space<smem>>
    %457 = arith.extf %451 : vector<16x128xbf16> to vector<16x128xf32>
    %458 = vector.broadcast %456 : f32 to vector<16x128xf32>
    %459 = arith.mulf %458, %457 : vector<16x128xf32>
    %460 = arith.addf %454, %459 : vector<16x128xf32>
    %c0_229 = arith.constant 0 : index
    %c0_230 = arith.constant 0 : index
    %461 = vector.load %arg7[%c0_229, %c0_230] : memref<16x128xf32, #tpu.memory_space<vmem>>, vector<16x128xf32>
    tpu.vector_store %arg7[%c0_229, %c0_230], %460 {strides = array<i32>} : memref<16x128xf32, #tpu.memory_space<vmem>>, vector<16x128xf32>,
    %c9_i32 = arith.constant 9 : i32
    %462 = arith.index_cast %c9_i32 : i32 to index
    %c0_231 = arith.constant 0 : index
    %c0_232 = arith.constant 0 : index
    %463 = vector.load %arg8[%462, %c0_231, %c0_232] : memref<12x16x512xbf16, #tpu.memory_space<vmem>>, vector<1x16x512xbf16>
    %464 = vector.shape_cast %463 : vector<1x16x512xbf16> to vector<16x512xbf16>
    %c0_233 = arith.constant 0 : index
    %c0_234 = arith.constant 0 : index
    %465 = vector.load %arg9[%c0_233, %c0_234] : memref<16x128xbf16, #tpu.memory_space<vmem>>, vector<16x128xbf16>
    %cst_235 = arith.constant dense<0.000000e+00> : vector<16x512xf32>
    %466 = tpu.matmul %465, %1, %cst_235 {dimension_numbers = #tpu.dot_dimension_numbers<[1], [0], [0], [1], [0, 0, 1, 1], [], []>} : vector<16x128xbf16>, vector<128x512xbf16>, vector<16x512xf32> -> vector<16x512xf32>
    %467 = arith.extf %464 : vector<16x512xbf16> to vector<16x512xf32>
    %468 = arith.addf %467, %466 : vector<16x512xf32>
    %469 = arith.truncf %468 : vector<16x512xf32> to vector<16x512xbf16>
    %470 = vector.extract_strided_slice %469 {offsets = [0, 0], sizes = [16, 384], strides = [1, 1]} : vector<16x512xbf16> to vector<16x384xbf16>
    %471 = arith.negf %470 : vector<16x384xbf16>
    %472 = math.exp %471 : vector<16x384xbf16>
    %cst_236 = arith.constant 1.000000e+00 : bf16
    %473 = vector.broadcast %cst_236 : bf16 to vector<16x384xbf16>
    %474 = arith.addf %473, %472 : vector<16x384xbf16>
    %475 = arith.divf %473, %474 : vector<16x384xbf16>
    %476 = vector.extract_strided_slice %469 {offsets = [0, 384], sizes = [16, 128], strides = [1, 1]} : vector<16x512xbf16> to vector<16x128xbf16>
    %477 = math.tanh %476 : vector<16x128xbf16>
    %478 = vector.extract_strided_slice %475 {offsets = [0, 0], sizes = [16, 128], strides = [1, 1]} : vector<16x384xbf16> to vector<16x128xbf16>
    %479 = vector.extract_strided_slice %475 {offsets = [0, 128], sizes = [16, 128], strides = [1, 1]} : vector<16x384xbf16> to vector<16x128xbf16>
    %480 = vector.extract_strided_slice %475 {offsets = [0, 256], sizes = [16, 128], strides = [1, 1]} : vector<16x384xbf16> to vector<16x128xbf16>
    %c0_237 = arith.constant 0 : index
    %c0_238 = arith.constant 0 : index
    %481 = vector.load %arg10[%c0_237, %c0_238] : memref<16x128xf32, #tpu.memory_space<vmem>>, vector<16x128xf32>
    %482 = arith.extf %479 : vector<16x128xbf16> to vector<16x128xf32>
    %483 = arith.mulf %482, %481 : vector<16x128xf32>
    %484 = arith.mulf %478, %477 : vector<16x128xbf16>
    %485 = arith.extf %484 : vector<16x128xbf16> to vector<16x128xf32>
    %486 = arith.addf %483, %485 : vector<16x128xf32>
    %487 = arith.truncf %486 : vector<16x128xf32> to vector<16x128xbf16>
    %488 = math.tanh %487 : vector<16x128xbf16>
    %489 = arith.mulf %480, %488 : vector<16x128xbf16>
    %c0_239 = arith.constant 0 : index
    %c0_240 = arith.constant 0 : index
    %490 = vector.load %arg10[%c0_239, %c0_240] : memref<16x128xf32, #tpu.memory_space<vmem>>, vector<16x128xf32>
    tpu.vector_store %arg10[%c0_239, %c0_240], %486 {strides = array<i32>} : memref<16x128xf32, #tpu.memory_space<vmem>>, vector<16x128xf32>,
    %c0_241 = arith.constant 0 : index
    %c0_242 = arith.constant 0 : index
    %491 = vector.load %arg9[%c0_241, %c0_242] : memref<16x128xbf16, #tpu.memory_space<vmem>>, vector<16x128xbf16>
    tpu.vector_store %arg9[%c0_241, %c0_242], %489 {strides = array<i32>} : memref<16x128xbf16, #tpu.memory_space<vmem>>, vector<16x128xbf16>,
    %c0_243 = arith.constant 0 : index
    %c0_244 = arith.constant 0 : index
    %492 = vector.load %arg7[%c0_243, %c0_244] : memref<16x128xf32, #tpu.memory_space<vmem>>, vector<16x128xf32>
    %493 = arith.index_cast %c9_i32 : i32 to index
    %494 = memref.load %arg1[%493] : memref<12xf32, #tpu.memory_space<smem>>
    %495 = arith.extf %489 : vector<16x128xbf16> to vector<16x128xf32>
    %496 = vector.broadcast %494 : f32 to vector<16x128xf32>
    %497 = arith.mulf %496, %495 : vector<16x128xf32>
    %498 = arith.addf %492, %497 : vector<16x128xf32>
    %c0_245 = arith.constant 0 : index
    %c0_246 = arith.constant 0 : index
    %499 = vector.load %arg7[%c0_245, %c0_246] : memref<16x128xf32, #tpu.memory_space<vmem>>, vector<16x128xf32>
    tpu.vector_store %arg7[%c0_245, %c0_246], %498 {strides = array<i32>} : memref<16x128xf32, #tpu.memory_space<vmem>>, vector<16x128xf32>,
    %c10_i32 = arith.constant 10 : i32
    %500 = arith.index_cast %c10_i32 : i32 to index
    %c0_247 = arith.constant 0 : index
    %c0_248 = arith.constant 0 : index
    %501 = vector.load %arg8[%500, %c0_247, %c0_248] : memref<12x16x512xbf16, #tpu.memory_space<vmem>>, vector<1x16x512xbf16>
    %502 = vector.shape_cast %501 : vector<1x16x512xbf16> to vector<16x512xbf16>
    %c0_249 = arith.constant 0 : index
    %c0_250 = arith.constant 0 : index
    %503 = vector.load %arg9[%c0_249, %c0_250] : memref<16x128xbf16, #tpu.memory_space<vmem>>, vector<16x128xbf16>
    %cst_251 = arith.constant dense<0.000000e+00> : vector<16x512xf32>
    %504 = tpu.matmul %503, %1, %cst_251 {dimension_numbers = #tpu.dot_dimension_numbers<[1], [0], [0], [1], [0, 0, 1, 1], [], []>} : vector<16x128xbf16>, vector<128x512xbf16>, vector<16x512xf32> -> vector<16x512xf32>
    %505 = arith.extf %502 : vector<16x512xbf16> to vector<16x512xf32>
    %506 = arith.addf %505, %504 : vector<16x512xf32>
    %507 = arith.truncf %506 : vector<16x512xf32> to vector<16x512xbf16>
    %508 = vector.extract_strided_slice %507 {offsets = [0, 0], sizes = [16, 384], strides = [1, 1]} : vector<16x512xbf16> to vector<16x384xbf16>
    %509 = arith.negf %508 : vector<16x384xbf16>
    %510 = math.exp %509 : vector<16x384xbf16>
    %cst_252 = arith.constant 1.000000e+00 : bf16
    %511 = vector.broadcast %cst_252 : bf16 to vector<16x384xbf16>
    %512 = arith.addf %511, %510 : vector<16x384xbf16>
    %513 = arith.divf %511, %512 : vector<16x384xbf16>
    %514 = vector.extract_strided_slice %507 {offsets = [0, 384], sizes = [16, 128], strides = [1, 1]} : vector<16x512xbf16> to vector<16x128xbf16>
    %515 = math.tanh %514 : vector<16x128xbf16>
    %516 = vector.extract_strided_slice %513 {offsets = [0, 0], sizes = [16, 128], strides = [1, 1]} : vector<16x384xbf16> to vector<16x128xbf16>
    %517 = vector.extract_strided_slice %513 {offsets = [0, 128], sizes = [16, 128], strides = [1, 1]} : vector<16x384xbf16> to vector<16x128xbf16>
    %518 = vector.extract_strided_slice %513 {offsets = [0, 256], sizes = [16, 128], strides = [1, 1]} : vector<16x384xbf16> to vector<16x128xbf16>
    %c0_253 = arith.constant 0 : index
    %c0_254 = arith.constant 0 : index
    %519 = vector.load %arg10[%c0_253, %c0_254] : memref<16x128xf32, #tpu.memory_space<vmem>>, vector<16x128xf32>
    %520 = arith.extf %517 : vector<16x128xbf16> to vector<16x128xf32>
    %521 = arith.mulf %520, %519 : vector<16x128xf32>
    %522 = arith.mulf %516, %515 : vector<16x128xbf16>
    %523 = arith.extf %522 : vector<16x128xbf16> to vector<16x128xf32>
    %524 = arith.addf %521, %523 : vector<16x128xf32>
    %525 = arith.truncf %524 : vector<16x128xf32> to vector<16x128xbf16>
    %526 = math.tanh %525 : vector<16x128xbf16>
    %527 = arith.mulf %518, %526 : vector<16x128xbf16>
    %c0_255 = arith.constant 0 : index
    %c0_256 = arith.constant 0 : index
    %528 = vector.load %arg10[%c0_255, %c0_256] : memref<16x128xf32, #tpu.memory_space<vmem>>, vector<16x128xf32>
    tpu.vector_store %arg10[%c0_255, %c0_256], %524 {strides = array<i32>} : memref<16x128xf32, #tpu.memory_space<vmem>>, vector<16x128xf32>,
    %c0_257 = arith.constant 0 : index
    %c0_258 = arith.constant 0 : index
    %529 = vector.load %arg9[%c0_257, %c0_258] : memref<16x128xbf16, #tpu.memory_space<vmem>>, vector<16x128xbf16>
    tpu.vector_store %arg9[%c0_257, %c0_258], %527 {strides = array<i32>} : memref<16x128xbf16, #tpu.memory_space<vmem>>, vector<16x128xbf16>,
    %c0_259 = arith.constant 0 : index
    %c0_260 = arith.constant 0 : index
    %530 = vector.load %arg7[%c0_259, %c0_260] : memref<16x128xf32, #tpu.memory_space<vmem>>, vector<16x128xf32>
    %531 = arith.index_cast %c10_i32 : i32 to index
    %532 = memref.load %arg1[%531] : memref<12xf32, #tpu.memory_space<smem>>
    %533 = arith.extf %527 : vector<16x128xbf16> to vector<16x128xf32>
    %534 = vector.broadcast %532 : f32 to vector<16x128xf32>
    %535 = arith.mulf %534, %533 : vector<16x128xf32>
    %536 = arith.addf %530, %535 : vector<16x128xf32>
    %c0_261 = arith.constant 0 : index
    %c0_262 = arith.constant 0 : index
    %537 = vector.load %arg7[%c0_261, %c0_262] : memref<16x128xf32, #tpu.memory_space<vmem>>, vector<16x128xf32>
    tpu.vector_store %arg7[%c0_261, %c0_262], %536 {strides = array<i32>} : memref<16x128xf32, #tpu.memory_space<vmem>>, vector<16x128xf32>,
    %c11_i32 = arith.constant 11 : i32
    %538 = arith.index_cast %c11_i32 : i32 to index
    %c0_263 = arith.constant 0 : index
    %c0_264 = arith.constant 0 : index
    %539 = vector.load %arg8[%538, %c0_263, %c0_264] : memref<12x16x512xbf16, #tpu.memory_space<vmem>>, vector<1x16x512xbf16>
    %540 = vector.shape_cast %539 : vector<1x16x512xbf16> to vector<16x512xbf16>
    %c0_265 = arith.constant 0 : index
    %c0_266 = arith.constant 0 : index
    %541 = vector.load %arg9[%c0_265, %c0_266] : memref<16x128xbf16, #tpu.memory_space<vmem>>, vector<16x128xbf16>
    %cst_267 = arith.constant dense<0.000000e+00> : vector<16x512xf32>
    %542 = tpu.matmul %541, %1, %cst_267 {dimension_numbers = #tpu.dot_dimension_numbers<[1], [0], [0], [1], [0, 0, 1, 1], [], []>} : vector<16x128xbf16>, vector<128x512xbf16>, vector<16x512xf32> -> vector<16x512xf32>
    %543 = arith.extf %540 : vector<16x512xbf16> to vector<16x512xf32>
    %544 = arith.addf %543, %542 : vector<16x512xf32>
    %545 = arith.truncf %544 : vector<16x512xf32> to vector<16x512xbf16>
    %546 = vector.extract_strided_slice %545 {offsets = [0, 0], sizes = [16, 384], strides = [1, 1]} : vector<16x512xbf16> to vector<16x384xbf16>
    %547 = arith.negf %546 : vector<16x384xbf16>
    %548 = math.exp %547 : vector<16x384xbf16>
    %cst_268 = arith.constant 1.000000e+00 : bf16
    %549 = vector.broadcast %cst_268 : bf16 to vector<16x384xbf16>
    %550 = arith.addf %549, %548 : vector<16x384xbf16>
    %551 = arith.divf %549, %550 : vector<16x384xbf16>
    %552 = vector.extract_strided_slice %545 {offsets = [0, 384], sizes = [16, 128], strides = [1, 1]} : vector<16x512xbf16> to vector<16x128xbf16>
    %553 = math.tanh %552 : vector<16x128xbf16>
    %554 = vector.extract_strided_slice %551 {offsets = [0, 0], sizes = [16, 128], strides = [1, 1]} : vector<16x384xbf16> to vector<16x128xbf16>
    %555 = vector.extract_strided_slice %551 {offsets = [0, 128], sizes = [16, 128], strides = [1, 1]} : vector<16x384xbf16> to vector<16x128xbf16>
    %556 = vector.extract_strided_slice %551 {offsets = [0, 256], sizes = [16, 128], strides = [1, 1]} : vector<16x384xbf16> to vector<16x128xbf16>
    %c0_269 = arith.constant 0 : index
    %c0_270 = arith.constant 0 : index
    %557 = vector.load %arg10[%c0_269, %c0_270] : memref<16x128xf32, #tpu.memory_space<vmem>>, vector<16x128xf32>
    %558 = arith.extf %555 : vector<16x128xbf16> to vector<16x128xf32>
    %559 = arith.mulf %558, %557 : vector<16x128xf32>
    %560 = arith.mulf %554, %553 : vector<16x128xbf16>
    %561 = arith.extf %560 : vector<16x128xbf16> to vector<16x128xf32>
    %562 = arith.addf %559, %561 : vector<16x128xf32>
    %563 = arith.truncf %562 : vector<16x128xf32> to vector<16x128xbf16>
    %564 = math.tanh %563 : vector<16x128xbf16>
    %565 = arith.mulf %556, %564 : vector<16x128xbf16>
    %c0_271 = arith.constant 0 : index
    %c0_272 = arith.constant 0 : index
    %566 = vector.load %arg10[%c0_271, %c0_272] : memref<16x128xf32, #tpu.memory_space<vmem>>, vector<16x128xf32>
    tpu.vector_store %arg10[%c0_271, %c0_272], %562 {strides = array<i32>} : memref<16x128xf32, #tpu.memory_space<vmem>>, vector<16x128xf32>,
    %c0_273 = arith.constant 0 : index
    %c0_274 = arith.constant 0 : index
    %567 = vector.load %arg9[%c0_273, %c0_274] : memref<16x128xbf16, #tpu.memory_space<vmem>>, vector<16x128xbf16>
    tpu.vector_store %arg9[%c0_273, %c0_274], %565 {strides = array<i32>} : memref<16x128xbf16, #tpu.memory_space<vmem>>, vector<16x128xbf16>,
    %c0_275 = arith.constant 0 : index
    %c0_276 = arith.constant 0 : index
    %568 = vector.load %arg7[%c0_275, %c0_276] : memref<16x128xf32, #tpu.memory_space<vmem>>, vector<16x128xf32>
    %569 = arith.index_cast %c11_i32 : i32 to index
    %570 = memref.load %arg1[%569] : memref<12xf32, #tpu.memory_space<smem>>
    %571 = arith.extf %565 : vector<16x128xbf16> to vector<16x128xf32>
    %572 = vector.broadcast %570 : f32 to vector<16x128xf32>
    %573 = arith.mulf %572, %571 : vector<16x128xf32>
    %574 = arith.addf %568, %573 : vector<16x128xf32>
    %c0_277 = arith.constant 0 : index
    %c0_278 = arith.constant 0 : index
    %575 = vector.load %arg7[%c0_277, %c0_278] : memref<16x128xf32, #tpu.memory_space<vmem>>, vector<16x128xf32>
    tpu.vector_store %arg7[%c0_277, %c0_278], %574 {strides = array<i32>} : memref<16x128xf32, #tpu.memory_space<vmem>>, vector<16x128xf32>,
    %c12_i32 = arith.constant 12 : i32
    return
  }
  func.func @transform_0(%arg0: i32, %arg1: memref<12xf32, #tpu.memory_space<smem>>, %arg2: memref<1xf32, #tpu.memory_space<smem>>) -> (i32, i32, i32) {
    %c0_i32 = arith.constant 0 : i32
    %c0_i32_0 = arith.constant 0 : i32
    %c0_i32_1 = arith.constant 0 : i32
    return %c0_i32, %arg0, %c0_i32_0 : i32, i32, i32
  }
  func.func @transform_1(%arg0: i32, %arg1: memref<12xf32, #tpu.memory_space<smem>>, %arg2: memref<1xf32, #tpu.memory_space<smem>>) -> (i32, i32) {
    %c0_i32 = arith.constant 0 : i32
    %c0_i32_0 = arith.constant 0 : i32
    %c0_i32_1 = arith.constant 0 : i32
    return %c0_i32, %c0_i32_0 : i32, i32
  }
  func.func @transform_2(%arg0: i32, %arg1: memref<12xf32, #tpu.memory_space<smem>>, %arg2: memref<1xf32, #tpu.memory_space<smem>>) -> (i32, i32) {
    %c0_i32 = arith.constant 0 : i32
    %c0_i32_0 = arith.constant 0 : i32
    %c0_i32_1 = arith.constant 0 : i32
    return %c0_i32, %c0_i32_0 : i32, i32
  }
  func.func @transform_3(%arg0: i32, %arg1: memref<12xf32, #tpu.memory_space<smem>>, %arg2: memref<1xf32, #tpu.memory_space<smem>>) -> (i32, i32) {
    %c0_i32 = arith.constant 0 : i32
    %c0_i32_0 = arith.constant 0 : i32
    %c0_i32_1 = arith.constant 0 : i32
    return %c0_i32, %c0_i32_0 : i32, i32
  }
  func.func @transform_4(%arg0: i32, %arg1: memref<12xf32, #tpu.memory_space<smem>>, %arg2: memref<1xf32, #tpu.memory_space<smem>>) -> (i32, i32) {
    %c0_i32 = arith.constant 0 : i32
    %c0_i32_0 = arith.constant 0 : i32
    return %arg0, %c0_i32 : i32, i32
  }
}

</mosaic_0001>

<bundles_post_ra>
// kernel: _lstm_ha_call.1
= control target key start
LH: loop header
LB: loop body
LE: loop exit
PB: predicated region body
PF: predicated region fallthrough
CT: control target
= control target key end

     0   :  { %s4841_s24 = smov [#allocation6]   ;;  %s6405_s0 = inlined_call_operand.vmem [shape: f32[12], index: 0, kind: input, shape index: {}]   ;;  %s6406_s1 = inlined_call_operand.<no memory space> [shape: f32[1], index: 1, kind: input, shape index: {}]   ;;  %s6407_s2 = inlined_call_operand.vmem [shape: bf16[12,16,29], index: 2, kind: input, shape index: {}]   ;;  %s6408_s3 = inlined_call_operand.vmem [shape: bf16[29,512], index: 3, kind: input, shape index: {}]   ;;  %s6409_s4 = inlined_call_operand.vmem [shape: bf16[128,512], index: 4, kind: input, shape index: {}]   ;;  %s6410_s5 = inlined_call_operand.vmem [shape: f32[1,512], index: 5, kind: input, shape index: {}]   ;;  %s6411_s6 = inlined_call_operand.vmem [shape: f32[16,128], index: 6, kind: output, shape index: {}]  }
   0x1   :  { %s12_s23 = sshll.u32 %s6405_s0, 4  ;;  %s13_s23 = int_to_ptr.vmem [resolvable:$true] %s12_s23 }
   0x2   :  { %15 = dma.vmem_to_smem %s13_s23, 16, %s4841_s24, [#allocation5] }
   0x3   :  { %4839 = dma.done.wait [#allocation5], 16 }
   0x4   :  { %4840 = vsyncadd [#allocation5], 4294967280 }
   0x5   :  { %19 = sfence }
   0x6   :  { %v3952_v0 = vld [vmem:[%s6408_s3 + $0x20] sm:$0xf]  ;;  %v4273_v1 = vld [vmem:[%s6408_s3 + $0x2c] sm:$0x70]  ;;  %vm127_vm0 = vcmask 1045504   ;;  %vm128_vm1 = vcmask 1046528  }
   0x7   :  { %v3953_v2 = vor.u32 %v4273_v1, %v3952_v0  ;;  %v4271_v3 = vld [vmem:[%s6408_s3 + $0x24] sm:$0xf]  ;;  %v3954_v4 = vld [vmem:[%s6408_s3 + $0x30] sm:$0x70]  ;;  %v4842_v5 = vmov 65535   ;;  %vm123_vm2 = vcmask 236544  }
   0x8   :  { %v129_v6 = vsel %vm127_vm0, 4294967295, %v4842_v5  ;;  %v3957_v7 = vor.u32 %v4271_v3, %v3954_v4  ;;  %v3960_v8 = vld [vmem:[%s6408_s3 + $0x28] sm:$0xf]  ;;  %v4274_v9 = vld [vmem:[%s6408_s3 + $0x34] sm:$0x70]  ;;  %v4307_v31 = vld [vmem:[%s6407_s2] sm:$0xff] }
   0x9   :  { %v130_v10 = vsel %vm128_vm1, %v129_v6, 0  ;;  %v3961_v11 = vor.u32 %v4274_v9, %v3960_v8  ;;  %v4272_v12 = vld [vmem:[%s6408_s3 + $0x2c] sm:$0xf]  ;;  %v3962_v13 = vld [vmem:[%s6408_s3 + $0x38] sm:$0x70]  ;;  %v4309_v33 = vld [vmem:[%s6407_s2 + $0x10] sm:$0xff] }
   0xa   :  { %v4907_v14 = vand.u32 %v3953_v2, %v130_v10  ;;  %v4909_v15 = vand.u32 %v3957_v7, %v130_v10  ;;  %v3965_v16 = vor.u32 %v4272_v12, %v3962_v13  ;;  %v3936_v17 = vld [vmem:[%s6408_s3] sm:$0xf]  ;;  %v4269_v18 = vld [vmem:[%s6408_s3 + $0xc] sm:$0xf0]  ;;  %v4267_v19 = vld [vmem:[%s6408_s3 + $0x4] sm:$0xf] }
   0xb   :  { %v4920_v20 = vand.u32 %v3961_v11, %v130_v10  ;;  %v3938_v21 = vld [vmem:[%s6408_s3 + $0x10] sm:$0xf0]  ;;  %v3944_v22 = vld [vmem:[%s6408_s3 + $0x8] sm:$0xf]  ;;  %v4270_v23 = vld [vmem:[%s6408_s3 + $0x14] sm:$0xf0]  ;;  %v4935_v25 = vor.u32 %v4269_v18, %v3936_v17 }
   0xc   :  { %149 = vmatpush.bf16.msra.mxu0 %v4907_v14  ;;  %163 = vmatpush.bf16.msra.mxu1 %v4909_v15  ;;  %v4933_v24 = vand.u32 %v3965_v16, %v130_v10  ;;  %v4937_v26 = vor.u32 %v4267_v19, %v3938_v21  ;;  %v4268_v27 = vld [vmem:[%s6408_s3 + $0xc] sm:$0xf]  ;;  %v3946_v28 = vld [vmem:[%s6408_s3 + $0x18] sm:$0xf0]  ;;  %v4946_v29 = vor.u32 %v4270_v23, %v3944_v22  ;;  %v4311_v35 = vld [vmem:[%s6407_s2 + $0x20] sm:$0xff]  ;;  %s5780_s22 = sld [smem:[#allocation6 + $0x1]] }
   0xd   :  { %177 = vmatpush.bf16.msra.mxu2 %v4920_v20  ;;  %v4949_v30 = vor.u32 %v4268_v27, %v3946_v28  ;;  %v4308_v32 = vld [vmem:[%s6407_s2 + $0x8] sm:$0xff]  ;;  %v4310_v34 = vld [vmem:[%s6407_s2 + $0x18] sm:$0xff]  ;;  %v4313_v37 = vld [vmem:[%s6407_s2 + $0x30] sm:$0xff]  ;;  %s4226_s25 = sld [smem:[#allocation6 + $0x3]] }
   0xe   :  { %191 = vmatpush.bf16.msra.mxu3 %v4933_v24  ;;  %v4312_v36 = vld [vmem:[%s6407_s2 + $0x28] sm:$0xff]  ;;  %v4314_v38 = vld [vmem:[%s6407_s2 + $0x38] sm:$0xff]  ;;  %v70_v39 = vld [vmem:[%s6410_s5] sm:$0xf]  ;;  %s4231_s5 = sld [smem:[#allocation6 + $0x4]] }
   0xf   :  { %v5086_v40 = vperm.slane %v70_v39, 0  ;;  %v5088_v41 = vperm.slane %v70_v39, 1  ;;  %v4315_v42 = vld [vmem:[%s6407_s2 + $0x40] sm:$0xff]  ;;  %v5100_v48 = vperm.slane %v70_v39, 2  ;;  %v5104_v49 = vperm.slane %v70_v39, 3  ;;  %v4316_v61 = vld [vmem:[%s6407_s2 + $0x48] sm:$0xff] }
  0x10   :  { %150 = vmatpush.bf16.msra.mxu0 %v4935_v25  ;;  %164 = vmatpush.bf16.msra.mxu1 %v4937_v26  ;;  %v4305_v16 = vld [vmem:[%s6409_s4 + $0xec] sm:$0xf0]  ;;  %v4303_v17 = vld [vmem:[%s6409_s4 + $0xe4] sm:$0xf]  ;;  %v4200_v18 = vld [vmem:[%s6409_s4 + $0xf0] sm:$0xf0] }
  0x11   :  { %178 = vmatpush.bf16.msra.mxu2 %v4946_v29  ;;  %6445 = vst [vmem:[#allocation9_spill] sm:$0xff] %v5086_v40  ;;  %v4206_v19 = vld [vmem:[%s6409_s4 + $0xe8] sm:$0xf]  ;;  %v4306_v22 = vld [vmem:[%s6409_s4 + $0xf4] sm:$0xf0]  ;;  %s4236_s26 = sld [smem:[#allocation6 + $0x5]] }
  0x12   :  { %192 = vmatpush.bf16.msra.mxu3 %v4949_v30  ;;  %6446 = vst [vmem:[#allocation10_spill] sm:$0xff] %v5088_v41  ;;  %v4304_v23 = vld [vmem:[%s6409_s4 + $0xec] sm:$0xf]  ;;  %v4302_v39 = vld [vmem:[%s6409_s4 + $0xd4] sm:$0xf0]  ;;  %s4241_s27 = sld [smem:[#allocation6 + $0x6]] }
  0x13   :  { %3966 = vmatmul.msk.bf16.vlgmr.msra.gmra.mxu0 %vm123_vm2, %v4307_v31  ;;  %3967 = vmatmul.msk.bf16.vlgmr.msra.gmra.mxu1 %vm123_vm2, %v4307_v31  ;;  %6447 = vst [vmem:[#allocation11_spill] sm:$0xff] %v5100_v48  ;;  %s4246_s28 = sld [smem:[#allocation6 + $0x7]] }
  0x14   :  { %224 = vmatpush.bf16.msrb.mxu0 %v4907_v14  ;;  %238 = vmatpush.bf16.msrb.mxu1 %v4909_v15  ;;  %6448 = vst [vmem:[#allocation12_spill] sm:$0xff] %v5104_v49  ;;  %s4251_s29 = sld [smem:[#allocation6 + $0x8]] }
  0x15   :  { %3968 = vmatmul.msk.bf16.vlgmr.msra.gmra.mxu2 %vm123_vm2, %v4307_v31  ;;  %3969 = vmatmul.msk.bf16.vlgmr.msra.gmra.mxu3 %vm123_vm2, %v4307_v31  ;;  %v4182_v31 = vld [vmem:[%s6409_s4 + $0xc0] sm:$0xf]  ;;  %s4256_s30 = sld [smem:[#allocation6 + $0x9]] }
  0x16   :  { %266 = vmatpush.bf16.msrb.mxu3 %v4933_v24  ;;  %252 = vmatpush.bf16.msrb.mxu2 %v4920_v20  ;;  %s4261_s0 = sld [smem:[#allocation6 + $0xa]] }
  0x17   :  { %s4266_s7 = sld [smem:[#allocation6 + $0xb]] }
  0x18   :  { %225 = vmatpush.bf16.msrb.mxu0 %v4935_v25  ;;  %239 = vmatpush.bf16.msrb.mxu1 %v4937_v26 }
  0x1a   :  { %267 = vmatpush.bf16.msrb.mxu3 %v4949_v30  ;;  %253 = vmatpush.bf16.msrb.mxu2 %v4946_v29 }
  0x1c   :  { %300 = vmatpush.bf16.msra.mxu0 %v4907_v14  ;;  %314 = vmatpush.bf16.msra.mxu1 %v4909_v15 }
  0x1e   :  { %342 = vmatpush.bf16.msra.mxu3 %v4933_v24  ;;  %328 = vmatpush.bf16.msra.mxu2 %v4920_v20 }
  0x20   :  { %301 = vmatpush.bf16.msra.mxu0 %v4935_v25  ;;  %315 = vmatpush.bf16.msra.mxu1 %v4937_v26 }
  0x22   :  { %343 = vmatpush.bf16.msra.mxu3 %v4949_v30  ;;  %329 = vmatpush.bf16.msra.mxu2 %v4946_v29 }
  0x23   :  { %3976 = vmatmul.msk.bf16.vlgmr.msrb.gmra.mxu0 %vm123_vm2, %v4308_v32  ;;  %3977 = vmatmul.msk.bf16.vlgmr.msrb.gmra.mxu1 %vm123_vm2, %v4308_v32 }
  0x24   :  { %376 = vmatpush.bf16.msrb.mxu0 %v4907_v14  ;;  %390 = vmatpush.bf16.msrb.mxu1 %v4909_v15 }
  0x25   :  { %3978 = vmatmul.msk.bf16.vlgmr.msrb.gmra.mxu2 %vm123_vm2, %v4308_v32  ;;  %3979 = vmatmul.msk.bf16.vlgmr.msrb.gmra.mxu3 %vm123_vm2, %v4308_v32  ;;  %v4301_v32 = vld [vmem:[%s6409_s4 + $0xcc] sm:$0xf0] }
  0x26   :  { %404 = vmatpush.bf16.msrb.mxu2 %v4920_v20  ;;  %418 = vmatpush.bf16.msrb.mxu3 %v4933_v24 }
  0x28   :  { %377 = vmatpush.bf16.msrb.mxu0 %v4935_v25  ;;  %391 = vmatpush.bf16.msrb.mxu1 %v4937_v26 }
  0x2a   :  { %405 = vmatpush.bf16.msrb.mxu2 %v4946_v29  ;;  %419 = vmatpush.bf16.msrb.mxu3 %v4949_v30 }
  0x33   :  { %3986 = vmatmul.msk.bf16.vlgmr.msra.gmra.mxu0 %vm123_vm2, %v4309_v33  ;;  %3987 = vmatmul.msk.bf16.vlgmr.msra.gmra.mxu1 %vm123_vm2, %v4309_v33 }
  0x34   :  { %452 = vmatpush.bf16.msra.mxu0 %v4907_v14  ;;  %466 = vmatpush.bf16.msra.mxu1 %v4909_v15 }
  0x35   :  { %3988 = vmatmul.msk.bf16.vlgmr.msra.gmra.mxu2 %vm123_vm2, %v4309_v33  ;;  %3989 = vmatmul.msk.bf16.vlgmr.msra.gmra.mxu3 %vm123_vm2, %v4309_v33 }
  0x36   :  { %480 = vmatpush.bf16.msra.mxu2 %v4920_v20  ;;  %494 = vmatpush.bf16.msra.mxu3 %v4933_v24 }
  0x38   :  { %453 = vmatpush.bf16.msra.mxu0 %v4935_v25  ;;  %467 = vmatpush.bf16.msra.mxu1 %v4937_v26 }
  0x3a   :  { %481 = vmatpush.bf16.msra.mxu2 %v4946_v29  ;;  %495 = vmatpush.bf16.msra.mxu3 %v4949_v30 }
  0x43   :  { %3996 = vmatmul.msk.bf16.vlgmr.msrb.gmra.mxu0 %vm123_vm2, %v4310_v34  ;;  %3997 = vmatmul.msk.bf16.vlgmr.msrb.gmra.mxu1 %vm123_vm2, %v4310_v34 }
  0x44   :  { %528 = vmatpush.bf16.msrb.mxu0 %v4907_v14  ;;  %542 = vmatpush.bf16.msrb.mxu1 %v4909_v15 }
  0x45   :  { %3998 = vmatmul.msk.bf16.vlgmr.msrb.gmra.mxu2 %vm123_vm2, %v4310_v34  ;;  %3999 = vmatmul.msk.bf16.vlgmr.msrb.gmra.mxu3 %vm123_vm2, %v4310_v34  ;;  %v5195_v34 = vor.u32 %v4306_v22, %v4206_v19  ;;  %v4294_v19 = vld [vmem:[%s6409_s4 + $0x94] sm:$0xf0]  ;;  %v4160_v22 = vld [vmem:[%s6409_s4 + $0x98] sm:$0xf0] }
  0x46   :  { %556 = vmatpush.bf16.msrb.mxu2 %v4920_v20  ;;  %570 = vmatpush.bf16.msrb.mxu3 %v4933_v24 }
  0x48   :  { %529 = vmatpush.bf16.msrb.mxu0 %v4935_v25  ;;  %543 = vmatpush.bf16.msrb.mxu1 %v4937_v26 }
  0x4a   :  { %557 = vmatpush.bf16.msrb.mxu2 %v4946_v29  ;;  %571 = vmatpush.bf16.msrb.mxu3 %v4949_v30 }
  0x53   :  { %4006 = vmatmul.msk.bf16.vlgmr.msra.gmra.mxu0 %vm123_vm2, %v4311_v35  ;;  %4007 = vmatmul.msk.bf16.vlgmr.msra.gmra.mxu1 %vm123_vm2, %v4311_v35 }
  0x54   :  { %604 = vmatpush.bf16.msra.mxu0 %v4907_v14  ;;  %618 = vmatpush.bf16.msra.mxu1 %v4909_v15 }
  0x55   :  { %4008 = vmatmul.msk.bf16.vlgmr.msra.gmra.mxu2 %vm123_vm2, %v4311_v35  ;;  %4009 = vmatmul.msk.bf16.vlgmr.msra.gmra.mxu3 %vm123_vm2, %v4311_v35 }
  0x56   :  { %632 = vmatpush.bf16.msra.mxu2 %v4920_v20  ;;  %646 = vmatpush.bf16.msra.mxu3 %v4933_v24 }
  0x58   :  { %605 = vmatpush.bf16.msra.mxu0 %v4935_v25  ;;  %619 = vmatpush.bf16.msra.mxu1 %v4937_v26 }
  0x5a   :  { %633 = vmatpush.bf16.msra.mxu2 %v4946_v29  ;;  %647 = vmatpush.bf16.msra.mxu3 %v4949_v30 }
  0x63   :  { %4016 = vmatmul.msk.bf16.vlgmr.msrb.gmra.mxu0 %vm123_vm2, %v4312_v36  ;;  %4017 = vmatmul.msk.bf16.vlgmr.msrb.gmra.mxu1 %vm123_vm2, %v4312_v36 }
  0x64   :  { %680 = vmatpush.bf16.msrb.mxu0 %v4907_v14  ;;  %694 = vmatpush.bf16.msrb.mxu1 %v4909_v15 }
  0x65   :  { %4018 = vmatmul.msk.bf16.vlgmr.msrb.gmra.mxu2 %vm123_vm2, %v4312_v36  ;;  %4019 = vmatmul.msk.bf16.vlgmr.msrb.gmra.mxu3 %vm123_vm2, %v4312_v36  ;;  %v4299_v36 = vld [vmem:[%s6409_s4 + $0xc4] sm:$0xf] }
  0x66   :  { %708 = vmatpush.bf16.msrb.mxu2 %v4920_v20  ;;  %722 = vmatpush.bf16.msrb.mxu3 %v4933_v24 }
  0x68   :  { %681 = vmatpush.bf16.msrb.mxu0 %v4935_v25  ;;  %695 = vmatpush.bf16.msrb.mxu1 %v4937_v26 }
  0x6a   :  { %709 = vmatpush.bf16.msrb.mxu2 %v4946_v29  ;;  %723 = vmatpush.bf16.msrb.mxu3 %v4949_v30 }
  0x73   :  { %4026 = vmatmul.msk.bf16.vlgmr.msra.gmra.mxu0 %vm123_vm2, %v4313_v37  ;;  %4027 = vmatmul.msk.bf16.vlgmr.msra.gmra.mxu1 %vm123_vm2, %v4313_v37 }
  0x74   :  { %756 = vmatpush.bf16.msra.mxu0 %v4907_v14  ;;  %770 = vmatpush.bf16.msra.mxu1 %v4909_v15 }
  0x75   :  { %4028 = vmatmul.msk.bf16.vlgmr.msra.gmra.mxu2 %vm123_vm2, %v4313_v37  ;;  %4029 = vmatmul.msk.bf16.vlgmr.msra.gmra.mxu3 %vm123_vm2, %v4313_v37  ;;  %v4184_v37 = vld [vmem:[%s6409_s4 + $0xd0] sm:$0xf0] }
  0x76   :  { %784 = vmatpush.bf16.msra.mxu2 %v4920_v20  ;;  %798 = vmatpush.bf16.msra.mxu3 %v4933_v24 }
  0x78   :  { %757 = vmatpush.bf16.msra.mxu0 %v4935_v25  ;;  %771 = vmatpush.bf16.msra.mxu1 %v4937_v26 }
  0x7a   :  { %785 = vmatpush.bf16.msra.mxu2 %v4946_v29  ;;  %799 = vmatpush.bf16.msra.mxu3 %v4949_v30 }
  0x83   :  { %4036 = vmatmul.msk.bf16.vlgmr.msrb.gmra.mxu0 %vm123_vm2, %v4314_v38  ;;  %4037 = vmatmul.msk.bf16.vlgmr.msrb.gmra.mxu1 %vm123_vm2, %v4314_v38 }
  0x84   :  { %832 = vmatpush.bf16.msrb.mxu0 %v4907_v14  ;;  %846 = vmatpush.bf16.msrb.mxu1 %v4909_v15 }
  0x85   :  { %4038 = vmatmul.msk.bf16.vlgmr.msrb.gmra.mxu2 %vm123_vm2, %v4314_v38  ;;  %4039 = vmatmul.msk.bf16.vlgmr.msrb.gmra.mxu3 %vm123_vm2, %v4314_v38  ;;  %v4190_v38 = vld [vmem:[%s6409_s4 + $0xc8] sm:$0xf] }
  0x86   :  { %860 = vmatpush.bf16.msrb.mxu2 %v4920_v20  ;;  %874 = vmatpush.bf16.msrb.mxu3 %v4933_v24 }
  0x88   :  { %833 = vmatpush.bf16.msrb.mxu0 %v4935_v25  ;;  %847 = vmatpush.bf16.msrb.mxu1 %v4937_v26 }
  0x8a   :  { %861 = vmatpush.bf16.msrb.mxu2 %v4946_v29  ;;  %875 = vmatpush.bf16.msrb.mxu3 %v4949_v30 }
  0x90   :  { %v152_v43 = vpop.f32.mrf.mxu0  ;;  %v166_v44 = vpop.f32.mrf.mxu1 }
  0x91   :  { %v153_v45 = vadd.f32 %v152_v43, %v5086_v40  ;;  %v167_v46 = vadd.f32 %v166_v44, %v5088_v41  ;;  %v4192_v43 = vld [vmem:[%s6409_s4 + $0xd8] sm:$0xf0] }
  0x93   :  { %v5095_v47 = vpack.c.bf16 %v167_v46, %v153_v45  ;;  %4046 = vmatmul.msk.bf16.vlgmr.msra.gmra.mxu0 %vm123_vm2, %v4315_v42  ;;  %4047 = vmatmul.msk.bf16.vlgmr.msra.gmra.mxu1 %vm123_vm2, %v4315_v42  ;;  %v5223_v45 = vor.u32 %v4301_v32, %v4182_v31  ;;  %v5227_v46 = vor.u32 %v4299_v36, %v4184_v37  ;;  %v4136_v36 = vld [vmem:[%s6409_s4 + $0x70] sm:$0xf0]  ;;  %v4142_v37 = vld [vmem:[%s6409_s4 + $0x68] sm:$0xf] }
  0x94   :  { %908 = vmatpush.bf16.msra.mxu0 %v4907_v14  ;;  %922 = vmatpush.bf16.msra.mxu1 %v4909_v15 }
  0x95   :  { %4048 = vmatmul.msk.bf16.vlgmr.msra.gmra.mxu2 %vm123_vm2, %v4315_v42  ;;  %4049 = vmatmul.msk.bf16.vlgmr.msra.gmra.mxu3 %vm123_vm2, %v4315_v42  ;;  %v4300_v42 = vld [vmem:[%s6409_s4 + $0xcc] sm:$0xf] }
  0x96   :  { %936 = vmatpush.bf16.msra.mxu2 %v4920_v20  ;;  %950 = vmatpush.bf16.msra.mxu3 %v4933_v24 }
  0x98   :  { %v180_v50 = vpop.f32.mrf.mxu2  ;;  %v194_v52 = vpop.f32.mrf.mxu3  ;;  %909 = vmatpush.bf16.msra.mxu0 %v4935_v25  ;;  %923 = vmatpush.bf16.msra.mxu1 %v4937_v26 }
  0x99   :  { %v181_v51 = vadd.f32 %v180_v50, %v5100_v48  ;;  %v154_v53 = vpop.f32.mrf.mxu0  ;;  %v195_v54 = vadd.f32 %v194_v52, %v5104_v49  ;;  %v168_v56 = vpop.f32.mrf.mxu1  ;;  %v4166_v50 = vld [vmem:[%s6409_s4 + $0xa0] sm:$0xf]  ;;  %v5237_v52 = vor.u32 %v4302_v39, %v4190_v38  ;;  %v4290_v39 = vld [vmem:[%s6409_s4 + $0x74] sm:$0xf0] }
  0x9a   :  { %v155_v55 = vadd.f32 %v154_v53, %v5086_v40  ;;  %v169_v57 = vadd.f32 %v168_v56, %v5088_v41  ;;  %937 = vmatpush.bf16.msra.mxu2 %v4946_v29  ;;  %951 = vmatpush.bf16.msra.mxu3 %v4949_v30  ;;  %v5239_v53 = vor.u32 %v4300_v42, %v4192_v43  ;;  %v4174_v56 = vld [vmem:[%s6409_s4 + $0xa8] sm:$0xf]  ;;  %v4288_v42 = vld [vmem:[%s6409_s4 + $0x6c] sm:$0xf]  ;;  %v4144_v43 = vld [vmem:[%s6409_s4 + $0x78] sm:$0xf0] }
  0x9b   :  { %v5117_v58 = vpack.c.bf16 %v195_v54, %v181_v51  ;;  %v4297_v51 = vld [vmem:[%s6409_s4 + $0xac] sm:$0xf0]  ;;  %v4295_v54 = vld [vmem:[%s6409_s4 + $0xa4] sm:$0xf] }
  0x9c   :  { %v5119_v59 = vpack.c.bf16 %v169_v57, %v155_v55  ;;  %v4168_v55 = vld [vmem:[%s6409_s4 + $0xb0] sm:$0xf0] }
  0xa0   :  { %v182_v60 = vpop.f32.mrf.mxu2  ;;  %v196_v63 = vpop.f32.mrf.mxu3 }
  0xa1   :  { %v183_v62 = vadd.f32 %v182_v60, %v5100_v48  ;;  %v227_v0 = vpop.f32.mrf.mxu0  ;;  %v197_v1 = vadd.f32 %v196_v63, %v5104_v49  ;;  %v241_v3 = vpop.f32.mrf.mxu1  ;;  %v4298_v60 = vld [vmem:[%s6409_s4 + $0xb4] sm:$0xf0] }
  0xa2   :  { %v228_v2 = vadd.f32 %v227_v0, %v5086_v40  ;;  %v242_v4 = vadd.f32 %v241_v3, %v5088_v41 }
  0xa3   :  { %v5128_v5 = vpack.c.bf16 %v197_v1, %v183_v62  ;;  %4056 = vmatmul.msk.bf16.vlgmr.msrb.gmra.mxu0 %vm123_vm2, %v4316_v61  ;;  %4057 = vmatmul.msk.bf16.vlgmr.msrb.gmra.mxu1 %vm123_vm2, %v4316_v61  ;;  %v4176_v62 = vld [vmem:[%s6409_s4 + $0xb8] sm:$0xf0] }
  0xa4   :  { %v5132_v6 = vpack.c.bf16 %v242_v4, %v228_v2  ;;  %984 = vmatpush.bf16.msrb.mxu0 %v4907_v14  ;;  %998 = vmatpush.bf16.msrb.mxu1 %v4909_v15  ;;  %v4198_v14 = vld [vmem:[%s6409_s4 + $0xe0] sm:$0xf]  ;;  %v4317_v15 = vld [vmem:[%s6407_s2 + $0x50] sm:$0xff]  ;;  %v5263_v2 = vor.u32 %v4297_v51, %v4166_v50 }
  0xa5   :  { %4058 = vmatmul.msk.bf16.vlgmr.msrb.gmra.mxu2 %vm123_vm2, %v4316_v61  ;;  %4059 = vmatmul.msk.bf16.vlgmr.msrb.gmra.mxu3 %vm123_vm2, %v4316_v61  ;;  %v5183_v27 = vor.u32 %v4305_v16, %v4198_v14  ;;  %v4296_v61 = vld [vmem:[%s6409_s4 + $0xac] sm:$0xf]  ;;  %v4152_v16 = vld [vmem:[%s6409_s4 + $0x90] sm:$0xf0] }
  0xa6   :  { %1012 = vmatpush.bf16.msrb.mxu2 %v4920_v20  ;;  %1026 = vmatpush.bf16.msrb.mxu3 %v4933_v24  ;;  %v4843_v20 = vmov 0   ;;  %v4208_v24 = vld [vmem:[%s6409_s4 + $0xf8] sm:$0xf0]  ;;  %v5281_v14 = vor.u32 %v4296_v61, %v4176_v62  ;;  %v4285_v61 = vld [vmem:[%s6409_s4 + $0x4c] sm:$0xf0] }
  0xa7   :  { %1043 = vst [vmem:[#allocation3] sm:$0xf] %v4843_v20  ;;  %v5197_v35 = vor.u32 %v4304_v23, %v4208_v24 }
  0xa8   :  { %v255_v7 = vpop.f32.mrf.mxu2  ;;  %v269_v9 = vpop.f32.mrf.mxu3  ;;  %985 = vmatpush.bf16.msrb.mxu0 %v4935_v25  ;;  %999 = vmatpush.bf16.msrb.mxu1 %v4937_v26  ;;  %1044 = vst [vmem:[#allocation3 + $0x4] sm:$0xf] %v4843_v20  ;;  %v4292_v20 = vld [vmem:[%s6409_s4 + $0x8c] sm:$0xf] }
  0xa9   :  { %v256_v8 = vadd.f32 %v255_v7, %v5100_v48  ;;  %v5141_v10 = vpop.f32.mrf.mxu0  ;;  %v270_v11 = vadd.f32 %v269_v9, %v5104_v49  ;;  %v5145_v12 = vpop.f32.mrf.mxu1  ;;  %v5269_v7 = vor.u32 %v4295_v54, %v4168_v55  ;;  %v4293_v9 = vld [vmem:[%s6409_s4 + $0x8c] sm:$0xf0]  ;;  %v5322_v32 = vor.u32 %v4292_v20, %v4160_v22 }
  0xaa   :  { %1013 = vmatpush.bf16.msrb.mxu2 %v4946_v29  ;;  %1027 = vmatpush.bf16.msrb.mxu3 %v4949_v30  ;;  %v5186_v30 = vor.u32 %v4303_v17, %v4200_v18  ;;  %v4158_v17 = vld [vmem:[%s6409_s4 + $0x88] sm:$0xf] }
  0xab   :  { %v5150_v13 = vpack.c.bf16 %v270_v11, %v256_v8  ;;  %v4150_v8 = vld [vmem:[%s6409_s4 + $0x80] sm:$0xf]  ;;  %v5279_v11 = vor.u32 %v4298_v60, %v4174_v56  ;;  %v5320_v31 = vor.u32 %v4294_v19, %v4158_v17  ;;  %v4128_v17 = vld [vmem:[%s6409_s4 + $0x58] sm:$0xf0] }
  0xac   :  { %v5304_v23 = vor.u32 %v4293_v9, %v4150_v8  ;;  %v4118_v60 = vld [vmem:[%s6409_s4 + $0x40] sm:$0xf]  ;;  %v4120_v8 = vld [vmem:[%s6409_s4 + $0x50] sm:$0xf0]  ;;  %v4126_v9 = vld [vmem:[%s6409_s4 + $0x48] sm:$0xf] }
  0xad   :  { %6449 = vst [vmem:[#allocation13_spill] sm:$0xff] %v5150_v13  ;;  %v5390_v20 = vor.u32 %v4285_v61, %v4118_v60  ;;  %v1286_v13 = vunpack.c.l.bf16 %v5128_v5 }
  0xb0   :  { %v5170_v21 = vpop.f32.mrf.mxu2  ;;  %v5181_v25 = vpop.f32.mrf.mxu3 }
  0xb1   :  { %6450 = vst [vmem:[#allocation14_spill] sm:$0xff] %v5170_v21  ;;  %v303_v26 = vpop.f32.mrf.mxu0  ;;  %v317_v29 = vpop.f32.mrf.mxu1 }
  0xb2   :  { %6451 = vst [vmem:[#allocation15_spill] sm:$0xff] %v5181_v25  ;;  %v304_v28 = vadd.f32 %v303_v26, %v5086_v40  ;;  %v318_v33 = vadd.f32 %v317_v29, %v5088_v41  ;;  %v4318_v26 = vld [vmem:[%s6407_s2 + $0x58] sm:$0xff]  ;;  %v4289_v29 = vld [vmem:[%s6409_s4 + $0x6c] sm:$0xf0]  ;;  %v1287_v25 = vunpack.c.h.bf16 %v5128_v5 }
  0xb3   :  { %4066 = vmatmul.msk.bf16.vlgmr.msra.gmra.mxu0 %vm123_vm2, %v4317_v15  ;;  %4067 = vmatmul.msk.bf16.vlgmr.msra.gmra.mxu1 %vm123_vm2, %v4317_v15 }
  0xb4   :  { %v5219_v44 = vpack.c.bf16 %v318_v33, %v304_v28  ;;  %1224 = vmatpush.bf16.msra.mxu0 %v5183_v27  ;;  %1238 = vmatpush.bf16.msra.mxu1 %v5186_v30  ;;  %v4134_v28 = vld [vmem:[%s6409_s4 + $0x60] sm:$0xf]  ;;  %v4287_v33 = vld [vmem:[%s6409_s4 + $0x64] sm:$0xf] }
  0xb5   :  { %4068 = vmatmul.msk.bf16.vlgmr.msra.gmra.mxu2 %vm123_vm2, %v4317_v15  ;;  %4069 = vmatmul.msk.bf16.vlgmr.msra.gmra.mxu3 %vm123_vm2, %v4317_v15  ;;  %v4291_v15 = vld [vmem:[%s6409_s4 + $0x84] sm:$0xf]  ;;  %v5347_v54 = vor.u32 %v4289_v29, %v4134_v28  ;;  %v4102_v28 = vld [vmem:[%s6409_s4 + $0x20] sm:$0xf]  ;;  %v4281_v29 = vld [vmem:[%s6409_s4 + $0x2c] sm:$0xf0] }
  0xb6   :  { %6452 = vst [vmem:[#allocation16_spill] sm:$0xff] %v5219_v44  ;;  %1252 = vmatpush.bf16.msra.mxu2 %v5195_v34  ;;  %1266 = vmatpush.bf16.msra.mxu3 %v5197_v35  ;;  %v5307_v24 = vor.u32 %v4291_v15, %v4152_v16  ;;  %v4286_v15 = vld [vmem:[%s6409_s4 + $0x54] sm:$0xf0]  ;;  %v4284_v16 = vld [vmem:[%s6409_s4 + $0x4c] sm:$0xf]  ;;  %v1284_v44 = vunpack.c.l.bf16 %v5119_v59 }
  0xb8   :  { %v331_v57 = vpop.f32.mrf.mxu2  ;;  %v345_v0 = vpop.f32.mrf.mxu3  ;;  %1225 = vmatpush.bf16.msra.mxu0 %v5223_v45  ;;  %1239 = vmatpush.bf16.msra.mxu1 %v5227_v46 }
  0xb9   :  { %v332_v63 = vadd.f32 %v331_v57, %v5100_v48  ;;  %v5260_v1 = vpop.f32.mrf.mxu0  ;;  %v346_v3 = vadd.f32 %v345_v0, %v5104_v49  ;;  %v5266_v4 = vpop.f32.mrf.mxu1  ;;  %v5351_v57 = vor.u32 %v4287_v33, %v4136_v36  ;;  %v5364_v0 = vor.u32 %v4288_v42, %v4144_v43  ;;  %v4282_v43 = vld [vmem:[%s6409_s4 + $0x34] sm:$0xf0] }
  0xba   :  { %6453 = vst [vmem:[#allocation17_spill] sm:$0xff] %v5260_v1  ;;  %1253 = vmatpush.bf16.msra.mxu2 %v5237_v52  ;;  %1267 = vmatpush.bf16.msra.mxu3 %v5239_v53  ;;  %v5404_v33 = vor.u32 %v4286_v15, %v4126_v9  ;;  %v5406_v36 = vor.u32 %v4284_v16, %v4128_v17  ;;  %v4086_v15 = vld [vmem:[%s6409_s4] sm:$0xf]  ;;  %v4277_v16 = vld [vmem:[%s6409_s4 + $0xc] sm:$0xf0] }
  0xbb   :  { %6454 = vst [vmem:[#allocation18_spill] sm:$0xff] %v5266_v4  ;;  %v5292_v18 = vpack.c.bf16 %v346_v3, %v332_v63  ;;  %v5362_v63 = vor.u32 %v4290_v39, %v4142_v37  ;;  %v4283_v3 = vld [vmem:[%s6409_s4 + $0x44] sm:$0xf]  ;;  %v4104_v37 = vld [vmem:[%s6409_s4 + $0x30] sm:$0xf0] }
  0xbc   :  { %1226 = vmatpush.bf16.msra.mxu0 %v5263_v2  ;;  %1240 = vmatpush.bf16.msra.mxu1 %v5269_v7  ;;  %v5394_v22 = vor.u32 %v4283_v3, %v4120_v8  ;;  %v4110_v39 = vld [vmem:[%s6409_s4 + $0x28] sm:$0xf] }
  0xbd   :  { %6455 = vst [vmem:[#allocation19_spill] sm:$0xff] %v5292_v18  ;;  %v5446_v17 = vor.u32 %v4282_v43, %v4110_v39  ;;  %v4278_v39 = vld [vmem:[%s6409_s4 + $0x14] sm:$0xf0]  ;;  %v4276_v43 = vld [vmem:[%s6409_s4 + $0xc] sm:$0xf] }
  0xbe   :  { %1254 = vmatpush.bf16.msra.mxu2 %v5279_v11  ;;  %1268 = vmatpush.bf16.msra.mxu3 %v5281_v14 }
  0xc0   :  { %v5333_v38 = vpop.f32.mrf.mxu2  ;;  %v5344_v50 = vpop.f32.mrf.mxu3  ;;  %1227 = vmatpush.bf16.msra.mxu0 %v5304_v23  ;;  %1241 = vmatpush.bf16.msra.mxu1 %v5307_v24 }
  0xc1   :  { %6456 = vst [vmem:[#allocation20_spill] sm:$0xff] %v5333_v38  ;;  %v379_v51 = vpop.f32.mrf.mxu0  ;;  %v393_v56 = vpop.f32.mrf.mxu1 }
  0xc2   :  { %6457 = vst [vmem:[#allocation21_spill] sm:$0xff] %v5344_v50  ;;  %v380_v55 = vadd.f32 %v379_v51, %v5086_v40  ;;  %v394_v62 = vadd.f32 %v393_v56, %v5088_v41  ;;  %1255 = vmatpush.bf16.msra.mxu2 %v5320_v31  ;;  %1269 = vmatpush.bf16.msra.mxu3 %v5322_v32  ;;  %v4280_v51 = vld [vmem:[%s6409_s4 + $0x2c] sm:$0xf] }
  0xc3   :  { %4076 = vmatmul.msk.bf16.vlgmr.msrb.gmra.mxu0 %vm123_vm2, %v4318_v26  ;;  %4077 = vmatmul.msk.bf16.vlgmr.msrb.gmra.mxu1 %vm123_vm2, %v4318_v26 }
  0xc4   :  { %v5386_v19 = vpack.c.bf16 %v394_v62, %v380_v55  ;;  %1228 = vmatpush.bf16.msra.mxu0 %v5347_v54  ;;  %1242 = vmatpush.bf16.msra.mxu1 %v5351_v57  ;;  %v4112_v55 = vld [vmem:[%s6409_s4 + $0x38] sm:$0xf0]  ;;  %v5430_v62 = vor.u32 %v4281_v29, %v4102_v28  ;;  %v4275_v29 = vld [vmem:[%s6409_s4 + $0x4] sm:$0xf] }
  0xc5   :  { %4078 = vmatmul.msk.bf16.vlgmr.msrb.gmra.mxu2 %vm123_vm2, %v4318_v26  ;;  %4079 = vmatmul.msk.bf16.vlgmr.msrb.gmra.mxu3 %vm123_vm2, %v4318_v26  ;;  %v4279_v26 = vld [vmem:[%s6409_s4 + $0x24] sm:$0xf]  ;;  %v5448_v28 = vor.u32 %v4280_v51, %v4112_v55  ;;  %v4096_v51 = vld [vmem:[%s6409_s4 + $0x18] sm:$0xf0]  ;;  %v5471_v55 = vor.u32 %v4277_v16, %v4086_v15 }
  0xc6   :  { %6458 = vst [vmem:[#allocation22_spill] sm:$0xff] %v5386_v19  ;;  %1256 = vmatpush.bf16.msra.mxu2 %v5362_v63  ;;  %1270 = vmatpush.bf16.msra.mxu3 %v5364_v0  ;;  %v5436_v9 = vor.u32 %v4279_v26, %v4104_v37  ;;  %v4088_v26 = vld [vmem:[%s6409_s4 + $0x10] sm:$0xf0]  ;;  %v4094_v37 = vld [vmem:[%s6409_s4 + $0x8] sm:$0xf]  ;;  %v4319_v19 = vld [vmem:[#allocation3] sm:$0xff] }
  0xc7   :  { %s5769_s4 = sld [smem:[#allocation6]] }
  0xc8   :  { %v407_v42 = vpop.f32.mrf.mxu2  ;;  %v421_v60 = vpop.f32.mrf.mxu3  ;;  %1229 = vmatpush.bf16.msra.mxu0 %v5390_v20  ;;  %1243 = vmatpush.bf16.msra.mxu1 %v5394_v22 }
  0xc9   :  { %v408_v56 = vadd.f32 %v407_v42, %v5100_v48  ;;  %v5427_v61 = vpop.f32.mrf.mxu0  ;;  %v422_v3 = vadd.f32 %v421_v60, %v5104_v49  ;;  %v5433_v8 = vpop.f32.mrf.mxu1  ;;  %v5478_v60 = vor.u32 %v4278_v39, %v4094_v37 }
  0xca   :  { %6459 = vst [vmem:[#allocation23_spill] sm:$0xff] %v5427_v61  ;;  %1257 = vmatpush.bf16.msra.mxu2 %v5404_v33  ;;  %1271 = vmatpush.bf16.msra.mxu3 %v5406_v36 }
  0xcb   :  { %6460 = vst [vmem:[#allocation24_spill] sm:$0xff] %v5433_v8  ;;  %v5459_v42 = vpack.c.bf16 %v422_v3, %v408_v56  ;;  %v5474_v56 = vor.u32 %v4275_v29, %v4088_v26  ;;  %v5480_v3 = vor.u32 %v4276_v43, %v4096_v51 }
  0xcc   :  { %1230 = vmatpush.bf16.msra.mxu0 %v5430_v62  ;;  %1244 = vmatpush.bf16.msra.mxu1 %v5436_v9  ;;  %6462 = vst [vmem:[#allocation26_spill] sm:$0xff] %v5478_v60 }
  0xcd   :  { %6461 = vst [vmem:[#allocation25_spill] sm:$0xff] %v5459_v42 }
  0xce   :  { %1258 = vmatpush.bf16.msra.mxu2 %v5446_v17  ;;  %1272 = vmatpush.bf16.msra.mxu3 %v5448_v28  ;;  %6463 = vst [vmem:[#allocation27_spill] sm:$0xff] %v5480_v3 }
  0xd0   :  { %v5482_v42 = vpop.f32.mrf.mxu2  ;;  %v5484_v8 = vpop.f32.mrf.mxu3  ;;  %1231 = vmatpush.bf16.msra.mxu0 %v5471_v55  ;;  %1245 = vmatpush.bf16.msra.mxu1 %v5474_v56 }
  0xd1   :  { %6464 = vst [vmem:[#allocation28_spill] sm:$0xff] %v5482_v42  ;;  %v455_v61 = vpop.f32.mrf.mxu0  ;;  %v469_v16 = vpop.f32.mrf.mxu1 }
  0xd2   :  { %6465 = vst [vmem:[#allocation29_spill] sm:$0xff] %v5484_v8  ;;  %v456_v15 = vadd.f32 %v455_v61, %v5086_v40  ;;  %v470_v29 = vadd.f32 %v469_v16, %v5088_v41  ;;  %1259 = vmatpush.bf16.msra.mxu2 %v5478_v60  ;;  %1273 = vmatpush.bf16.msra.mxu3 %v5480_v3 }
  0xd3   :  { %1232 = vmatmul.bf16.vlgmr.msra.gmra.mxu0 %v4319_v19  ;;  %1246 = vmatmul.bf16.vlgmr.msra.gmra.mxu1 %v4319_v19 }
  0xd4   :  { %1452 = vmatpush.bf16.msrb.mxu0 %v5183_v27  ;;  %1466 = vmatpush.bf16.msrb.mxu1 %v5186_v30  ;;  %v5494_v26 = vpack.c.bf16 %v470_v29, %v456_v15 }
  0xd5   :  { %1260 = vmatmul.bf16.vlgmr.msra.gmra.mxu2 %v4319_v19  ;;  %1274 = vmatmul.bf16.vlgmr.msra.gmra.mxu3 %v4319_v19 }
  0xd6   :  { %6466 = vst [vmem:[#allocation30_spill] sm:$0xff] %v5494_v26  ;;  %1480 = vmatpush.bf16.msrb.mxu2 %v5195_v34  ;;  %1494 = vmatpush.bf16.msrb.mxu3 %v5197_v35 }
  0xd8   :  { %1453 = vmatpush.bf16.msrb.mxu0 %v5223_v45  ;;  %v483_v61 = vpop.f32.mrf.mxu2  ;;  %1467 = vmatpush.bf16.msrb.mxu1 %v5227_v46  ;;  %v497_v39 = vpop.f32.mrf.mxu3 }
  0xd9   :  { %v484_v37 = vadd.f32 %v483_v61, %v5100_v48  ;;  %v5501_v43 = vpop.f32.mrf.mxu0  ;;  %v498_v51 = vadd.f32 %v497_v39, %v5104_v49  ;;  %v5505_v15 = vpop.f32.mrf.mxu1 }
  0xda   :  { %6467 = vst [vmem:[#allocation31_spill] sm:$0xff] %v5501_v43  ;;  %1481 = vmatpush.bf16.msrb.mxu2 %v5237_v52  ;;  %1495 = vmatpush.bf16.msrb.mxu3 %v5239_v53 }
  0xdb   :  { %6468 = vst [vmem:[#allocation32_spill] sm:$0xff] %v5505_v15  ;;  %v5509_v19 = vpack.c.bf16 %v498_v51, %v484_v37 }
  0xdc   :  { %1454 = vmatpush.bf16.msrb.mxu0 %v5263_v2  ;;  %1468 = vmatpush.bf16.msrb.mxu1 %v5269_v7 }
  0xdd   :  { %6469 = vst [vmem:[#allocation33_spill] sm:$0xff] %v5509_v19 }
  0xde   :  { %1482 = vmatpush.bf16.msrb.mxu2 %v5279_v11  ;;  %1496 = vmatpush.bf16.msrb.mxu3 %v5281_v14 }
  0xe0   :  { %1455 = vmatpush.bf16.msrb.mxu0 %v5304_v23  ;;  %v5515_v16 = vpop.f32.mrf.mxu2  ;;  %1469 = vmatpush.bf16.msrb.mxu1 %v5307_v24  ;;  %v5518_v29 = vpop.f32.mrf.mxu3 }
  0xe1   :  { %6470 = vst [vmem:[#allocation34_spill] sm:$0xff] %v5515_v16  ;;  %v531_v61 = vpop.f32.mrf.mxu0  ;;  %v545_v39 = vpop.f32.mrf.mxu1 }
  0xe2   :  { %6471 = vst [vmem:[#allocation35_spill] sm:$0xff] %v5518_v29  ;;  %1483 = vmatpush.bf16.msrb.mxu2 %v5320_v31  ;;  %v532_v37 = vadd.f32 %v531_v61, %v5086_v40  ;;  %v546_v51 = vadd.f32 %v545_v39, %v5088_v41  ;;  %1497 = vmatpush.bf16.msrb.mxu3 %v5322_v32 }
  0xe4   :  { %1456 = vmatpush.bf16.msrb.mxu0 %v5347_v54  ;;  %1470 = vmatpush.bf16.msrb.mxu1 %v5351_v57  ;;  %v5526_v19 = vpack.c.bf16 %v546_v51, %v532_v37 }
  0xe6   :  { %6472 = vst [vmem:[#allocation36_spill] sm:$0xff] %v5526_v19  ;;  %1484 = vmatpush.bf16.msrb.mxu2 %v5362_v63  ;;  %1498 = vmatpush.bf16.msrb.mxu3 %v5364_v0 }
  0xe8   :  { %1457 = vmatpush.bf16.msrb.mxu0 %v5390_v20  ;;  %v559_v29 = vpop.f32.mrf.mxu2  ;;  %1471 = vmatpush.bf16.msrb.mxu1 %v5394_v22  ;;  %v573_v39 = vpop.f32.mrf.mxu3 }
  0xe9   :  { %v560_v61 = vadd.f32 %v559_v29, %v5100_v48  ;;  %v5533_v16 = vpop.f32.mrf.mxu0  ;;  %v574_v26 = vadd.f32 %v573_v39, %v5104_v49  ;;  %v5537_v37 = vpop.f32.mrf.mxu1 }
  0xea   :  { %6473 = vst [vmem:[#allocation37_spill] sm:$0xff] %v5533_v16  ;;  %1485 = vmatpush.bf16.msrb.mxu2 %v5404_v33  ;;  %1499 = vmatpush.bf16.msrb.mxu3 %v5406_v36 }
  0xeb   :  { %6474 = vst [vmem:[#allocation38_spill] sm:$0xff] %v5537_v37  ;;  %v5541_v51 = vpack.c.bf16 %v574_v26, %v560_v61 }
  0xec   :  { %1458 = vmatpush.bf16.msrb.mxu0 %v5430_v62  ;;  %1472 = vmatpush.bf16.msrb.mxu1 %v5436_v9 }
  0xed   :  { %6475 = vst [vmem:[#allocation39_spill] sm:$0xff] %v5541_v51 }
  0xee   :  { %1486 = vmatpush.bf16.msrb.mxu2 %v5446_v17  ;;  %1500 = vmatpush.bf16.msrb.mxu3 %v5448_v28 }
  0xf0   :  { %1459 = vmatpush.bf16.msrb.mxu0 %v5471_v55  ;;  %v5547_v29 = vpop.f32.mrf.mxu2  ;;  %1473 = vmatpush.bf16.msrb.mxu1 %v5474_v56  ;;  %v5551_v39 = vpop.f32.mrf.mxu3 }
  0xf1   :  { %6476 = vst [vmem:[#allocation40_spill] sm:$0xff] %v5547_v29  ;;  %v607_v19 = vpop.f32.mrf.mxu0  ;;  %v621_v61 = vpop.f32.mrf.mxu1 }
  0xf2   :  { %6477 = vst [vmem:[#allocation41_spill] sm:$0xff] %v5551_v39  ;;  %1487 = vmatpush.bf16.msrb.mxu2 %v5478_v60  ;;  %v608_v26 = vadd.f32 %v607_v19, %v5086_v40  ;;  %v622_v51 = vadd.f32 %v621_v61, %v5088_v41  ;;  %1501 = vmatpush.bf16.msrb.mxu3 %v5480_v3 }
  0xf4   :  { %1678 = vmatpush.bf16.msra.mxu0 %v5183_v27  ;;  %1692 = vmatpush.bf16.msra.mxu1 %v5186_v30  ;;  %v5561_v29 = vpack.c.bf16 %v622_v51, %v608_v26 }
  0xf6   :  { %1706 = vmatpush.bf16.msra.mxu2 %v5195_v34  ;;  %1720 = vmatpush.bf16.msra.mxu3 %v5197_v35  ;;  %6478 = vst [vmem:[#allocation42_spill] sm:$0xff] %v5561_v29 }
  0xf8   :  { %1679 = vmatpush.bf16.msra.mxu0 %v5223_v45  ;;  %1693 = vmatpush.bf16.msra.mxu1 %v5227_v46  ;;  %v635_v39 = vpop.f32.mrf.mxu2  ;;  %v649_v61 = vpop.f32.mrf.mxu3 }
  0xf9   :  { %v636_v19 = vadd.f32 %v635_v39, %v5100_v48  ;;  %v5568_v37 = vpop.f32.mrf.mxu0  ;;  %v650_v16 = vadd.f32 %v649_v61, %v5104_v49  ;;  %v5572_v51 = vpop.f32.mrf.mxu1 }
  0xfa   :  { %1707 = vmatpush.bf16.msra.mxu2 %v5237_v52  ;;  %1721 = vmatpush.bf16.msra.mxu3 %v5239_v53  ;;  %6479 = vst [vmem:[#allocation43_spill] sm:$0xff] %v5568_v37 }
  0xfb   :  { %6480 = vst [vmem:[#allocation44_spill] sm:$0xff] %v5572_v51  ;;  %v5575_v26 = vpack.c.bf16 %v650_v16, %v636_v19 }
  0xfc   :  { %1680 = vmatpush.bf16.msra.mxu0 %v5263_v2  ;;  %1694 = vmatpush.bf16.msra.mxu1 %v5269_v7 }
  0xfd   :  { %6481 = vst [vmem:[#allocation45_spill] sm:$0xff] %v5575_v26 }
  0xfe   :  { %1708 = vmatpush.bf16.msra.mxu2 %v5279_v11  ;;  %1722 = vmatpush.bf16.msra.mxu3 %v5281_v14 }
 0x100   :  { %1681 = vmatpush.bf16.msra.mxu0 %v5304_v23  ;;  %1695 = vmatpush.bf16.msra.mxu1 %v5307_v24  ;;  %v5581_v39 = vpop.f32.mrf.mxu2  ;;  %v5585_v61 = vpop.f32.mrf.mxu3 }
 0x101   :  { %6482 = vst [vmem:[#allocation46_spill] sm:$0xff] %v5581_v39  ;;  %v683_v29 = vpop.f32.mrf.mxu0  ;;  %v697_v19 = vpop.f32.mrf.mxu1 }
 0x102   :  { %1709 = vmatpush.bf16.msra.mxu2 %v5320_v31  ;;  %1723 = vmatpush.bf16.msra.mxu3 %v5322_v32  ;;  %6483 = vst [vmem:[#allocation47_spill] sm:$0xff] %v5585_v61  ;;  %v684_v16 = vadd.f32 %v683_v29, %v5086_v40  ;;  %v698_v26 = vadd.f32 %v697_v19, %v5088_v41 }
 0x104   :  { %1682 = vmatpush.bf16.msra.mxu0 %v5347_v54  ;;  %1696 = vmatpush.bf16.msra.mxu1 %v5351_v57  ;;  %v5593_v39 = vpack.c.bf16 %v698_v26, %v684_v16 }
 0x106   :  { %1710 = vmatpush.bf16.msra.mxu2 %v5362_v63  ;;  %1724 = vmatpush.bf16.msra.mxu3 %v5364_v0  ;;  %6484 = vst [vmem:[#allocation48_spill] sm:$0xff] %v5593_v39 }
 0x108   :  { %1683 = vmatpush.bf16.msra.mxu0 %v5390_v20  ;;  %1697 = vmatpush.bf16.msra.mxu1 %v5394_v22  ;;  %v711_v61 = vpop.f32.mrf.mxu2  ;;  %v725_v51 = vpop.f32.mrf.mxu3 }
 0x109   :  { %v712_v29 = vadd.f32 %v711_v61, %v5100_v48  ;;  %v5600_v37 = vpop.f32.mrf.mxu0  ;;  %v726_v19 = vadd.f32 %v725_v51, %v5104_v49  ;;  %v5604_v26 = vpop.f32.mrf.mxu1 }
 0x10a   :  { %1711 = vmatpush.bf16.msra.mxu2 %v5404_v33  ;;  %1725 = vmatpush.bf16.msra.mxu3 %v5406_v36  ;;  %6485 = vst [vmem:[#allocation49_spill] sm:$0xff] %v5600_v37 }
 0x10b   :  { %6486 = vst [vmem:[#allocation50_spill] sm:$0xff] %v5604_v26  ;;  %v5607_v16 = vpack.c.bf16 %v726_v19, %v712_v29 }
 0x10c   :  { %1684 = vmatpush.bf16.msra.mxu0 %v5430_v62  ;;  %1698 = vmatpush.bf16.msra.mxu1 %v5436_v9 }
 0x10d   :  { %6487 = vst [vmem:[#allocation51_spill] sm:$0xff] %v5607_v16 }
 0x10e   :  { %1712 = vmatpush.bf16.msra.mxu2 %v5446_v17  ;;  %1726 = vmatpush.bf16.msra.mxu3 %v5448_v28 }
 0x110   :  { %1685 = vmatpush.bf16.msra.mxu0 %v5471_v55  ;;  %1699 = vmatpush.bf16.msra.mxu1 %v5474_v56  ;;  %v5613_v61 = vpop.f32.mrf.mxu2  ;;  %v5616_v39 = vpop.f32.mrf.mxu3 }
 0x111   :  { %6488 = vst [vmem:[#allocation52_spill] sm:$0xff] %v5613_v61  ;;  %v759_v51 = vpop.f32.mrf.mxu0  ;;  %v773_v37 = vpop.f32.mrf.mxu1 }
 0x112   :  { %1713 = vmatpush.bf16.msra.mxu2 %v5478_v60  ;;  %1727 = vmatpush.bf16.msra.mxu3 %v5480_v3  ;;  %6489 = vst [vmem:[#allocation53_spill] sm:$0xff] %v5616_v39  ;;  %v760_v26 = vadd.f32 %v759_v51, %v5086_v40  ;;  %v774_v29 = vadd.f32 %v773_v37, %v5088_v41 }
 0x114   :  { %v5620_v19 = vpack.c.bf16 %v774_v29, %v760_v26 }
 0x116   :  { %6490 = vst [vmem:[#allocation54_spill] sm:$0xff] %v5620_v19 }
 0x118   :  { %v787_v16 = vpop.f32.mrf.mxu2  ;;  %v801_v43 = vpop.f32.mrf.mxu3 }
 0x119   :  { %v788_v15 = vadd.f32 %v787_v16, %v5100_v48  ;;  %v5623_v8 = vpop.f32.mrf.mxu0  ;;  %v802_v61 = vadd.f32 %v801_v43, %v5104_v49  ;;  %v5626_v42 = vpop.f32.mrf.mxu1 }
 0x11a   :  { %6491 = vst [vmem:[#allocation55_spill] sm:$0xff] %v5623_v8 }
 0x11b   :  { %6492 = vst [vmem:[#allocation56_spill] sm:$0xff] %v5626_v42  ;;  %v5628_v18 = vpack.c.bf16 %v802_v61, %v788_v15 }
 0x11d   :  { %6493 = vst [vmem:[#allocation57_spill] sm:$0xff] %v5628_v18 }
 0x120   :  { %v5630_v39 = vpop.f32.mrf.mxu2  ;;  %v5632_v51 = vpop.f32.mrf.mxu3 }
 0x121   :  { %6494 = vst [vmem:[#allocation58_spill] sm:$0xff] %v5630_v39  ;;  %v835_v50 = vpop.f32.mrf.mxu0  ;;  %v849_v26 = vpop.f32.mrf.mxu1 }
 0x122   :  { %6495 = vst [vmem:[#allocation59_spill] sm:$0xff] %v5632_v51  ;;  %v836_v37 = vadd.f32 %v835_v50, %v5086_v40  ;;  %v850_v29 = vadd.f32 %v849_v26, %v5088_v41 }
 0x124   :  { %v5636_v16 = vpack.c.bf16 %v850_v29, %v836_v37 }
 0x126   :  { %6496 = vst [vmem:[#allocation60_spill] sm:$0xff] %v5636_v16 }
 0x128   :  { %v863_v19 = vpop.f32.mrf.mxu2  ;;  %v877_v43 = vpop.f32.mrf.mxu3 }
 0x129   :  { %v864_v8 = vadd.f32 %v863_v19, %v5100_v48  ;;  %v5639_v38 = vpop.f32.mrf.mxu0  ;;  %v878_v15 = vadd.f32 %v877_v43, %v5104_v49  ;;  %v5642_v61 = vpop.f32.mrf.mxu1 }
 0x12a   :  { %6497 = vst [vmem:[#allocation61_spill] sm:$0xff] %v5639_v38 }
 0x12b   :  { %6498 = vst [vmem:[#allocation62_spill] sm:$0xff] %v5642_v61  ;;  %v5644_v18 = vpack.c.bf16 %v878_v15, %v864_v8 }
 0x12d   :  { %6499 = vst [vmem:[#allocation63_spill] sm:$0xff] %v5644_v18 }
 0x130   :  { %v5646_v51 = vpop.f32.mrf.mxu2  ;;  %v5648_v50 = vpop.f32.mrf.mxu3 }
 0x131   :  { %6500 = vst [vmem:[#allocation64_spill] sm:$0xff] %v5646_v51  ;;  %v911_v39 = vpop.f32.mrf.mxu0  ;;  %v925_v26 = vpop.f32.mrf.mxu1 }
 0x132   :  { %6501 = vst [vmem:[#allocation65_spill] sm:$0xff] %v5648_v50  ;;  %v912_v37 = vadd.f32 %v911_v39, %v5086_v40  ;;  %v926_v29 = vadd.f32 %v925_v26, %v5088_v41 }
 0x134   :  { %v5652_v19 = vpack.c.bf16 %v926_v29, %v912_v37 }
 0x136   :  { %6502 = vst [vmem:[#allocation66_spill] sm:$0xff] %v5652_v19 }
 0x138   :  { %v939_v16 = vpop.f32.mrf.mxu2  ;;  %v953_v43 = vpop.f32.mrf.mxu3 }
 0x139   :  { %v940_v38 = vadd.f32 %v939_v16, %v5100_v48  ;;  %v5655_v42 = vpop.f32.mrf.mxu0  ;;  %v954_v8 = vadd.f32 %v953_v43, %v5104_v49  ;;  %v5658_v15 = vpop.f32.mrf.mxu1 }
 0x13a   :  { %6503 = vst [vmem:[#allocation67_spill] sm:$0xff] %v5655_v42 }
 0x13b   :  { %6504 = vst [vmem:[#allocation68_spill] sm:$0xff] %v5658_v15  ;;  %v5660_v18 = vpack.c.bf16 %v954_v8, %v940_v38 }
 0x13d   :  { %6505 = vst [vmem:[#allocation69_spill] sm:$0xff] %v5660_v18 }
 0x140   :  { %v5662_v50 = vpop.f32.mrf.mxu2  ;;  %v5664_v39 = vpop.f32.mrf.mxu3 }
 0x141   :  { %6506 = vst [vmem:[#allocation70_spill] sm:$0xff] %v5662_v50  ;;  %v987_v51 = vpop.f32.mrf.mxu0  ;;  %v1001_v26 = vpop.f32.mrf.mxu1 }
 0x142   :  { %6507 = vst [vmem:[#allocation71_spill] sm:$0xff] %v5664_v39  ;;  %v988_v37 = vadd.f32 %v987_v51, %v5086_v40  ;;  %v1002_v29 = vadd.f32 %v1001_v26, %v5088_v41  ;;  %v1280_v51 = vunpack.c.l.bf16 %v5095_v47  ;;  %v1281_v26 = vunpack.c.h.bf16 %v5095_v47 }
 0x144   :  { %v5668_v16 = vpack.c.bf16 %v1002_v29, %v988_v37 }
 0x146   :  { %6508 = vst [vmem:[#allocation72_spill] sm:$0xff] %v5668_v16 }
 0x148   :  { %v1015_v19 = vpop.f32.mrf.mxu2  ;;  %v1029_v43 = vpop.f32.mrf.mxu3 }
 0x149   :  { %v1016_v42 = vadd.f32 %v1015_v19, %v5100_v48  ;;  %v5671_v61 = vpop.f32.mrf.mxu0  ;;  %v1030_v38 = vadd.f32 %v1029_v43, %v5104_v49  ;;  %v5674_v8 = vpop.f32.mrf.mxu1  ;;  %v1282_v43 = vunpack.c.l.bf16 %v5117_v58 }
 0x14a   :  { %6509 = vst [vmem:[#allocation73_spill] sm:$0xff] %v5671_v61 }
 0x14b   :  { %6510 = vst [vmem:[#allocation74_spill] sm:$0xff] %v5674_v8  ;;  %v5676_v18 = vpack.c.bf16 %v1030_v38, %v1016_v42  ;;  %v1283_v8 = vunpack.c.h.bf16 %v5117_v58 }
 0x14d   :  { %6511 = vst [vmem:[#allocation75_spill] sm:$0xff] %v5676_v18 }
 0x150   :  { %v5678_v39 = vpop.f32.mrf.mxu2  ;;  %v5681_v50 = vpop.f32.mrf.mxu3 }
 0x151   :  { %6512 = vst [vmem:[#allocation76_spill] sm:$0xff] %v5678_v39  ;;  %v1233_v37 = vpop.f32.mrf.mxu0  ;;  %v1247_v19 = vpop.f32.mrf.mxu1 }
 0x152   :  { %6513 = vst [vmem:[#allocation77_spill] sm:$0xff] %v5681_v50  ;;  %v1288_v29 = vadd.f32 %v1280_v51, %v1233_v37  ;;  %v1289_v16 = vadd.f32 %v1281_v26, %v1247_v19  ;;  %v1285_v50 = vunpack.c.h.bf16 %v5119_v59 }
 0x154   :  { %v1296_v15 = vpack.c.bf16 %v1289_v16, %v1288_v29 }
 0x156   :  { %v1300_v61 = vxor.u32 2147516416, %v1296_v15 }
 0x158   :  { %v1304_v42 = vunpack.c.l.bf16 %v1300_v61  ;;  %v1305_v38 = vunpack.c.h.bf16 %v1300_v61  ;;  %v1261_v18 = vpop.f32.mrf.mxu2  ;;  %v1275_v39 = vpop.f32.mrf.mxu3 }
 0x159   :  { %v1290_v4 = vadd.f32 %v1282_v43, %v1261_v18  ;;  %v1291_v1 = vadd.f32 %v1283_v8, %v1275_v39  ;;  %v1235_v47 = vpop.f32.mrf.mxu0  ;;  %v1249_v51 = vpop.f32.mrf.mxu1 }
 0x15a   :  { %v1310_v37 = vmul.f32 1.442695, %v1304_v42  ;;  %v1312_v26 = vmul.f32 1.442695, %v1305_v38  ;;  %v1292_v16 = vadd.f32 %v1284_v44, %v1235_v47  ;;  %v1293_v15 = vadd.f32 %v1285_v50, %v1249_v51 }
 0x15b   :  { %v1297_v29 = vpack.c.bf16 %v1291_v1, %v1290_v4 }
 0x15c   :  { %4395 = vpow2.f32 %v1310_v37  ;;  %v1298_v19 = vpack.c.bf16 %v1293_v15, %v1292_v16 }
 0x15d   :  { %4397 = vpow2.f32 %v1312_v26  ;;  %v1301_v58 = vxor.u32 2147516416, %v1297_v29  ;;  %v1374_v37 = vrot.slane %v1297_v29, 4 }
 0x15e   :  { %v1302_v61 = vxor.u32 2147516416, %v1298_v19 }
 0x15f   :  { %v1306_v49 = vunpack.c.l.bf16 %v1301_v58 }
 0x160   :  { %v1307_v59 = vunpack.c.l.bf16 %v1302_v61  ;;  %v1308_v18 = vunpack.c.h.bf16 %v1302_v61  ;;  %v1263_v39 = vpop.f32.mrf.mxu2  ;;  %v1277_v8 = vpop.f32.mrf.mxu3  ;;  %v1378_v61 = vunpack.c.l.bf16 %v1374_v37 }
 0x161   :  { %v1294_v43 = vadd.f32 %v1286_v13, %v1263_v39  ;;  %v1295_v42 = vadd.f32 %v1287_v25, %v1277_v8  ;;  %v1314_v51 = vmul.f32 1.442695, %v1306_v49 }
 0x162   :  { %v4396_v38 = vpop.eup %4395  ;;  %v1316_v44 = vmul.f32 1.442695, %v1307_v59  ;;  %v1318_v50 = vmul.f32 1.442695, %v1308_v18 }
 0x163   :  { %v4398_v1 = vpop.eup %4397  ;;  %v1299_v4 = vpack.c.bf16 %v1295_v42, %v1294_v43 }
 0x164   :  { %v1322_v47 = vpack.c.bf16 %v4398_v1, %v4396_v38  ;;  %4399 = vpow2.f32 %v1316_v44 }
 0x165   :  { %4401 = vpow2.f32 %v1318_v50  ;;  %v1303_v26 = vxor.u32 2147516416, %v1299_v4  ;;  %v1375_v49 = vrot.slane %v1299_v4, 4 }
 0x166   :  { %v1326_v16 = vunpack.c.l.bf16 %v1322_v47  ;;  %v1327_v5 = vunpack.c.h.bf16 %v1322_v47  ;;  %4403 = vpow2.f32 %v1314_v51  ;;  %v4844_v51 = vmov 1065369472  }
 0x167   :  { %v1309_v15 = vunpack.c.l.bf16 %v1303_v26  ;;  %v5690_v37 = vunpack.c.h.bf16 %v4844_v51  ;;  %v1379_v26 = vunpack.c.l.bf16 %v1375_v49 }
 0x168   :  { %v1332_v19 = vadd.f32 1.0, %v1326_v16  ;;  %v1333_v58 = vadd.f32 1.0, %v1327_v5  ;;  %v5692_v16 = vunpack.c.l.bf16 %v4844_v51 }
 0x169   :  { %v1320_v13 = vmul.f32 1.442695, %v1309_v15 }
 0x16a   :  { %v4400_v25 = vpop.eup %4399  ;;  %v1338_v39 = vpack.c.bf16 %v1333_v58, %v1332_v19 }
 0x16b   :  { %v4402_v59 = vpop.eup %4401  ;;  %4405 = vpow2.f32 %v1320_v13 }
 0x16c   :  { %v1344_v18 = vunpack.c.h.bf16 %v1338_v39  ;;  %v1345_v8 = vunpack.c.l.bf16 %v1338_v39  ;;  %v1324_v43 = vpack.c.bf16 %v4402_v59, %v4400_v25  ;;  %4407 = vtanh.f32 %v1378_v61  ;;  %v4404_v29 = vpop.eup %4403 }
 0x16d   :  { %v1323_v47 = vpack.c.bf16 %v4404_v29, %v4404_v29 }
 0x16e   :  { %4409 = vrcp.f32 %v1344_v18  ;;  %v1329_v42 = vunpack.c.l.bf16 %v1324_v43  ;;  %v1330_v38 = vunpack.c.h.bf16 %v1324_v43 }
 0x16f   :  { %4411 = vrcp.f32 %v1345_v8  ;;  %v1328_v25 = vunpack.c.l.bf16 %v1323_v47 }
 0x170   :  { %v1335_v44 = vadd.f32 1.0, %v1329_v42  ;;  %v1336_v50 = vadd.f32 1.0, %v1330_v38  ;;  %4413 = vtanh.f32 %v1379_v26 }
 0x171   :  { %v4406_v1 = vpop.eup %4405  ;;  %v1334_v49 = vadd.f32 1.0, %v1328_v25 }
 0x172   :  { %v1340_v5 = vpack.c.bf16 %v1336_v50, %v1335_v44  ;;  %v4408_v15 = vpop.eup %4407  ;;  %v1325_v19 = vpack.c.bf16 %v4406_v1, %v4406_v1 }
 0x173   :  { %v1382_v18 = vpack.c.bf16 %v4408_v15, %v4408_v15  ;;  %v1339_v21 = vpack.c.bf16 %v1334_v49, %v1334_v49 }
 0x174   :  { %v4410_v58 = vpop.eup %4409  ;;  %v1358_v4 = vunpack.c.h.bf16 %v1340_v5  ;;  %v1359_v61 = vunpack.c.l.bf16 %v1340_v5  ;;  %v1331_v8 = vunpack.c.l.bf16 %v1325_v19 }
 0x175   :  { %v4412_v13 = vpop.eup %4411  ;;  %v1347_v39 = vmul.f32 %v4410_v58, %v5690_v37  ;;  %v1398_v38 = vunpack.c.l.bf16 %v1382_v18 }
 0x176   :  { %v1349_v59 = vmul.f32 %v4412_v13, %v5692_v16  ;;  %4415 = vrcp.f32 %v1358_v4  ;;  %v4414_v44 = vpop.eup %4413  ;;  %v1337_v50 = vadd.f32 1.0, %v1331_v8 }
 0x177   :  { %4417 = vrcp.f32 %v1359_v61  ;;  %v1383_v4 = vpack.c.bf16 %v4414_v44, %v4414_v44 }
 0x178   :  { %v1350_v43 = vpack.c.bf16 %v1347_v39, %v1349_v59  ;;  %v1341_v61 = vpack.c.bf16 %v1337_v50, %v1337_v50  ;;  %v1351_v39 = vunpack.c.h.bf16 %v1339_v21  ;;  %v1352_v59 = vunpack.c.l.bf16 %v1339_v21 }
 0x17a   :  { %v1388_v29 = vrot.slane %v1350_v43, 4  ;;  %v1396_v42 = vunpack.c.l.bf16 %v1350_v43  ;;  %4419 = vrcp.f32 %v1351_v39 }
 0x17b   :  { %4421 = vrcp.f32 %v1352_v59 }
 0x17c   :  { %v4416_v1 = vpop.eup %4415  ;;  %v1392_v51 = vunpack.c.l.bf16 %v1388_v29  ;;  %v1400_v5 = vmul.f32 %v1398_v38, %v1396_v42  ;;  %v1399_v29 = vunpack.c.l.bf16 %v1383_v4  ;;  %v1365_v42 = vunpack.c.h.bf16 %v1341_v61 }
 0x17d   :  { %v4418_v47 = vpop.eup %4417  ;;  %v1361_v26 = vmul.f32 %v4416_v1, %v5690_v37  ;;  %v1366_v38 = vunpack.c.l.bf16 %v1341_v61 }
 0x17e   :  { %v1402_v58 = vpack.c.bf16 %v1400_v5, %v1400_v5  ;;  %v1363_v15 = vmul.f32 %v4418_v47, %v5692_v16  ;;  %v1394_v19 = vmul.f32 0.0, %v1392_v51  ;;  %4423 = vrcp.f32 %v1365_v42 }
 0x17f   :  { %4425 = vrcp.f32 %v1366_v38 }
 0x180   :  { %v1404_v13 = vunpack.c.l.bf16 %v1402_v58  ;;  %v1364_v25 = vpack.c.bf16 %v1361_v26, %v1363_v15  ;;  %v4420_v26 = vpop.eup %4419 }
 0x181   :  { %v4422_v58 = vpop.eup %4421 }
 0x182   :  { %v5698_v18 = vadd.f32 %v1404_v13, %v1394_v19  ;;  %v1389_v8 = vrot.slane %v1364_v25, 4  ;;  %v1397_v43 = vunpack.c.l.bf16 %v1364_v25  ;;  %v1354_v25 = vmul.f32 %v4420_v26, %v5690_v37 }
 0x183   :  { %v1356_v39 = vmul.f32 %v4422_v58, %v5692_v16 }
 0x184   :  { %v1408_v49 = vpack.c.bf16 %v5698_v18, %v5698_v18  ;;  %v1393_v1 = vunpack.c.l.bf16 %v1389_v8  ;;  %v1401_v5 = vmul.f32 %v1399_v29, %v1397_v43  ;;  %v4424_v4 = vpop.eup %4423 }
 0x185   :  { %v4426_v61 = vpop.eup %4425  ;;  %v1368_v59 = vmul.f32 %v4424_v4, %v5690_v37  ;;  %v1357_v29 = vpack.c.bf16 %v1354_v25, %v1356_v39  ;;  %v244_v4 = vadd.f32 %v5145_v12, %v5088_v41 }
 0x186   :  { %v1410_v44 = vunpack.c.l.bf16 %v1408_v49  ;;  %v1403_v50 = vpack.c.bf16 %v1401_v5, %v1401_v5  ;;  %v1395_v51 = vmul.f32 0.0, %v1393_v1  ;;  %v1370_v8 = vmul.f32 %v4426_v61, %v5692_v16 }
 0x187   :  { %v1416_v5 = vunpack.c.l.bf16 %v1357_v29  ;;  %v1508_v61 = vunpack.c.l.bf16 %v5132_v6 }
 0x188   :  { %v1405_v21 = vunpack.c.l.bf16 %v1403_v50  ;;  %4427 = vtanh.f32 %v1410_v44  ;;  %v1371_v42 = vpack.c.bf16 %v1368_v59, %v1370_v8 }
 0x18a   :  { %v5702_v47 = vadd.f32 %v1405_v21, %v1395_v51  ;;  %v1417_v44 = vunpack.c.l.bf16 %v1371_v42  ;;  %v6514_v42 = vld [vmem:[#allocation14_spill] sm:$0xff] }
 0x18c   :  { %v1409_v15 = vpack.c.bf16 %v5702_v47, %v5702_v47 }
 0x18e   :  { %v1411_v19 = vunpack.c.l.bf16 %v1409_v15  ;;  %v4428_v13 = vpop.eup %4427  ;;  %v230_v15 = vadd.f32 %v5141_v10, %v5086_v40 }
 0x18f   :  { %v1414_v43 = vpack.c.bf16 %v4428_v13, %v4428_v13 }
 0x190   :  { %4429 = vtanh.f32 %v1411_v19  ;;  %v1509_v19 = vunpack.c.h.bf16 %v5132_v6  ;;  %v276_v8 = vpack.c.bf16 %v244_v4, %v230_v15 }
 0x191   :  { %v1418_v38 = vunpack.c.l.bf16 %v1414_v43 }
 0x192   :  { %v1512_v41 = vunpack.c.l.bf16 %v276_v8 }
 0x193   :  { %v5710_v51 = vmul.f32 %v1418_v38, %v1416_v5  ;;  %v6515_v38 = vld [vmem:[#allocation12_spill] sm:$0xff]  ;;  %v6517_v5 = vld [vmem:[#allocation13_spill] sm:$0xff] }
 0x194   :  { %v1511_v12 = vunpack.c.h.bf16 %v6517_v5 }
 0x196   :  { %v4430_v49 = vpop.eup %4429 }
 0x197   :  { %v1415_v1 = vpack.c.bf16 %v4430_v49, %v4430_v49  ;;  %v258_v49 = vadd.f32 %v6514_v42, %v5100_v48 }
 0x199   :  { %v1419_v50 = vunpack.c.l.bf16 %v1415_v1  ;;  %v6516_v1 = vld [vmem:[#allocation15_spill] sm:$0xff] }
 0x19a   :  { %v272_v10 = vadd.f32 %v6516_v1, %v6515_v38 }
 0x19b   :  { %v5712_v21 = vmul.f32 %v1419_v50, %v1417_v44  ;;  %v1510_v44 = vunpack.c.l.bf16 %v6517_v5 }
 0x19c   :  { %v277_v42 = vpack.c.bf16 %v272_v10, %v258_v49 }
 0x19d   :  { %v4334_v26 = vpack.c.bf16 %v5712_v21, %v5710_v51 }
 0x19e   :  { %v1514_v40 = vunpack.c.l.bf16 %v277_v42 }
 0x19f   :  { %4335 = vst [vmem:[#allocation3] sm:$0xff] %v4334_v26  }
 0x1a6   :  { %v4320_v58 = vld [vmem:[#allocation3] sm:$0xff] }
 0x1a7   :  { %1460 = vmatmul.bf16.vlgmr.msrb.gmra.mxu0 %v4320_v58  ;;  %1474 = vmatmul.bf16.vlgmr.msrb.gmra.mxu1 %v4320_v58 }
 0x1a8   :  { %1488 = vmatmul.bf16.vlgmr.msrb.gmra.mxu2 %v4320_v58  ;;  %1502 = vmatmul.bf16.vlgmr.msrb.gmra.mxu3 %v4320_v58 }
 0x1a9   :  { %1904 = vmatpush.bf16.msrb.mxu0 %v5183_v27  ;;  %1918 = vmatpush.bf16.msrb.mxu1 %v5186_v30 }
 0x1aa   :  { %1932 = vmatpush.bf16.msrb.mxu2 %v5195_v34  ;;  %1946 = vmatpush.bf16.msrb.mxu3 %v5197_v35 }
 0x1ad   :  { %1905 = vmatpush.bf16.msrb.mxu0 %v5223_v45  ;;  %1919 = vmatpush.bf16.msrb.mxu1 %v5227_v46 }
 0x1ae   :  { %1933 = vmatpush.bf16.msrb.mxu2 %v5237_v52  ;;  %1947 = vmatpush.bf16.msrb.mxu3 %v5239_v53 }
 0x1b1   :  { %1906 = vmatpush.bf16.msrb.mxu0 %v5263_v2  ;;  %1920 = vmatpush.bf16.msrb.mxu1 %v5269_v7 }
 0x1b2   :  { %1934 = vmatpush.bf16.msrb.mxu2 %v5279_v11  ;;  %1948 = vmatpush.bf16.msrb.mxu3 %v5281_v14 }
 0x1b5   :  { %1907 = vmatpush.bf16.msrb.mxu0 %v5304_v23  ;;  %1921 = vmatpush.bf16.msrb.mxu1 %v5307_v24 }
 0x1b6   :  { %1935 = vmatpush.bf16.msrb.mxu2 %v5320_v31  ;;  %1949 = vmatpush.bf16.msrb.mxu3 %v5322_v32 }
 0x1b9   :  { %1908 = vmatpush.bf16.msrb.mxu0 %v5347_v54  ;;  %1922 = vmatpush.bf16.msrb.mxu1 %v5351_v57 }
 0x1ba   :  { %1936 = vmatpush.bf16.msrb.mxu2 %v5362_v63  ;;  %1950 = vmatpush.bf16.msrb.mxu3 %v5364_v0 }
 0x1bd   :  { %1909 = vmatpush.bf16.msrb.mxu0 %v5390_v20  ;;  %1923 = vmatpush.bf16.msrb.mxu1 %v5394_v22 }
 0x1be   :  { %1937 = vmatpush.bf16.msrb.mxu2 %v5404_v33  ;;  %1951 = vmatpush.bf16.msrb.mxu3 %v5406_v36 }
 0x1c1   :  { %1910 = vmatpush.bf16.msrb.mxu0 %v5430_v62  ;;  %1924 = vmatpush.bf16.msrb.mxu1 %v5436_v9 }
 0x1c2   :  { %1938 = vmatpush.bf16.msrb.mxu2 %v5446_v17  ;;  %1952 = vmatpush.bf16.msrb.mxu3 %v5448_v28 }
 0x1c5   :  { %1911 = vmatpush.bf16.msrb.mxu0 %v5471_v55  ;;  %1925 = vmatpush.bf16.msrb.mxu1 %v5474_v56 }
 0x1c6   :  { %1939 = vmatpush.bf16.msrb.mxu2 %v5478_v60  ;;  %1953 = vmatpush.bf16.msrb.mxu3 %v5480_v3  ;;  %v1515_v3 = vunpack.c.h.bf16 %v277_v42 }
 0x224   :  { %v1461_v13 = vpop.f32.mrf.mxu0  ;;  %v1475_v25 = vpop.f32.mrf.mxu1 }
 0x225   :  { %v1516_v39 = vadd.f32 %v1508_v61, %v1461_v13  ;;  %v1517_v59 = vadd.f32 %v1509_v19, %v1475_v25  ;;  %v1513_v61 = vunpack.c.h.bf16 %v276_v8 }
 0x227   :  { %v1524_v43 = vpack.c.bf16 %v1517_v59, %v1516_v39 }
 0x229   :  { %v1528_v29 = vxor.u32 2147516416, %v1524_v43 }
 0x22b   :  { %v1532_v50 = vunpack.c.l.bf16 %v1528_v29  ;;  %v1533_v26 = vunpack.c.h.bf16 %v1528_v29  ;;  %v1489_v6 = vpop.f32.mrf.mxu2  ;;  %v1503_v58 = vpop.f32.mrf.mxu3 }
 0x22c   :  { %v1518_v19 = vadd.f32 %v1510_v44, %v1489_v6  ;;  %v1519_v15 = vadd.f32 %v1511_v12, %v1503_v58  ;;  %v1463_v4 = vpop.f32.mrf.mxu0  ;;  %v1477_v13 = vpop.f32.mrf.mxu1 }
 0x22d   :  { %v1538_v25 = vmul.f32 1.442695, %v1532_v50  ;;  %v1540_v39 = vmul.f32 1.442695, %v1533_v26  ;;  %v1520_v59 = vadd.f32 %v1512_v41, %v1463_v4  ;;  %v1521_v43 = vadd.f32 %v1513_v61, %v1477_v13 }
 0x22e   :  { %v1525_v1 = vpack.c.bf16 %v1519_v15, %v1518_v19 }
 0x22f   :  { %4431 = vpow2.f32 %v1538_v25  ;;  %v1526_v38 = vpack.c.bf16 %v1521_v43, %v1520_v59 }
 0x230   :  { %4433 = vpow2.f32 %v1540_v39  ;;  %v1529_v5 = vxor.u32 2147516416, %v1525_v1  ;;  %v1600_v15 = vrot.slane %v1525_v1, 4 }
 0x231   :  { %v1530_v48 = vxor.u32 2147516416, %v1526_v38 }
 0x232   :  { %v1534_v29 = vunpack.c.l.bf16 %v1529_v5  ;;  %v1604_v43 = vunpack.c.l.bf16 %v1600_v15 }
 0x233   :  { %v1535_v60 = vunpack.c.l.bf16 %v1530_v48  ;;  %v1536_v8 = vunpack.c.h.bf16 %v1530_v48  ;;  %v1491_v44 = vpop.f32.mrf.mxu2  ;;  %v1505_v12 = vpop.f32.mrf.mxu3 }
 0x234   :  { %v1542_v6 = vmul.f32 1.442695, %v1534_v29  ;;  %v1522_v58 = vadd.f32 %v1514_v40, %v1491_v44  ;;  %v1523_v50 = vadd.f32 %v1515_v3, %v1505_v12 }
 0x235   :  { %v4432_v26 = vpop.eup %4431  ;;  %v1544_v41 = vmul.f32 1.442695, %v1535_v60  ;;  %v1546_v61 = vmul.f32 1.442695, %v1536_v8 }
 0x236   :  { %v4434_v49 = vpop.eup %4433  ;;  %4435 = vpow2.f32 %v1542_v6  ;;  %v1527_v10 = vpack.c.bf16 %v1523_v50, %v1522_v58 }
 0x237   :  { %v1550_v19 = vpack.c.bf16 %v4434_v49, %v4432_v26  ;;  %4437 = vpow2.f32 %v1544_v41 }
 0x238   :  { %4439 = vpow2.f32 %v1546_v61  ;;  %v1531_v38 = vxor.u32 2147516416, %v1527_v10  ;;  %v1601_v12 = vrot.slane %v1527_v10, 4 }
 0x239   :  { %v1554_v4 = vunpack.c.l.bf16 %v1550_v19  ;;  %v1555_v13 = vunpack.c.h.bf16 %v1550_v19 }
 0x23a   :  { %v1537_v25 = vunpack.c.l.bf16 %v1531_v38  ;;  %v1605_v41 = vunpack.c.l.bf16 %v1601_v12 }
 0x23b   :  { %v1560_v48 = vadd.f32 1.0, %v1554_v4  ;;  %v1561_v39 = vadd.f32 1.0, %v1555_v13 }
 0x23c   :  { %v4436_v59 = vpop.eup %4435  ;;  %v1548_v40 = vmul.f32 1.442695, %v1537_v25 }
 0x23d   :  { %v4438_v3 = vpop.eup %4437  ;;  %v1566_v42 = vpack.c.bf16 %v1561_v39, %v1560_v48  ;;  %v1551_v5 = vpack.c.bf16 %v4436_v59, %v4436_v59 }
 0x23e   :  { %v4440_v60 = vpop.eup %4439  ;;  %4441 = vpow2.f32 %v1548_v40 }
 0x23f   :  { %v1570_v29 = vunpack.c.h.bf16 %v1566_v42  ;;  %v1571_v8 = vunpack.c.l.bf16 %v1566_v42  ;;  %v1552_v44 = vpack.c.bf16 %v4440_v60, %v4438_v3  ;;  %4443 = vtanh.f32 %v1604_v43 }
 0x240   :  { %v1556_v58 = vunpack.c.l.bf16 %v1551_v5 }
 0x241   :  { %4445 = vrcp.f32 %v1570_v29  ;;  %v1557_v1 = vunpack.c.l.bf16 %v1552_v44  ;;  %v1558_v6 = vunpack.c.h.bf16 %v1552_v44 }
 0x242   :  { %4447 = vrcp.f32 %v1571_v8  ;;  %v1562_v38 = vadd.f32 1.0, %v1556_v58 }
 0x243   :  { %v1563_v50 = vadd.f32 1.0, %v1557_v1  ;;  %v1564_v26 = vadd.f32 1.0, %v1558_v6  ;;  %4449 = vtanh.f32 %v1605_v41 }
 0x244   :  { %v4442_v61 = vpop.eup %4441  ;;  %v1567_v40 = vpack.c.bf16 %v1562_v38, %v1562_v38 }
 0x245   :  { %v1568_v49 = vpack.c.bf16 %v1564_v26, %v1563_v50  ;;  %v1553_v19 = vpack.c.bf16 %v4442_v61, %v4442_v61  ;;  %v4444_v15 = vpop.eup %4443 }
 0x246   :  { %v1608_v59 = vpack.c.bf16 %v4444_v15, %v4444_v15  ;;  %v1577_v44 = vunpack.c.h.bf16 %v1567_v40  ;;  %v1578_v1 = vunpack.c.l.bf16 %v1567_v40 }
 0x247   :  { %v4446_v4 = vpop.eup %4445  ;;  %v1584_v13 = vunpack.c.h.bf16 %v1568_v49  ;;  %v1585_v25 = vunpack.c.l.bf16 %v1568_v49  ;;  %v1559_v43 = vunpack.c.l.bf16 %v1553_v19 }
 0x248   :  { %v4448_v48 = vpop.eup %4447  ;;  %v1573_v10 = vmul.f32 %v4446_v4, %v5690_v37  ;;  %v1624_v29 = vunpack.c.l.bf16 %v1608_v59 }
 0x249   :  { %v1575_v39 = vmul.f32 %v4448_v48, %v5692_v16  ;;  %4451 = vrcp.f32 %v1584_v13  ;;  %v4450_v42 = vpop.eup %4449  ;;  %v1565_v8 = vadd.f32 1.0, %v1559_v43 }
 0x24a   :  { %4453 = vrcp.f32 %v1585_v25  ;;  %v1609_v41 = vpack.c.bf16 %v4450_v42, %v4450_v42 }
 0x24b   :  { %v1576_v3 = vpack.c.bf16 %v1573_v10, %v1575_v39  ;;  %v1569_v49 = vpack.c.bf16 %v1565_v8, %v1565_v8  ;;  %4455 = vrcp.f32 %v1577_v44 }
 0x24c   :  { %4457 = vrcp.f32 %v1578_v1  ;;  %v1625_v13 = vunpack.c.l.bf16 %v1609_v41 }
 0x24d   :  { %v1614_v60 = vrot.slane %v1576_v3, 4  ;;  %v1622_v5 = vunpack.c.l.bf16 %v1576_v3  ;;  %v1591_v48 = vunpack.c.h.bf16 %v1569_v49  ;;  %v1592_v59 = vunpack.c.l.bf16 %v1569_v49 }
 0x24f   :  { %v4452_v12 = vpop.eup %4451  ;;  %v1618_v6 = vunpack.c.l.bf16 %v1614_v60  ;;  %v1626_v58 = vmul.f32 %v1624_v29, %v1622_v5  ;;  %4459 = vrcp.f32 %v1591_v48 }
 0x250   :  { %v4454_v50 = vpop.eup %4453  ;;  %v1587_v26 = vmul.f32 %v4452_v12, %v5690_v37  ;;  %4461 = vrcp.f32 %v1592_v59  ;;  %v1423_v59 = vpack.c.bf16 %v5712_v21, %v5712_v21 }
 0x251   :  { %v1628_v61 = vpack.c.bf16 %v1626_v58, %v1626_v58  ;;  %v1589_v19 = vmul.f32 %v4454_v50, %v5692_v16  ;;  %v1620_v15 = vmul.f32 %v1618_v6, %v5698_v18  ;;  %v4456_v42 = vpop.eup %4455  ;;  %v1422_v58 = vpack.c.bf16 %v5710_v51, %v5710_v51 }
 0x252   :  { %v4458_v60 = vpop.eup %4457  ;;  %v1580_v44 = vmul.f32 %v4456_v42, %v5690_v37  ;;  %v1659_v42 = vstv %s5780_s22 }
 0x253   :  { %v1630_v38 = vunpack.c.l.bf16 %v1628_v61  ;;  %v1590_v4 = vpack.c.bf16 %v1587_v26, %v1589_v19  ;;  %v1582_v12 = vmul.f32 %v4458_v60, %v5692_v16  ;;  %v1431_v19 = vunpack.c.l.bf16 %v1422_v58 }
 0x255   :  { %v5765_v25 = vadd.f32 %v1630_v38, %v1620_v15  ;;  %v1615_v10 = vrot.slane %v1590_v4, 4  ;;  %v1623_v39 = vunpack.c.l.bf16 %v1590_v4  ;;  %v4460_v6 = vpop.eup %4459  ;;  %v1583_v41 = vpack.c.bf16 %v1580_v44, %v1582_v12 }
 0x256   :  { %v4462_v26 = vpop.eup %4461  ;;  %v1433_v15 = vstv %s5769_s4 }
 0x257   :  { %v1634_v43 = vpack.c.bf16 %v5765_v25, %v5765_v25  ;;  %v1619_v40 = vunpack.c.l.bf16 %v1615_v10  ;;  %v1627_v3 = vmul.f32 %v1625_v13, %v1623_v39  ;;  %v1642_v38 = vunpack.c.l.bf16 %v1583_v41 }
 0x258   :  { %v1594_v13 = vmul.f32 %v4460_v6, %v5690_v37  ;;  %v1596_v51 = vmul.f32 %v4462_v26, %v5692_v16  ;;  %v1434_v10 = vmul.f32 %v1433_v15, %v1431_v19  ;;  %v1048_v39 = vstv %s6406_s1  ;;  %s4221_s1 = sld [smem:[#allocation6 + $0x2]] }
 0x259   :  { %v1636_v5 = vunpack.c.l.bf16 %v1634_v43  ;;  %v1629_v29 = vpack.c.bf16 %v1627_v3, %v1627_v3  ;;  %v1621_v18 = vmul.f32 %v1619_v40, %v5702_v47 }
 0x25a   :  { %v1597_v40 = vpack.c.bf16 %v1594_v13, %v1596_v51  ;;  %v6521_v13 = vld [vmem:[#allocation17_spill] sm:$0xff] }
 0x25b   :  { %4463 = vtanh.f32 %v1636_v5  ;;  %v1631_v8 = vunpack.c.l.bf16 %v1629_v29  ;;  %v1436_v29 = vadd.f32 %v1434_v10, %v1048_v39  ;;  %v6523_v10 = vld [vmem:[#allocation18_spill] sm:$0xff] }
 0x25c   :  { %v1643_v44 = vunpack.c.l.bf16 %v1597_v40 }
 0x25d   :  { %v5774_v1 = vadd.f32 %v1631_v8, %v1621_v18  ;;  %v1432_v18 = vunpack.c.l.bf16 %v1423_v59  ;;  %v6524_v59 = vld [vmem:[#allocation16_spill] sm:$0xff] }
 0x25e   :  { %v1735_v40 = vunpack.c.h.bf16 %v6524_v59 }
 0x25f   :  { %v1635_v50 = vpack.c.bf16 %v5774_v1, %v5774_v1 }
 0x261   :  { %v4464_v61 = vpop.eup %4463  ;;  %v1637_v47 = vunpack.c.l.bf16 %v1635_v50  ;;  %v1435_v50 = vmul.f32 %v1433_v15, %v1432_v18  ;;  %v6518_v15 = vld [vmem:[#allocation26_spill] sm:$0xff] }
 0x262   :  { %v1640_v49 = vpack.c.bf16 %v4464_v61, %v4464_v61 }
 0x263   :  { %4465 = vtanh.f32 %v1637_v47  ;;  %v1437_v21 = vadd.f32 %v1435_v50, %v1048_v39  ;;  %v6527_v50 = vld [vmem:[#allocation12_spill] sm:$0xff] }
 0x264   :  { %v1644_v4 = vunpack.c.l.bf16 %v1640_v49 }
 0x266   :  { %v1646_v48 = vmul.f32 %v1644_v4, %v1642_v38  ;;  %v6519_v38 = vld [vmem:[#allocation27_spill] sm:$0xff]  ;;  %v6520_v4 = vld [vmem:[#allocation9_spill] sm:$0xff] }
 0x267   :  { %v306_v51 = vadd.f32 %v6521_v13, %v6520_v4 }
 0x268   :  { %v1648_v43 = vpack.c.bf16 %v1646_v48, %v1646_v48 }
 0x269   :  { %v4466_v3 = vpop.eup %4465 }
 0x26a   :  { %v1657_v60 = vunpack.c.l.bf16 %v1648_v43  ;;  %v1641_v5 = vpack.c.bf16 %v4466_v3, %v4466_v3  ;;  %v1734_v43 = vunpack.c.l.bf16 %v6524_v59 }
 0x26c   :  { %v1660_v8 = vmul.f32 %v1659_v42, %v1657_v60  ;;  %v1645_v12 = vunpack.c.l.bf16 %v1641_v5 }
 0x26e   :  { %v5791_v6 = vadd.f32 %v1660_v8, %v1436_v29  ;;  %v1647_v58 = vmul.f32 %v1645_v12, %v1643_v44  ;;  %v6525_v44 = vld [vmem:[#allocation11_spill] sm:$0xff]  ;;  %v6526_v12 = vld [vmem:[#allocation20_spill] sm:$0xff] }
 0x270   :  { %v1649_v26 = vpack.c.bf16 %v1647_v58, %v1647_v58  ;;  %v4339_v41 = vpack.c.bf16 %v1647_v58, %v1646_v48  ;;  %v6522_v48 = vld [vmem:[#allocation10_spill] sm:$0xff]  ;;  %v334_v58 = vadd.f32 %v6526_v12, %v6525_v44 }
 0x271   :  { %v320_v39 = vadd.f32 %v6523_v10, %v6522_v48 }
 0x272   :  { %4340 = vst [vmem:[#allocation3] sm:$0xff] %v4339_v41   ;;  %v1658_v61 = vunpack.c.l.bf16 %v1649_v26  ;;  %v6528_v26 = vld [vmem:[#allocation21_spill] sm:$0xff] }
 0x273   :  { %v352_v29 = vpack.c.bf16 %v320_v39, %v306_v51  ;;  %v348_v41 = vadd.f32 %v6528_v26, %v6527_v50 }
 0x274   :  { %v1661_v47 = vmul.f32 %v1659_v42, %v1658_v61  ;;  %v6529_v61 = vld [vmem:[#allocation19_spill] sm:$0xff] }
 0x275   :  { %v1738_v48 = vunpack.c.l.bf16 %v352_v29  ;;  %v353_v12 = vpack.c.bf16 %v348_v41, %v334_v58 }
 0x276   :  { %v5793_v49 = vadd.f32 %v1661_v47, %v1437_v21  ;;  %v1736_v21 = vunpack.c.l.bf16 %v6529_v61  ;;  %v1737_v47 = vunpack.c.h.bf16 %v6529_v61 }
 0x277   :  { %v1740_v4 = vunpack.c.l.bf16 %v353_v12 }
 0x279   :  { %v4321_v19 = vld [vmem:[#allocation3] sm:$0xff] }
 0x27a   :  { %1686 = vmatmul.bf16.vlgmr.msra.gmra.mxu0 %v4321_v19  ;;  %1700 = vmatmul.bf16.vlgmr.msra.gmra.mxu1 %v4321_v19 }
 0x27b   :  { %1714 = vmatmul.bf16.vlgmr.msra.gmra.mxu2 %v4321_v19  ;;  %1728 = vmatmul.bf16.vlgmr.msra.gmra.mxu3 %v4321_v19 }
 0x27c   :  { %2130 = vmatpush.bf16.msra.mxu0 %v5183_v27  ;;  %2144 = vmatpush.bf16.msra.mxu1 %v5186_v30 }
 0x27d   :  { %2158 = vmatpush.bf16.msra.mxu2 %v5195_v34  ;;  %2172 = vmatpush.bf16.msra.mxu3 %v5197_v35 }
 0x280   :  { %2131 = vmatpush.bf16.msra.mxu0 %v5223_v45  ;;  %2145 = vmatpush.bf16.msra.mxu1 %v5227_v46 }
 0x281   :  { %2159 = vmatpush.bf16.msra.mxu2 %v5237_v52  ;;  %2173 = vmatpush.bf16.msra.mxu3 %v5239_v53 }
 0x284   :  { %2132 = vmatpush.bf16.msra.mxu0 %v5263_v2  ;;  %2146 = vmatpush.bf16.msra.mxu1 %v5269_v7 }
 0x285   :  { %2160 = vmatpush.bf16.msra.mxu2 %v5279_v11  ;;  %2174 = vmatpush.bf16.msra.mxu3 %v5281_v14 }
 0x288   :  { %2133 = vmatpush.bf16.msra.mxu0 %v5304_v23  ;;  %2147 = vmatpush.bf16.msra.mxu1 %v5307_v24 }
 0x289   :  { %2161 = vmatpush.bf16.msra.mxu2 %v5320_v31  ;;  %2175 = vmatpush.bf16.msra.mxu3 %v5322_v32 }
 0x28c   :  { %2134 = vmatpush.bf16.msra.mxu0 %v5347_v54  ;;  %2148 = vmatpush.bf16.msra.mxu1 %v5351_v57 }
 0x28d   :  { %2162 = vmatpush.bf16.msra.mxu2 %v5362_v63  ;;  %2176 = vmatpush.bf16.msra.mxu3 %v5364_v0 }
 0x290   :  { %2135 = vmatpush.bf16.msra.mxu0 %v5390_v20  ;;  %2149 = vmatpush.bf16.msra.mxu1 %v5394_v22 }
 0x291   :  { %2163 = vmatpush.bf16.msra.mxu2 %v5404_v33  ;;  %2177 = vmatpush.bf16.msra.mxu3 %v5406_v36 }
 0x294   :  { %2136 = vmatpush.bf16.msra.mxu0 %v5430_v62  ;;  %2150 = vmatpush.bf16.msra.mxu1 %v5436_v9 }
 0x295   :  { %2164 = vmatpush.bf16.msra.mxu2 %v5446_v17  ;;  %2178 = vmatpush.bf16.msra.mxu3 %v5448_v28 }
 0x298   :  { %2137 = vmatpush.bf16.msra.mxu0 %v5471_v55  ;;  %2151 = vmatpush.bf16.msra.mxu1 %v5474_v56 }
 0x299   :  { %2165 = vmatpush.bf16.msra.mxu2 %v6518_v15  ;;  %2179 = vmatpush.bf16.msra.mxu3 %v6519_v38  ;;  %v1741_v38 = vunpack.c.h.bf16 %v353_v12 }
 0x2f7   :  { %v1687_v3 = vpop.f32.mrf.mxu0  ;;  %v1701_v42 = vpop.f32.mrf.mxu1 }
 0x2f8   :  { %v1742_v60 = vadd.f32 %v1734_v43, %v1687_v3  ;;  %v1743_v5 = vadd.f32 %v1735_v40, %v1701_v42  ;;  %v1739_v43 = vunpack.c.h.bf16 %v352_v29 }
 0x2fa   :  { %v1750_v18 = vpack.c.bf16 %v1743_v5, %v1742_v60 }
 0x2fc   :  { %v1754_v8 = vxor.u32 2147516416, %v1750_v18 }
 0x2fe   :  { %v1758_v19 = vunpack.c.l.bf16 %v1754_v8  ;;  %v1759_v13 = vunpack.c.h.bf16 %v1754_v8  ;;  %v1715_v10 = vpop.f32.mrf.mxu2  ;;  %v1729_v59 = vpop.f32.mrf.mxu3 }
 0x2ff   :  { %v1744_v40 = vadd.f32 %v1736_v21, %v1715_v10  ;;  %v1745_v51 = vadd.f32 %v1737_v47, %v1729_v59  ;;  %v1689_v39 = vpop.f32.mrf.mxu0  ;;  %v1703_v3 = vpop.f32.mrf.mxu1 }
 0x300   :  { %v1764_v42 = vmul.f32 1.442695, %v1758_v19  ;;  %v1766_v60 = vmul.f32 1.442695, %v1759_v13  ;;  %v1746_v5 = vadd.f32 %v1738_v48, %v1689_v39  ;;  %v1747_v18 = vadd.f32 %v1739_v43, %v1703_v3 }
 0x301   :  { %v1751_v26 = vpack.c.bf16 %v1745_v51, %v1744_v40 }
 0x302   :  { %4467 = vpow2.f32 %v1764_v42  ;;  %v1752_v50 = vpack.c.bf16 %v1747_v18, %v1746_v5 }
 0x303   :  { %4469 = vpow2.f32 %v1766_v60  ;;  %v1755_v61 = vxor.u32 2147516416, %v1751_v26  ;;  %v1826_v51 = vrot.slane %v1751_v26, 4 }
 0x304   :  { %v1756_v44 = vxor.u32 2147516416, %v1752_v50 }
 0x305   :  { %v1760_v8 = vunpack.c.l.bf16 %v1755_v61  ;;  %v1830_v18 = vunpack.c.l.bf16 %v1826_v51 }
 0x306   :  { %v1761_v15 = vunpack.c.l.bf16 %v1756_v44  ;;  %v1762_v29 = vunpack.c.h.bf16 %v1756_v44  ;;  %v1717_v21 = vpop.f32.mrf.mxu2  ;;  %v1731_v47 = vpop.f32.mrf.mxu3 }
 0x307   :  { %v1768_v10 = vmul.f32 1.442695, %v1760_v8  ;;  %v1748_v59 = vadd.f32 %v1740_v4, %v1717_v21  ;;  %v1749_v19 = vadd.f32 %v1741_v38, %v1731_v47 }
 0x308   :  { %v4468_v13 = vpop.eup %4467  ;;  %v1770_v48 = vmul.f32 1.442695, %v1761_v15  ;;  %v1772_v43 = vmul.f32 1.442695, %v1762_v29 }
 0x309   :  { %v4470_v58 = vpop.eup %4469  ;;  %4471 = vpow2.f32 %v1768_v10  ;;  %v1753_v41 = vpack.c.bf16 %v1749_v19, %v1748_v59 }
 0x30a   :  { %v1776_v40 = vpack.c.bf16 %v4470_v58, %v4468_v13  ;;  %4473 = vpow2.f32 %v1770_v48 }
 0x30b   :  { %4475 = vpow2.f32 %v1772_v43  ;;  %v1757_v50 = vxor.u32 2147516416, %v1753_v41  ;;  %v1827_v47 = vrot.slane %v1753_v41, 4 }
 0x30c   :  { %v1780_v39 = vunpack.c.l.bf16 %v1776_v40  ;;  %v1781_v3 = vunpack.c.h.bf16 %v1776_v40 }
 0x30d   :  { %v1763_v42 = vunpack.c.l.bf16 %v1757_v50  ;;  %v1831_v48 = vunpack.c.l.bf16 %v1827_v47 }
 0x30e   :  { %v1786_v44 = vadd.f32 1.0, %v1780_v39  ;;  %v1787_v60 = vadd.f32 1.0, %v1781_v3 }
 0x30f   :  { %v4472_v5 = vpop.eup %4471  ;;  %v1774_v4 = vmul.f32 1.442695, %v1763_v42 }
 0x310   :  { %v4474_v38 = vpop.eup %4473  ;;  %v1792_v12 = vpack.c.bf16 %v1787_v60, %v1786_v44  ;;  %v1777_v61 = vpack.c.bf16 %v4472_v5, %v4472_v5 }
 0x311   :  { %v4476_v15 = vpop.eup %4475  ;;  %4477 = vpow2.f32 %v1774_v4 }
 0x312   :  { %v1796_v8 = vunpack.c.h.bf16 %v1792_v12  ;;  %v1797_v29 = vunpack.c.l.bf16 %v1792_v12  ;;  %v1778_v21 = vpack.c.bf16 %v4476_v15, %v4474_v38  ;;  %4479 = vtanh.f32 %v1830_v18 }
 0x313   :  { %v1782_v59 = vunpack.c.l.bf16 %v1777_v61 }
 0x314   :  { %4481 = vrcp.f32 %v1796_v8  ;;  %v1783_v26 = vunpack.c.l.bf16 %v1778_v21  ;;  %v1784_v10 = vunpack.c.h.bf16 %v1778_v21 }
 0x315   :  { %4483 = vrcp.f32 %v1797_v29  ;;  %v1788_v50 = vadd.f32 1.0, %v1782_v59 }
 0x316   :  { %v1789_v19 = vadd.f32 1.0, %v1783_v26  ;;  %v1790_v13 = vadd.f32 1.0, %v1784_v10  ;;  %4485 = vtanh.f32 %v1831_v48 }
 0x317   :  { %v4478_v43 = vpop.eup %4477  ;;  %v1793_v4 = vpack.c.bf16 %v1788_v50, %v1788_v50 }
 0x318   :  { %v1794_v58 = vpack.c.bf16 %v1790_v13, %v1789_v19  ;;  %v1779_v40 = vpack.c.bf16 %v4478_v43, %v4478_v43  ;;  %v4480_v51 = vpop.eup %4479 }
 0x319   :  { %v1834_v5 = vpack.c.bf16 %v4480_v51, %v4480_v51  ;;  %v1803_v21 = vunpack.c.h.bf16 %v1793_v4  ;;  %v1804_v26 = vunpack.c.l.bf16 %v1793_v4 }
 0x31a   :  { %v4482_v39 = vpop.eup %4481  ;;  %v1810_v3 = vunpack.c.h.bf16 %v1794_v58  ;;  %v1811_v42 = vunpack.c.l.bf16 %v1794_v58  ;;  %v1785_v18 = vunpack.c.l.bf16 %v1779_v40 }
 0x31b   :  { %v4484_v44 = vpop.eup %4483  ;;  %v1799_v41 = vmul.f32 %v4482_v39, %v5690_v37  ;;  %v1850_v8 = vunpack.c.l.bf16 %v1834_v5 }
 0x31c   :  { %v1801_v60 = vmul.f32 %v4484_v44, %v5692_v16  ;;  %4487 = vrcp.f32 %v1810_v3  ;;  %v4486_v12 = vpop.eup %4485  ;;  %v1791_v29 = vadd.f32 1.0, %v1785_v18 }
 0x31d   :  { %4489 = vrcp.f32 %v1811_v42  ;;  %v1835_v48 = vpack.c.bf16 %v4486_v12, %v4486_v12 }
 0x31e   :  { %v1802_v38 = vpack.c.bf16 %v1799_v41, %v1801_v60  ;;  %v1795_v58 = vpack.c.bf16 %v1791_v29, %v1791_v29  ;;  %4491 = vrcp.f32 %v1803_v21 }
 0x31f   :  { %4493 = vrcp.f32 %v1804_v26  ;;  %v1851_v3 = vunpack.c.l.bf16 %v1835_v48 }
 0x320   :  { %v1840_v15 = vrot.slane %v1802_v38, 4  ;;  %v1848_v61 = vunpack.c.l.bf16 %v1802_v38  ;;  %v1817_v44 = vunpack.c.h.bf16 %v1795_v58  ;;  %v1818_v5 = vunpack.c.l.bf16 %v1795_v58 }
 0x322   :  { %v4488_v47 = vpop.eup %4487  ;;  %v1844_v10 = vunpack.c.l.bf16 %v1840_v15  ;;  %v1852_v59 = vmul.f32 %v1850_v8, %v1848_v61  ;;  %4495 = vrcp.f32 %v1817_v44 }
 0x323   :  { %v4490_v19 = vpop.eup %4489  ;;  %v1813_v13 = vmul.f32 %v4488_v47, %v5690_v37  ;;  %4497 = vrcp.f32 %v1818_v5 }
 0x324   :  { %v1854_v43 = vpack.c.bf16 %v1852_v59, %v1852_v59  ;;  %v1815_v40 = vmul.f32 %v4490_v19, %v5692_v16  ;;  %v1846_v51 = vmul.f32 %v1844_v10, %v5765_v25  ;;  %v4492_v12 = vpop.eup %4491 }
 0x325   :  { %v4494_v15 = vpop.eup %4493  ;;  %v1806_v21 = vmul.f32 %v4492_v12, %v5690_v37 }
 0x326   :  { %v1856_v50 = vunpack.c.l.bf16 %v1854_v43  ;;  %v1816_v39 = vpack.c.bf16 %v1813_v13, %v1815_v40  ;;  %v1808_v47 = vmul.f32 %v4494_v15, %v5692_v16 }
 0x328   :  { %v5844_v42 = vadd.f32 %v1856_v50, %v1846_v51  ;;  %v1841_v41 = vrot.slane %v1816_v39, 4  ;;  %v1849_v60 = vunpack.c.l.bf16 %v1816_v39  ;;  %v4496_v10 = vpop.eup %4495  ;;  %v1809_v13 = vpack.c.bf16 %v1806_v21, %v1808_v47 }
 0x329   :  { %v4498_v19 = vpop.eup %4497  ;;  %v1820_v51 = vmul.f32 %v4496_v10, %v5690_v37 }
 0x32a   :  { %v1860_v18 = vpack.c.bf16 %v5844_v42, %v5844_v42  ;;  %v1845_v4 = vunpack.c.l.bf16 %v1841_v41  ;;  %v1853_v38 = vmul.f32 %v1851_v3, %v1849_v60  ;;  %v1868_v40 = vunpack.c.l.bf16 %v1809_v13 }
 0x32b   :  { %v1822_v50 = vmul.f32 %v4498_v19, %v5692_v16  ;;  %v1885_v60 = vstv %s4221_s1  ;;  %v6533_v19 = vld [vmem:[#allocation23_spill] sm:$0xff] }
 0x32c   :  { %v1862_v61 = vunpack.c.l.bf16 %v1860_v18  ;;  %v1855_v8 = vpack.c.bf16 %v1853_v38, %v1853_v38  ;;  %v1847_v25 = vmul.f32 %v1845_v4, %v5774_v1 }
 0x32d   :  { %v1823_v44 = vpack.c.bf16 %v1820_v51, %v1822_v50 }
 0x32e   :  { %4499 = vtanh.f32 %v1862_v61  ;;  %v1857_v29 = vunpack.c.l.bf16 %v1855_v8 }
 0x32f   :  { %v1869_v38 = vunpack.c.l.bf16 %v1823_v44 }
 0x330   :  { %v5851_v26 = vadd.f32 %v1857_v29, %v1847_v25 }
 0x332   :  { %v1861_v59 = vpack.c.bf16 %v5851_v26, %v5851_v26 }
 0x334   :  { %v4500_v48 = vpop.eup %4499  ;;  %v1863_v43 = vunpack.c.l.bf16 %v1861_v59  ;;  %v6532_v59 = vld [vmem:[#allocation9_spill] sm:$0xff] }
 0x335   :  { %v1866_v58 = vpack.c.bf16 %v4500_v48, %v4500_v48  ;;  %v382_v13 = vadd.f32 %v6533_v19, %v6532_v59  ;;  %v6534_v48 = vld [vmem:[#allocation10_spill] sm:$0xff] }
 0x336   :  { %4501 = vtanh.f32 %v1863_v43  ;;  %v6535_v43 = vld [vmem:[#allocation24_spill] sm:$0xff] }
 0x337   :  { %v1870_v1 = vunpack.c.l.bf16 %v1866_v58  ;;  %v396_v58 = vadd.f32 %v6535_v43, %v6534_v48 }
 0x339   :  { %v1872_v39 = vmul.f32 %v1870_v1, %v1868_v40  ;;  %v6536_v40 = vld [vmem:[#allocation22_spill] sm:$0xff] }
 0x33a   :  { %v1960_v1 = vunpack.c.l.bf16 %v6536_v40  ;;  %v1961_v51 = vunpack.c.h.bf16 %v6536_v40 }
 0x33b   :  { %v1874_v3 = vpack.c.bf16 %v1872_v39, %v1872_v39 }
 0x33c   :  { %v4502_v41 = vpop.eup %4501 }
 0x33d   :  { %v1883_v5 = vunpack.c.l.bf16 %v1874_v3  ;;  %v1867_v18 = vpack.c.bf16 %v4502_v41, %v4502_v41  ;;  %v428_v41 = vpack.c.bf16 %v396_v58, %v382_v13 }
 0x33f   :  { %v1886_v4 = vmul.f32 %v1885_v60, %v1883_v5  ;;  %v1871_v12 = vunpack.c.l.bf16 %v1867_v18  ;;  %v6537_v18 = vld [vmem:[#allocation11_spill] sm:$0xff]  ;;  %v1964_v48 = vunpack.c.l.bf16 %v428_v41 }
 0x341   :  { %v5858_v15 = vadd.f32 %v1886_v4, %v5791_v6  ;;  %v1873_v61 = vmul.f32 %v1871_v12, %v1869_v38  ;;  %v6530_v6 = vld [vmem:[#allocation26_spill] sm:$0xff]  ;;  %v6538_v4 = vld [vmem:[#allocation28_spill] sm:$0xff] }
 0x342   :  { %v410_v38 = vadd.f32 %v6538_v4, %v6537_v18  ;;  %v6539_v12 = vld [vmem:[#allocation12_spill] sm:$0xff] }
 0x343   :  { %v1875_v8 = vpack.c.bf16 %v1873_v61, %v1873_v61  ;;  %v4344_v25 = vpack.c.bf16 %v1873_v61, %v1872_v39  ;;  %v6540_v61 = vld [vmem:[#allocation29_spill] sm:$0xff] }
 0x345   :  { %4345 = vst [vmem:[#allocation3] sm:$0xff] %v4344_v25   ;;  %v1884_v29 = vunpack.c.l.bf16 %v1875_v8  ;;  %v424_v8 = vadd.f32 %v6540_v61, %v6539_v12  ;;  %v6541_v25 = vld [vmem:[#allocation25_spill] sm:$0xff] }
 0x347   :  { %v1887_v21 = vmul.f32 %v1885_v60, %v1884_v29  ;;  %v1962_v29 = vunpack.c.l.bf16 %v6541_v25  ;;  %v429_v4 = vpack.c.bf16 %v424_v8, %v410_v38 }
 0x349   :  { %v5861_v47 = vadd.f32 %v1887_v21, %v5793_v49  ;;  %v6531_v49 = vld [vmem:[#allocation27_spill] sm:$0xff]  ;;  %v1963_v21 = vunpack.c.h.bf16 %v6541_v25  ;;  %v1966_v59 = vunpack.c.l.bf16 %v429_v4 }
 0x34c   :  { %v4322_v10 = vld [vmem:[#allocation3] sm:$0xff] }
 0x34d   :  { %1912 = vmatmul.bf16.vlgmr.msrb.gmra.mxu0 %v4322_v10  ;;  %1926 = vmatmul.bf16.vlgmr.msrb.gmra.mxu1 %v4322_v10 }
 0x34e   :  { %1940 = vmatmul.bf16.vlgmr.msrb.gmra.mxu2 %v4322_v10  ;;  %1954 = vmatmul.bf16.vlgmr.msrb.gmra.mxu3 %v4322_v10 }
 0x34f   :  { %2356 = vmatpush.bf16.msrb.mxu0 %v5183_v27  ;;  %2370 = vmatpush.bf16.msrb.mxu1 %v5186_v30 }
 0x350   :  { %2384 = vmatpush.bf16.msrb.mxu2 %v5195_v34  ;;  %2398 = vmatpush.bf16.msrb.mxu3 %v5197_v35 }
 0x353   :  { %2357 = vmatpush.bf16.msrb.mxu0 %v5223_v45  ;;  %2371 = vmatpush.bf16.msrb.mxu1 %v5227_v46 }
 0x354   :  { %2385 = vmatpush.bf16.msrb.mxu2 %v5237_v52  ;;  %2399 = vmatpush.bf16.msrb.mxu3 %v5239_v53 }
 0x357   :  { %2358 = vmatpush.bf16.msrb.mxu0 %v5263_v2  ;;  %2372 = vmatpush.bf16.msrb.mxu1 %v5269_v7 }
 0x358   :  { %2386 = vmatpush.bf16.msrb.mxu2 %v5279_v11  ;;  %2400 = vmatpush.bf16.msrb.mxu3 %v5281_v14 }
 0x35b   :  { %2359 = vmatpush.bf16.msrb.mxu0 %v5304_v23  ;;  %2373 = vmatpush.bf16.msrb.mxu1 %v5307_v24 }
 0x35c   :  { %2387 = vmatpush.bf16.msrb.mxu2 %v5320_v31  ;;  %2401 = vmatpush.bf16.msrb.mxu3 %v5322_v32 }
 0x35f   :  { %2360 = vmatpush.bf16.msrb.mxu0 %v5347_v54  ;;  %2374 = vmatpush.bf16.msrb.mxu1 %v5351_v57 }
 0x360   :  { %2388 = vmatpush.bf16.msrb.mxu2 %v5362_v63  ;;  %2402 = vmatpush.bf16.msrb.mxu3 %v5364_v0 }
 0x363   :  { %2361 = vmatpush.bf16.msrb.mxu0 %v5390_v20  ;;  %2375 = vmatpush.bf16.msrb.mxu1 %v5394_v22 }
 0x364   :  { %2389 = vmatpush.bf16.msrb.mxu2 %v5404_v33  ;;  %2403 = vmatpush.bf16.msrb.mxu3 %v5406_v36 }
 0x367   :  { %2362 = vmatpush.bf16.msrb.mxu0 %v5430_v62  ;;  %2376 = vmatpush.bf16.msrb.mxu1 %v5436_v9 }
 0x368   :  { %2390 = vmatpush.bf16.msrb.mxu2 %v5446_v17  ;;  %2404 = vmatpush.bf16.msrb.mxu3 %v5448_v28 }
 0x36b   :  { %2363 = vmatpush.bf16.msrb.mxu0 %v5471_v55  ;;  %2377 = vmatpush.bf16.msrb.mxu1 %v5474_v56 }
 0x36c   :  { %2391 = vmatpush.bf16.msrb.mxu2 %v6530_v6  ;;  %2405 = vmatpush.bf16.msrb.mxu3 %v6531_v49  ;;  %v1967_v49 = vunpack.c.h.bf16 %v429_v4 }
 0x3ca   :  { %v1913_v50 = vpop.f32.mrf.mxu0  ;;  %v1927_v39 = vpop.f32.mrf.mxu1 }
 0x3cb   :  { %v1968_v3 = vadd.f32 %v1960_v1, %v1913_v50  ;;  %v1969_v44 = vadd.f32 %v1961_v51, %v1927_v39  ;;  %v1965_v1 = vunpack.c.h.bf16 %v428_v41 }
 0x3cd   :  { %v1976_v60 = vpack.c.bf16 %v1969_v44, %v1968_v3 }
 0x3cf   :  { %v1980_v5 = vxor.u32 2147516416, %v1976_v60 }
 0x3d1   :  { %v1984_v10 = vunpack.c.l.bf16 %v1980_v5  ;;  %v1985_v19 = vunpack.c.h.bf16 %v1980_v5  ;;  %v1941_v43 = vpop.f32.mrf.mxu2  ;;  %v1955_v40 = vpop.f32.mrf.mxu3 }
 0x3d2   :  { %v1970_v51 = vadd.f32 %v1962_v29, %v1941_v43  ;;  %v1971_v13 = vadd.f32 %v1963_v21, %v1955_v40  ;;  %v1915_v58 = vpop.f32.mrf.mxu0  ;;  %v1929_v50 = vpop.f32.mrf.mxu1 }
 0x3d3   :  { %v1990_v39 = vmul.f32 1.442695, %v1984_v10  ;;  %v1992_v3 = vmul.f32 1.442695, %v1985_v19  ;;  %v1972_v44 = vadd.f32 %v1964_v48, %v1915_v58  ;;  %v1973_v60 = vadd.f32 %v1965_v1, %v1929_v50 }
 0x3d4   :  { %v1977_v61 = vpack.c.bf16 %v1971_v13, %v1970_v51 }
 0x3d5   :  { %4503 = vpow2.f32 %v1990_v39  ;;  %v1978_v12 = vpack.c.bf16 %v1973_v60, %v1972_v44 }
 0x3d6   :  { %4505 = vpow2.f32 %v1992_v3  ;;  %v1981_v25 = vxor.u32 2147516416, %v1977_v61  ;;  %v2052_v13 = vrot.slane %v1977_v61, 4 }
 0x3d7   :  { %v1982_v18 = vxor.u32 2147516416, %v1978_v12 }
 0x3d8   :  { %v1986_v5 = vunpack.c.l.bf16 %v1981_v25  ;;  %v2056_v60 = vunpack.c.l.bf16 %v2052_v13 }
 0x3d9   :  { %v1987_v6 = vunpack.c.l.bf16 %v1982_v18  ;;  %v1988_v41 = vunpack.c.h.bf16 %v1982_v18  ;;  %v1943_v29 = vpop.f32.mrf.mxu2  ;;  %v1957_v21 = vpop.f32.mrf.mxu3 }
 0x3da   :  { %v1994_v43 = vmul.f32 1.442695, %v1986_v5  ;;  %v1974_v40 = vadd.f32 %v1966_v59, %v1943_v29  ;;  %v1975_v10 = vadd.f32 %v1967_v49, %v1957_v21 }
 0x3db   :  { %v4504_v19 = vpop.eup %4503  ;;  %v1996_v48 = vmul.f32 1.442695, %v1987_v6  ;;  %v1998_v1 = vmul.f32 1.442695, %v1988_v41 }
 0x3dc   :  { %v4506_v38 = vpop.eup %4505  ;;  %4507 = vpow2.f32 %v1994_v43  ;;  %v1979_v8 = vpack.c.bf16 %v1975_v10, %v1974_v40 }
 0x3dd   :  { %v2002_v51 = vpack.c.bf16 %v4506_v38, %v4504_v19  ;;  %4509 = vpow2.f32 %v1996_v48 }
 0x3de   :  { %4511 = vpow2.f32 %v1998_v1  ;;  %v1983_v12 = vxor.u32 2147516416, %v1979_v8  ;;  %v2053_v21 = vrot.slane %v1979_v8, 4 }
 0x3df   :  { %v2006_v58 = vunpack.c.l.bf16 %v2002_v51  ;;  %v2007_v50 = vunpack.c.h.bf16 %v2002_v51 }
 0x3e0   :  { %v1989_v39 = vunpack.c.l.bf16 %v1983_v12  ;;  %v2057_v48 = vunpack.c.l.bf16 %v2053_v21 }
 0x3e1   :  { %v2012_v18 = vadd.f32 1.0, %v2006_v58  ;;  %v2013_v3 = vadd.f32 1.0, %v2007_v50 }
 0x3e2   :  { %v4508_v44 = vpop.eup %4507  ;;  %v2000_v59 = vmul.f32 1.442695, %v1989_v39 }
 0x3e3   :  { %v4510_v49 = vpop.eup %4509  ;;  %v2018_v4 = vpack.c.bf16 %v2013_v3, %v2012_v18  ;;  %v2003_v25 = vpack.c.bf16 %v4508_v44, %v4508_v44 }
 0x3e4   :  { %v4512_v6 = vpop.eup %4511  ;;  %4513 = vpow2.f32 %v2000_v59 }
 0x3e5   :  { %v2022_v5 = vunpack.c.h.bf16 %v2018_v4  ;;  %v2023_v41 = vunpack.c.l.bf16 %v2018_v4  ;;  %v2004_v29 = vpack.c.bf16 %v4512_v6, %v4510_v49  ;;  %4515 = vtanh.f32 %v2056_v60 }
 0x3e6   :  { %v2008_v40 = vunpack.c.l.bf16 %v2003_v25 }
 0x3e7   :  { %4517 = vrcp.f32 %v2022_v5  ;;  %v2009_v61 = vunpack.c.l.bf16 %v2004_v29  ;;  %v2010_v43 = vunpack.c.h.bf16 %v2004_v29 }
 0x3e8   :  { %4519 = vrcp.f32 %v2023_v41  ;;  %v2014_v12 = vadd.f32 1.0, %v2008_v40 }
 0x3e9   :  { %v2015_v10 = vadd.f32 1.0, %v2009_v61  ;;  %v2016_v19 = vadd.f32 1.0, %v2010_v43  ;;  %4521 = vtanh.f32 %v2057_v48 }
 0x3ea   :  { %v4514_v1 = vpop.eup %4513  ;;  %v2019_v59 = vpack.c.bf16 %v2014_v12, %v2014_v12 }
 0x3eb   :  { %v2020_v38 = vpack.c.bf16 %v2016_v19, %v2015_v10  ;;  %v2005_v51 = vpack.c.bf16 %v4514_v1, %v4514_v1  ;;  %v4516_v13 = vpop.eup %4515 }
 0x3ec   :  { %v2060_v44 = vpack.c.bf16 %v4516_v13, %v4516_v13  ;;  %v2029_v29 = vunpack.c.h.bf16 %v2019_v59  ;;  %v2030_v61 = vunpack.c.l.bf16 %v2019_v59 }
 0x3ed   :  { %v4518_v58 = vpop.eup %4517  ;;  %v2036_v50 = vunpack.c.h.bf16 %v2020_v38  ;;  %v2037_v39 = vunpack.c.l.bf16 %v2020_v38  ;;  %v2011_v60 = vunpack.c.l.bf16 %v2005_v51 }
 0x3ee   :  { %v4520_v18 = vpop.eup %4519  ;;  %v2025_v8 = vmul.f32 %v4518_v58, %v5690_v37  ;;  %v2076_v5 = vunpack.c.l.bf16 %v2060_v44 }
 0x3ef   :  { %v2027_v3 = vmul.f32 %v4520_v18, %v5692_v16  ;;  %4523 = vrcp.f32 %v2036_v50  ;;  %v4522_v4 = vpop.eup %4521  ;;  %v2017_v41 = vadd.f32 1.0, %v2011_v60 }
 0x3f0   :  { %4525 = vrcp.f32 %v2037_v39  ;;  %v2061_v48 = vpack.c.bf16 %v4522_v4, %v4522_v4 }
 0x3f1   :  { %v2028_v49 = vpack.c.bf16 %v2025_v8, %v2027_v3  ;;  %v2021_v38 = vpack.c.bf16 %v2017_v41, %v2017_v41  ;;  %4527 = vrcp.f32 %v2029_v29 }
 0x3f2   :  { %4529 = vrcp.f32 %v2030_v61  ;;  %v2077_v50 = vunpack.c.l.bf16 %v2061_v48 }
 0x3f3   :  { %v2066_v6 = vrot.slane %v2028_v49, 4  ;;  %v2074_v25 = vunpack.c.l.bf16 %v2028_v49  ;;  %v2043_v18 = vunpack.c.h.bf16 %v2021_v38  ;;  %v2044_v44 = vunpack.c.l.bf16 %v2021_v38 }
 0x3f5   :  { %v4524_v21 = vpop.eup %4523  ;;  %v2070_v43 = vunpack.c.l.bf16 %v2066_v6  ;;  %v2078_v40 = vmul.f32 %v2076_v5, %v2074_v25  ;;  %4531 = vrcp.f32 %v2043_v18 }
 0x3f6   :  { %v4526_v10 = vpop.eup %4525  ;;  %v2039_v19 = vmul.f32 %v4524_v21, %v5690_v37  ;;  %4533 = vrcp.f32 %v2044_v44 }
 0x3f7   :  { %v2080_v1 = vpack.c.bf16 %v2078_v40, %v2078_v40  ;;  %v2041_v51 = vmul.f32 %v4526_v10, %v5692_v16  ;;  %v2072_v13 = vmul.f32 %v2070_v43, %v5844_v42  ;;  %v4528_v4 = vpop.eup %4527 }
 0x3f8   :  { %v4530_v6 = vpop.eup %4529  ;;  %v2032_v29 = vmul.f32 %v4528_v4, %v5690_v37 }
 0x3f9   :  { %v2082_v12 = vunpack.c.l.bf16 %v2080_v1  ;;  %v2042_v58 = vpack.c.bf16 %v2039_v19, %v2041_v51  ;;  %v2034_v21 = vmul.f32 %v4530_v6, %v5692_v16 }
 0x3fb   :  { %v5912_v39 = vadd.f32 %v2082_v12, %v2072_v13  ;;  %v2067_v8 = vrot.slane %v2042_v58, 4  ;;  %v2075_v3 = vunpack.c.l.bf16 %v2042_v58  ;;  %v4532_v43 = vpop.eup %4531  ;;  %v2035_v19 = vpack.c.bf16 %v2032_v29, %v2034_v21 }
 0x3fc   :  { %v4534_v10 = vpop.eup %4533  ;;  %v2046_v13 = vmul.f32 %v4532_v43, %v5690_v37 }
 0x3fd   :  { %v2086_v60 = vpack.c.bf16 %v5912_v39, %v5912_v39  ;;  %v2071_v59 = vunpack.c.l.bf16 %v2067_v8  ;;  %v2079_v49 = vmul.f32 %v2077_v50, %v2075_v3  ;;  %v2094_v51 = vunpack.c.l.bf16 %v2035_v19 }
 0x3fe   :  { %v2048_v12 = vmul.f32 %v4534_v10, %v5692_v16  ;;  %v2111_v3 = vstv %s4226_s25  ;;  %v6545_v10 = vld [vmem:[#allocation31_spill] sm:$0xff] }
 0x3ff   :  { %v2088_v25 = vunpack.c.l.bf16 %v2086_v60  ;;  %v2081_v5 = vpack.c.bf16 %v2079_v49, %v2079_v49  ;;  %v2073_v42 = vmul.f32 %v2071_v59, %v5851_v26 }
 0x400   :  { %v2049_v18 = vpack.c.bf16 %v2046_v13, %v2048_v12 }
 0x401   :  { %4535 = vtanh.f32 %v2088_v25  ;;  %v2083_v41 = vunpack.c.l.bf16 %v2081_v5 }
 0x402   :  { %v2095_v49 = vunpack.c.l.bf16 %v2049_v18 }
 0x403   :  { %v5919_v61 = vadd.f32 %v2083_v41, %v2073_v42 }
 0x405   :  { %v2087_v40 = vpack.c.bf16 %v5919_v61, %v5919_v61 }
 0x407   :  { %v4536_v48 = vpop.eup %4535  ;;  %v2089_v1 = vunpack.c.l.bf16 %v2087_v40  ;;  %v6544_v40 = vld [vmem:[#allocation9_spill] sm:$0xff] }
 0x408   :  { %v2092_v38 = vpack.c.bf16 %v4536_v48, %v4536_v48  ;;  %v458_v19 = vadd.f32 %v6545_v10, %v6544_v40  ;;  %v6546_v48 = vld [vmem:[#allocation10_spill] sm:$0xff] }
 0x409   :  { %4537 = vtanh.f32 %v2089_v1  ;;  %v6547_v1 = vld [vmem:[#allocation32_spill] sm:$0xff] }
 0x40a   :  { %v2096_v26 = vunpack.c.l.bf16 %v2092_v38  ;;  %v472_v38 = vadd.f32 %v6547_v1, %v6546_v48 }
 0x40c   :  { %v2098_v58 = vmul.f32 %v2096_v26, %v2094_v51  ;;  %v6548_v51 = vld [vmem:[#allocation30_spill] sm:$0xff] }
 0x40d   :  { %v2186_v26 = vunpack.c.l.bf16 %v6548_v51  ;;  %v2187_v13 = vunpack.c.h.bf16 %v6548_v51 }
 0x40e   :  { %v2100_v50 = vpack.c.bf16 %v2098_v58, %v2098_v58 }
 0x40f   :  { %v4538_v8 = vpop.eup %4537 }
 0x410   :  { %v2109_v44 = vunpack.c.l.bf16 %v2100_v50  ;;  %v2093_v60 = vpack.c.bf16 %v4538_v8, %v4538_v8  ;;  %v504_v8 = vpack.c.bf16 %v472_v38, %v458_v19 }
 0x412   :  { %v2112_v59 = vmul.f32 %v2111_v3, %v2109_v44  ;;  %v2097_v4 = vunpack.c.l.bf16 %v2093_v60  ;;  %v6549_v60 = vld [vmem:[#allocation11_spill] sm:$0xff]  ;;  %v2190_v48 = vunpack.c.l.bf16 %v504_v8 }
 0x414   :  { %v5926_v6 = vadd.f32 %v2112_v59, %v5858_v15  ;;  %v2099_v25 = vmul.f32 %v2097_v4, %v2095_v49  ;;  %v6542_v15 = vld [vmem:[#allocation26_spill] sm:$0xff]  ;;  %v6551_v4 = vld [vmem:[#allocation12_spill] sm:$0xff] }
 0x415   :  { %v6550_v59 = vld [vmem:[#allocation34_spill] sm:$0xff] }
 0x416   :  { %v2101_v5 = vpack.c.bf16 %v2099_v25, %v2099_v25  ;;  %v4349_v42 = vpack.c.bf16 %v2099_v25, %v2098_v58  ;;  %v486_v49 = vadd.f32 %v6550_v59, %v6549_v60  ;;  %v6552_v25 = vld [vmem:[#allocation35_spill] sm:$0xff] }
 0x418   :  { %v2110_v41 = vunpack.c.l.bf16 %v2101_v5  ;;  %4350 = vst [vmem:[#allocation3] sm:$0xff] %v4349_v42   ;;  %v500_v5 = vadd.f32 %v6552_v25, %v6551_v4  ;;  %v6553_v42 = vld [vmem:[#allocation33_spill] sm:$0xff] }
 0x41a   :  { %v2113_v29 = vmul.f32 %v2111_v3, %v2110_v41  ;;  %v2188_v41 = vunpack.c.l.bf16 %v6553_v42  ;;  %v505_v59 = vpack.c.bf16 %v500_v5, %v486_v49 }
 0x41c   :  { %v5929_v21 = vadd.f32 %v2113_v29, %v5861_v47  ;;  %v6543_v47 = vld [vmem:[#allocation27_spill] sm:$0xff]  ;;  %v2189_v29 = vunpack.c.h.bf16 %v6553_v42  ;;  %v2192_v40 = vunpack.c.l.bf16 %v505_v59 }
 0x41f   :  { %v4323_v43 = vld [vmem:[#allocation3] sm:$0xff] }
 0x420   :  { %2138 = vmatmul.bf16.vlgmr.msra.gmra.mxu0 %v4323_v43  ;;  %2152 = vmatmul.bf16.vlgmr.msra.gmra.mxu1 %v4323_v43 }
 0x421   :  { %2166 = vmatmul.bf16.vlgmr.msra.gmra.mxu2 %v4323_v43  ;;  %2180 = vmatmul.bf16.vlgmr.msra.gmra.mxu3 %v4323_v43 }
 0x422   :  { %2582 = vmatpush.bf16.msra.mxu0 %v5183_v27  ;;  %2596 = vmatpush.bf16.msra.mxu1 %v5186_v30 }
 0x423   :  { %2610 = vmatpush.bf16.msra.mxu2 %v5195_v34  ;;  %2624 = vmatpush.bf16.msra.mxu3 %v5197_v35 }
 0x426   :  { %2583 = vmatpush.bf16.msra.mxu0 %v5223_v45  ;;  %2597 = vmatpush.bf16.msra.mxu1 %v5227_v46 }
 0x427   :  { %2611 = vmatpush.bf16.msra.mxu2 %v5237_v52  ;;  %2625 = vmatpush.bf16.msra.mxu3 %v5239_v53 }
 0x42a   :  { %2584 = vmatpush.bf16.msra.mxu0 %v5263_v2  ;;  %2598 = vmatpush.bf16.msra.mxu1 %v5269_v7 }
 0x42b   :  { %2612 = vmatpush.bf16.msra.mxu2 %v5279_v11  ;;  %2626 = vmatpush.bf16.msra.mxu3 %v5281_v14 }
 0x42e   :  { %2585 = vmatpush.bf16.msra.mxu0 %v5304_v23  ;;  %2599 = vmatpush.bf16.msra.mxu1 %v5307_v24 }
 0x42f   :  { %2613 = vmatpush.bf16.msra.mxu2 %v5320_v31  ;;  %2627 = vmatpush.bf16.msra.mxu3 %v5322_v32 }
 0x432   :  { %2586 = vmatpush.bf16.msra.mxu0 %v5347_v54  ;;  %2600 = vmatpush.bf16.msra.mxu1 %v5351_v57 }
 0x433   :  { %2614 = vmatpush.bf16.msra.mxu2 %v5362_v63  ;;  %2628 = vmatpush.bf16.msra.mxu3 %v5364_v0 }
 0x436   :  { %2587 = vmatpush.bf16.msra.mxu0 %v5390_v20  ;;  %2601 = vmatpush.bf16.msra.mxu1 %v5394_v22 }
 0x437   :  { %2615 = vmatpush.bf16.msra.mxu2 %v5404_v33  ;;  %2629 = vmatpush.bf16.msra.mxu3 %v5406_v36 }
 0x43a   :  { %2588 = vmatpush.bf16.msra.mxu0 %v5430_v62  ;;  %2602 = vmatpush.bf16.msra.mxu1 %v5436_v9 }
 0x43b   :  { %2616 = vmatpush.bf16.msra.mxu2 %v5446_v17  ;;  %2630 = vmatpush.bf16.msra.mxu3 %v5448_v28 }
 0x43e   :  { %2589 = vmatpush.bf16.msra.mxu0 %v5471_v55  ;;  %2603 = vmatpush.bf16.msra.mxu1 %v5474_v56 }
 0x43f   :  { %2617 = vmatpush.bf16.msra.mxu2 %v6542_v15  ;;  %2631 = vmatpush.bf16.msra.mxu3 %v6543_v47  ;;  %v2193_v47 = vunpack.c.h.bf16 %v505_v59 }
 0x49d   :  { %v2139_v12 = vpop.f32.mrf.mxu0  ;;  %v2153_v58 = vpop.f32.mrf.mxu1 }
 0x49e   :  { %v2194_v50 = vadd.f32 %v2186_v26, %v2139_v12  ;;  %v2195_v18 = vadd.f32 %v2187_v13, %v2153_v58  ;;  %v2191_v26 = vunpack.c.h.bf16 %v504_v8 }
 0x4a0   :  { %v2202_v3 = vpack.c.bf16 %v2195_v18, %v2194_v50 }
 0x4a2   :  { %v2206_v44 = vxor.u32 2147516416, %v2202_v3 }
 0x4a4   :  { %v2210_v43 = vunpack.c.l.bf16 %v2206_v44  ;;  %v2211_v10 = vunpack.c.h.bf16 %v2206_v44  ;;  %v2167_v1 = vpop.f32.mrf.mxu2  ;;  %v2181_v51 = vpop.f32.mrf.mxu3 }
 0x4a5   :  { %v2196_v13 = vadd.f32 %v2188_v41, %v2167_v1  ;;  %v2197_v19 = vadd.f32 %v2189_v29, %v2181_v51  ;;  %v2141_v38 = vpop.f32.mrf.mxu0  ;;  %v2155_v12 = vpop.f32.mrf.mxu1 }
 0x4a6   :  { %v2216_v58 = vmul.f32 1.442695, %v2210_v43  ;;  %v2218_v50 = vmul.f32 1.442695, %v2211_v10  ;;  %v2198_v18 = vadd.f32 %v2190_v48, %v2141_v38  ;;  %v2199_v3 = vadd.f32 %v2191_v26, %v2155_v12 }
 0x4a7   :  { %v2203_v25 = vpack.c.bf16 %v2197_v19, %v2196_v13 }
 0x4a8   :  { %4539 = vpow2.f32 %v2216_v58  ;;  %v2204_v4 = vpack.c.bf16 %v2199_v3, %v2198_v18 }
 0x4a9   :  { %4541 = vpow2.f32 %v2218_v50  ;;  %v2207_v42 = vxor.u32 2147516416, %v2203_v25  ;;  %v2278_v19 = vrot.slane %v2203_v25, 4 }
 0x4aa   :  { %v2208_v60 = vxor.u32 2147516416, %v2204_v4 }
 0x4ab   :  { %v2212_v44 = vunpack.c.l.bf16 %v2207_v42  ;;  %v2282_v3 = vunpack.c.l.bf16 %v2278_v19 }
 0x4ac   :  { %v2213_v15 = vunpack.c.l.bf16 %v2208_v60  ;;  %v2214_v8 = vunpack.c.h.bf16 %v2208_v60  ;;  %v2169_v41 = vpop.f32.mrf.mxu2  ;;  %v2183_v29 = vpop.f32.mrf.mxu3 }
 0x4ad   :  { %v2220_v1 = vmul.f32 1.442695, %v2212_v44  ;;  %v2200_v51 = vadd.f32 %v2192_v40, %v2169_v41  ;;  %v2201_v43 = vadd.f32 %v2193_v47, %v2183_v29 }
 0x4ae   :  { %v4540_v10 = vpop.eup %4539  ;;  %v2222_v48 = vmul.f32 1.442695, %v2213_v15  ;;  %v2224_v26 = vmul.f32 1.442695, %v2214_v8 }
 0x4af   :  { %v4542_v49 = vpop.eup %4541  ;;  %4543 = vpow2.f32 %v2220_v1  ;;  %v2205_v5 = vpack.c.bf16 %v2201_v43, %v2200_v51 }
 0x4b0   :  { %v2228_v13 = vpack.c.bf16 %v4542_v49, %v4540_v10  ;;  %4545 = vpow2.f32 %v2222_v48 }
 0x4b1   :  { %4547 = vpow2.f32 %v2224_v26  ;;  %v2209_v4 = vxor.u32 2147516416, %v2205_v5  ;;  %v2279_v29 = vrot.slane %v2205_v5, 4 }
 0x4b2   :  { %v2232_v38 = vunpack.c.l.bf16 %v2228_v13  ;;  %v2233_v12 = vunpack.c.h.bf16 %v2228_v13 }
 0x4b3   :  { %v2215_v58 = vunpack.c.l.bf16 %v2209_v4  ;;  %v2283_v48 = vunpack.c.l.bf16 %v2279_v29 }
 0x4b4   :  { %v2238_v60 = vadd.f32 1.0, %v2232_v38  ;;  %v2239_v50 = vadd.f32 1.0, %v2233_v12 }
 0x4b5   :  { %v4544_v18 = vpop.eup %4543  ;;  %v2226_v40 = vmul.f32 1.442695, %v2215_v58 }
 0x4b6   :  { %v4546_v47 = vpop.eup %4545  ;;  %v2244_v59 = vpack.c.bf16 %v2239_v50, %v2238_v60  ;;  %v2229_v42 = vpack.c.bf16 %v4544_v18, %v4544_v18 }
 0x4b7   :  { %v4548_v15 = vpop.eup %4547  ;;  %4549 = vpow2.f32 %v2226_v40 }
 0x4b8   :  { %v2248_v44 = vunpack.c.h.bf16 %v2244_v59  ;;  %v2249_v8 = vunpack.c.l.bf16 %v2244_v59  ;;  %v2230_v41 = vpack.c.bf16 %v4548_v15, %v4546_v47  ;;  %4551 = vtanh.f32 %v2282_v3 }
 0x4b9   :  { %v2234_v51 = vunpack.c.l.bf16 %v2229_v42 }
 0x4ba   :  { %4553 = vrcp.f32 %v2248_v44  ;;  %v2235_v25 = vunpack.c.l.bf16 %v2230_v41  ;;  %v2236_v1 = vunpack.c.h.bf16 %v2230_v41 }
 0x4bb   :  { %4555 = vrcp.f32 %v2249_v8  ;;  %v2240_v4 = vadd.f32 1.0, %v2234_v51 }
 0x4bc   :  { %v2241_v43 = vadd.f32 1.0, %v2235_v25  ;;  %v2242_v10 = vadd.f32 1.0, %v2236_v1  ;;  %4557 = vtanh.f32 %v2283_v48 }
 0x4bd   :  { %v4550_v26 = vpop.eup %4549  ;;  %v2245_v40 = vpack.c.bf16 %v2240_v4, %v2240_v4 }
 0x4be   :  { %v2246_v49 = vpack.c.bf16 %v2242_v10, %v2241_v43  ;;  %v2231_v13 = vpack.c.bf16 %v4550_v26, %v4550_v26  ;;  %v4552_v19 = vpop.eup %4551 }
 0x4bf   :  { %v2286_v18 = vpack.c.bf16 %v4552_v19, %v4552_v19  ;;  %v2255_v41 = vunpack.c.h.bf16 %v2245_v40  ;;  %v2256_v25 = vunpack.c.l.bf16 %v2245_v40 }
 0x4c0   :  { %v4554_v38 = vpop.eup %4553  ;;  %v2262_v12 = vunpack.c.h.bf16 %v2246_v49  ;;  %v2263_v58 = vunpack.c.l.bf16 %v2246_v49  ;;  %v2237_v3 = vunpack.c.l.bf16 %v2231_v13 }
 0x4c1   :  { %v4556_v60 = vpop.eup %4555  ;;  %v2251_v5 = vmul.f32 %v4554_v38, %v5690_v37  ;;  %v2302_v44 = vunpack.c.l.bf16 %v2286_v18 }
 0x4c2   :  { %v2253_v50 = vmul.f32 %v4556_v60, %v5692_v16  ;;  %4559 = vrcp.f32 %v2262_v12  ;;  %v4558_v59 = vpop.eup %4557  ;;  %v2243_v8 = vadd.f32 1.0, %v2237_v3 }
 0x4c3   :  { %4561 = vrcp.f32 %v2263_v58  ;;  %v2287_v48 = vpack.c.bf16 %v4558_v59, %v4558_v59 }
 0x4c4   :  { %v2254_v47 = vpack.c.bf16 %v2251_v5, %v2253_v50  ;;  %v2247_v49 = vpack.c.bf16 %v2243_v8, %v2243_v8  ;;  %4563 = vrcp.f32 %v2255_v41 }
 0x4c5   :  { %4565 = vrcp.f32 %v2256_v25  ;;  %v2303_v12 = vunpack.c.l.bf16 %v2287_v48 }
 0x4c6   :  { %v2292_v15 = vrot.slane %v2254_v47, 4  ;;  %v2300_v42 = vunpack.c.l.bf16 %v2254_v47  ;;  %v2269_v60 = vunpack.c.h.bf16 %v2247_v49  ;;  %v2270_v18 = vunpack.c.l.bf16 %v2247_v49 }
 0x4c8   :  { %v4560_v29 = vpop.eup %4559  ;;  %v2296_v1 = vunpack.c.l.bf16 %v2292_v15  ;;  %v2304_v51 = vmul.f32 %v2302_v44, %v2300_v42  ;;  %4567 = vrcp.f32 %v2269_v60 }
 0x4c9   :  { %v4562_v43 = vpop.eup %4561  ;;  %v2265_v10 = vmul.f32 %v4560_v29, %v5690_v37  ;;  %4569 = vrcp.f32 %v2270_v18 }
 0x4ca   :  { %v2306_v26 = vpack.c.bf16 %v2304_v51, %v2304_v51  ;;  %v2267_v13 = vmul.f32 %v4562_v43, %v5692_v16  ;;  %v2298_v19 = vmul.f32 %v2296_v1, %v5912_v39  ;;  %v4564_v59 = vpop.eup %4563 }
 0x4cb   :  { %v4566_v15 = vpop.eup %4565  ;;  %v2258_v41 = vmul.f32 %v4564_v59, %v5690_v37 }
 0x4cc   :  { %v2308_v4 = vunpack.c.l.bf16 %v2306_v26  ;;  %v2268_v38 = vpack.c.bf16 %v2265_v10, %v2267_v13  ;;  %v2260_v29 = vmul.f32 %v4566_v15, %v5692_v16 }
 0x4ce   :  { %v5980_v58 = vadd.f32 %v2308_v4, %v2298_v19  ;;  %v2293_v5 = vrot.slane %v2268_v38, 4  ;;  %v2301_v50 = vunpack.c.l.bf16 %v2268_v38  ;;  %v4568_v1 = vpop.eup %4567  ;;  %v2261_v10 = vpack.c.bf16 %v2258_v41, %v2260_v29 }
 0x4cf   :  { %v4570_v43 = vpop.eup %4569  ;;  %v2272_v19 = vmul.f32 %v4568_v1, %v5690_v37 }
 0x4d0   :  { %v2312_v3 = vpack.c.bf16 %v5980_v58, %v5980_v58  ;;  %v2297_v40 = vunpack.c.l.bf16 %v2293_v5  ;;  %v2305_v47 = vmul.f32 %v2303_v12, %v2301_v50  ;;  %v2320_v13 = vunpack.c.l.bf16 %v2261_v10 }
 0x4d1   :  { %v2274_v4 = vmul.f32 %v4570_v43, %v5692_v16  ;;  %v2337_v50 = vstv %s4231_s5  ;;  %v6557_v43 = vld [vmem:[#allocation37_spill] sm:$0xff] }
 0x4d2   :  { %v2314_v42 = vunpack.c.l.bf16 %v2312_v3  ;;  %v2307_v44 = vpack.c.bf16 %v2305_v47, %v2305_v47  ;;  %v2299_v39 = vmul.f32 %v2297_v40, %v5919_v61 }
 0x4d3   :  { %v2275_v60 = vpack.c.bf16 %v2272_v19, %v2274_v4 }
 0x4d4   :  { %4571 = vtanh.f32 %v2314_v42  ;;  %v2309_v8 = vunpack.c.l.bf16 %v2307_v44 }
 0x4d5   :  { %v2321_v47 = vunpack.c.l.bf16 %v2275_v60 }
 0x4d6   :  { %v5987_v25 = vadd.f32 %v2309_v8, %v2299_v39 }
 0x4d8   :  { %v2313_v51 = vpack.c.bf16 %v5987_v25, %v5987_v25 }
 0x4da   :  { %v4572_v48 = vpop.eup %4571  ;;  %v2315_v26 = vunpack.c.l.bf16 %v2313_v51  ;;  %v6556_v51 = vld [vmem:[#allocation9_spill] sm:$0xff] }
 0x4db   :  { %v2318_v49 = vpack.c.bf16 %v4572_v48, %v4572_v48  ;;  %v534_v10 = vadd.f32 %v6557_v43, %v6556_v51  ;;  %v6558_v48 = vld [vmem:[#allocation10_spill] sm:$0xff] }
 0x4dc   :  { %4573 = vtanh.f32 %v2315_v26  ;;  %v6559_v26 = vld [vmem:[#allocation38_spill] sm:$0xff] }
 0x4dd   :  { %v2322_v61 = vunpack.c.l.bf16 %v2318_v49  ;;  %v548_v49 = vadd.f32 %v6559_v26, %v6558_v48 }
 0x4df   :  { %v2324_v38 = vmul.f32 %v2322_v61, %v2320_v13  ;;  %v6560_v13 = vld [vmem:[#allocation36_spill] sm:$0xff] }
 0x4e0   :  { %v2412_v61 = vunpack.c.l.bf16 %v6560_v13  ;;  %v2413_v19 = vunpack.c.h.bf16 %v6560_v13 }
 0x4e1   :  { %v2326_v12 = vpack.c.bf16 %v2324_v38, %v2324_v38 }
 0x4e2   :  { %v4574_v5 = vpop.eup %4573 }
 0x4e3   :  { %v2335_v18 = vunpack.c.l.bf16 %v2326_v12  ;;  %v2319_v3 = vpack.c.bf16 %v4574_v5, %v4574_v5  ;;  %v580_v5 = vpack.c.bf16 %v548_v49, %v534_v10 }
 0x4e5   :  { %v2338_v40 = vmul.f32 %v2337_v50, %v2335_v18  ;;  %v2323_v59 = vunpack.c.l.bf16 %v2319_v3  ;;  %v6561_v3 = vld [vmem:[#allocation11_spill] sm:$0xff]  ;;  %v2416_v48 = vunpack.c.l.bf16 %v580_v5 }
 0x4e7   :  { %v5994_v15 = vadd.f32 %v2338_v40, %v5926_v6  ;;  %v2325_v42 = vmul.f32 %v2323_v59, %v2321_v47  ;;  %v6554_v6 = vld [vmem:[#allocation26_spill] sm:$0xff]  ;;  %v6562_v40 = vld [vmem:[#allocation40_spill] sm:$0xff] }
 0x4e8   :  { %v562_v47 = vadd.f32 %v6562_v40, %v6561_v3  ;;  %v6563_v59 = vld [vmem:[#allocation12_spill] sm:$0xff] }
 0x4e9   :  { %v2327_v44 = vpack.c.bf16 %v2325_v42, %v2325_v42  ;;  %v4354_v39 = vpack.c.bf16 %v2325_v42, %v2324_v38  ;;  %v6564_v42 = vld [vmem:[#allocation41_spill] sm:$0xff] }
 0x4eb   :  { %v2336_v8 = vunpack.c.l.bf16 %v2327_v44  ;;  %4355 = vst [vmem:[#allocation3] sm:$0xff] %v4354_v39   ;;  %v576_v44 = vadd.f32 %v6564_v42, %v6563_v59  ;;  %v6565_v39 = vld [vmem:[#allocation39_spill] sm:$0xff] }
 0x4ed   :  { %v2339_v41 = vmul.f32 %v2337_v50, %v2336_v8  ;;  %v2414_v8 = vunpack.c.l.bf16 %v6565_v39  ;;  %v581_v40 = vpack.c.bf16 %v576_v44, %v562_v47 }
 0x4ef   :  { %v5997_v29 = vadd.f32 %v2339_v41, %v5929_v21  ;;  %v6555_v21 = vld [vmem:[#allocation27_spill] sm:$0xff]  ;;  %v2415_v41 = vunpack.c.h.bf16 %v6565_v39  ;;  %v2418_v51 = vunpack.c.l.bf16 %v581_v40 }
 0x4f2   :  { %v4324_v1 = vld [vmem:[#allocation3] sm:$0xff] }
 0x4f3   :  { %2364 = vmatmul.bf16.vlgmr.msrb.gmra.mxu0 %v4324_v1  ;;  %2378 = vmatmul.bf16.vlgmr.msrb.gmra.mxu1 %v4324_v1 }
 0x4f4   :  { %2392 = vmatmul.bf16.vlgmr.msrb.gmra.mxu2 %v4324_v1  ;;  %2406 = vmatmul.bf16.vlgmr.msrb.gmra.mxu3 %v4324_v1 }
 0x4f5   :  { %2808 = vmatpush.bf16.msrb.mxu0 %v5183_v27  ;;  %2822 = vmatpush.bf16.msrb.mxu1 %v5186_v30 }
 0x4f6   :  { %2836 = vmatpush.bf16.msrb.mxu2 %v5195_v34  ;;  %2850 = vmatpush.bf16.msrb.mxu3 %v5197_v35 }
 0x4f9   :  { %2809 = vmatpush.bf16.msrb.mxu0 %v5223_v45  ;;  %2823 = vmatpush.bf16.msrb.mxu1 %v5227_v46 }
 0x4fa   :  { %2837 = vmatpush.bf16.msrb.mxu2 %v5237_v52  ;;  %2851 = vmatpush.bf16.msrb.mxu3 %v5239_v53 }
 0x4fd   :  { %2810 = vmatpush.bf16.msrb.mxu0 %v5263_v2  ;;  %2824 = vmatpush.bf16.msrb.mxu1 %v5269_v7 }
 0x4fe   :  { %2838 = vmatpush.bf16.msrb.mxu2 %v5279_v11  ;;  %2852 = vmatpush.bf16.msrb.mxu3 %v5281_v14 }
 0x501   :  { %2811 = vmatpush.bf16.msrb.mxu0 %v5304_v23  ;;  %2825 = vmatpush.bf16.msrb.mxu1 %v5307_v24 }
 0x502   :  { %2839 = vmatpush.bf16.msrb.mxu2 %v5320_v31  ;;  %2853 = vmatpush.bf16.msrb.mxu3 %v5322_v32 }
 0x505   :  { %2812 = vmatpush.bf16.msrb.mxu0 %v5347_v54  ;;  %2826 = vmatpush.bf16.msrb.mxu1 %v5351_v57 }
 0x506   :  { %2840 = vmatpush.bf16.msrb.mxu2 %v5362_v63  ;;  %2854 = vmatpush.bf16.msrb.mxu3 %v5364_v0 }
 0x509   :  { %2813 = vmatpush.bf16.msrb.mxu0 %v5390_v20  ;;  %2827 = vmatpush.bf16.msrb.mxu1 %v5394_v22 }
 0x50a   :  { %2841 = vmatpush.bf16.msrb.mxu2 %v5404_v33  ;;  %2855 = vmatpush.bf16.msrb.mxu3 %v5406_v36 }
 0x50d   :  { %2814 = vmatpush.bf16.msrb.mxu0 %v5430_v62  ;;  %2828 = vmatpush.bf16.msrb.mxu1 %v5436_v9 }
 0x50e   :  { %2842 = vmatpush.bf16.msrb.mxu2 %v5446_v17  ;;  %2856 = vmatpush.bf16.msrb.mxu3 %v5448_v28 }
 0x511   :  { %2815 = vmatpush.bf16.msrb.mxu0 %v5471_v55  ;;  %2829 = vmatpush.bf16.msrb.mxu1 %v5474_v56 }
 0x512   :  { %2843 = vmatpush.bf16.msrb.mxu2 %v6554_v6  ;;  %2857 = vmatpush.bf16.msrb.mxu3 %v6555_v21  ;;  %v2419_v21 = vunpack.c.h.bf16 %v581_v40 }
 0x570   :  { %v2365_v4 = vpop.f32.mrf.mxu0  ;;  %v2379_v38 = vpop.f32.mrf.mxu1 }
 0x571   :  { %v2420_v12 = vadd.f32 %v2412_v61, %v2365_v4  ;;  %v2421_v60 = vadd.f32 %v2413_v19, %v2379_v38  ;;  %v2417_v61 = vunpack.c.h.bf16 %v580_v5 }
 0x573   :  { %v2428_v50 = vpack.c.bf16 %v2421_v60, %v2420_v12 }
 0x575   :  { %v2432_v18 = vxor.u32 2147516416, %v2428_v50 }
 0x577   :  { %v2436_v1 = vunpack.c.l.bf16 %v2432_v18  ;;  %v2437_v43 = vunpack.c.h.bf16 %v2432_v18  ;;  %v2393_v26 = vpop.f32.mrf.mxu2  ;;  %v2407_v13 = vpop.f32.mrf.mxu3 }
 0x578   :  { %v2422_v19 = vadd.f32 %v2414_v8, %v2393_v26  ;;  %v2423_v10 = vadd.f32 %v2415_v41, %v2407_v13  ;;  %v2367_v49 = vpop.f32.mrf.mxu0  ;;  %v2381_v4 = vpop.f32.mrf.mxu1 }
 0x579   :  { %v2442_v38 = vmul.f32 1.442695, %v2436_v1  ;;  %v2444_v12 = vmul.f32 1.442695, %v2437_v43  ;;  %v2424_v60 = vadd.f32 %v2416_v48, %v2367_v49  ;;  %v2425_v50 = vadd.f32 %v2417_v61, %v2381_v4 }
 0x57a   :  { %v2429_v42 = vpack.c.bf16 %v2423_v10, %v2422_v19 }
 0x57b   :  { %4575 = vpow2.f32 %v2442_v38  ;;  %v2430_v59 = vpack.c.bf16 %v2425_v50, %v2424_v60 }
 0x57c   :  { %4577 = vpow2.f32 %v2444_v12  ;;  %v2433_v39 = vxor.u32 2147516416, %v2429_v42  ;;  %v2504_v10 = vrot.slane %v2429_v42, 4 }
 0x57d   :  { %v2434_v3 = vxor.u32 2147516416, %v2430_v59 }
 0x57e   :  { %v2438_v18 = vunpack.c.l.bf16 %v2433_v39  ;;  %v2508_v50 = vunpack.c.l.bf16 %v2504_v10 }
 0x57f   :  { %v2439_v6 = vunpack.c.l.bf16 %v2434_v3  ;;  %v2440_v5 = vunpack.c.h.bf16 %v2434_v3  ;;  %v2395_v8 = vpop.f32.mrf.mxu2  ;;  %v2409_v41 = vpop.f32.mrf.mxu3 }
 0x580   :  { %v2446_v26 = vmul.f32 1.442695, %v2438_v18  ;;  %v2426_v13 = vadd.f32 %v2418_v51, %v2395_v8  ;;  %v2427_v1 = vadd.f32 %v2419_v21, %v2409_v41 }
 0x581   :  { %v4576_v43 = vpop.eup %4575  ;;  %v2448_v48 = vmul.f32 1.442695, %v2439_v6  ;;  %v2450_v61 = vmul.f32 1.442695, %v2440_v5 }
 0x582   :  { %v4578_v47 = vpop.eup %4577  ;;  %4579 = vpow2.f32 %v2446_v26  ;;  %v2431_v44 = vpack.c.bf16 %v2427_v1, %v2426_v13 }
 0x583   :  { %v2454_v19 = vpack.c.bf16 %v4578_v47, %v4576_v43  ;;  %4581 = vpow2.f32 %v2448_v48 }
 0x584   :  { %4583 = vpow2.f32 %v2450_v61  ;;  %v2435_v59 = vxor.u32 2147516416, %v2431_v44  ;;  %v2505_v41 = vrot.slane %v2431_v44, 4 }
 0x585   :  { %v2458_v49 = vunpack.c.l.bf16 %v2454_v19  ;;  %v2459_v4 = vunpack.c.h.bf16 %v2454_v19 }
 0x586   :  { %v2441_v38 = vunpack.c.l.bf16 %v2435_v59  ;;  %v2509_v48 = vunpack.c.l.bf16 %v2505_v41 }
 0x587   :  { %v2464_v3 = vadd.f32 1.0, %v2458_v49  ;;  %v2465_v12 = vadd.f32 1.0, %v2459_v4 }
 0x588   :  { %v4580_v60 = vpop.eup %4579  ;;  %v2452_v51 = vmul.f32 1.442695, %v2441_v38 }
 0x589   :  { %v4582_v21 = vpop.eup %4581  ;;  %v2470_v40 = vpack.c.bf16 %v2465_v12, %v2464_v3  ;;  %v2455_v39 = vpack.c.bf16 %v4580_v60, %v4580_v60 }
 0x58a   :  { %v4584_v6 = vpop.eup %4583  ;;  %4585 = vpow2.f32 %v2452_v51 }
 0x58b   :  { %v2474_v18 = vunpack.c.h.bf16 %v2470_v40  ;;  %v2475_v5 = vunpack.c.l.bf16 %v2470_v40  ;;  %v2456_v8 = vpack.c.bf16 %v4584_v6, %v4582_v21  ;;  %4587 = vtanh.f32 %v2508_v50 }
 0x58c   :  { %v2460_v13 = vunpack.c.l.bf16 %v2455_v39 }
 0x58d   :  { %4589 = vrcp.f32 %v2474_v18  ;;  %v2461_v42 = vunpack.c.l.bf16 %v2456_v8  ;;  %v2462_v26 = vunpack.c.h.bf16 %v2456_v8 }
 0x58e   :  { %4591 = vrcp.f32 %v2475_v5  ;;  %v2466_v59 = vadd.f32 1.0, %v2460_v13 }
 0x58f   :  { %v2467_v1 = vadd.f32 1.0, %v2461_v42  ;;  %v2468_v43 = vadd.f32 1.0, %v2462_v26  ;;  %4593 = vtanh.f32 %v2509_v48 }
 0x590   :  { %v4586_v61 = vpop.eup %4585  ;;  %v2471_v51 = vpack.c.bf16 %v2466_v59, %v2466_v59 }
 0x591   :  { %v2472_v47 = vpack.c.bf16 %v2468_v43, %v2467_v1  ;;  %v2457_v19 = vpack.c.bf16 %v4586_v61, %v4586_v61  ;;  %v4588_v10 = vpop.eup %4587 }
 0x592   :  { %v2512_v60 = vpack.c.bf16 %v4588_v10, %v4588_v10  ;;  %v2481_v8 = vunpack.c.h.bf16 %v2471_v51  ;;  %v2482_v42 = vunpack.c.l.bf16 %v2471_v51 }
 0x593   :  { %v4590_v49 = vpop.eup %4589  ;;  %v2488_v4 = vunpack.c.h.bf16 %v2472_v47  ;;  %v2489_v38 = vunpack.c.l.bf16 %v2472_v47  ;;  %v2463_v50 = vunpack.c.l.bf16 %v2457_v19 }
 0x594   :  { %v4592_v3 = vpop.eup %4591  ;;  %v2477_v44 = vmul.f32 %v4590_v49, %v5690_v37  ;;  %v2528_v18 = vunpack.c.l.bf16 %v2512_v60 }
 0x595   :  { %v2479_v12 = vmul.f32 %v4592_v3, %v5692_v16  ;;  %4595 = vrcp.f32 %v2488_v4  ;;  %v4594_v40 = vpop.eup %4593  ;;  %v2469_v5 = vadd.f32 1.0, %v2463_v50 }
 0x596   :  { %4597 = vrcp.f32 %v2489_v38  ;;  %v2513_v48 = vpack.c.bf16 %v4594_v40, %v4594_v40 }
 0x597   :  { %v2480_v21 = vpack.c.bf16 %v2477_v44, %v2479_v12  ;;  %v2473_v47 = vpack.c.bf16 %v2469_v5, %v2469_v5  ;;  %4599 = vrcp.f32 %v2481_v8 }
 0x598   :  { %4601 = vrcp.f32 %v2482_v42  ;;  %v2529_v4 = vunpack.c.l.bf16 %v2513_v48 }
 0x599   :  { %v2518_v6 = vrot.slane %v2480_v21, 4  ;;  %v2526_v39 = vunpack.c.l.bf16 %v2480_v21  ;;  %v2495_v3 = vunpack.c.h.bf16 %v2473_v47  ;;  %v2496_v60 = vunpack.c.l.bf16 %v2473_v47 }
 0x59b   :  { %v4596_v41 = vpop.eup %4595  ;;  %v2522_v26 = vunpack.c.l.bf16 %v2518_v6  ;;  %v2530_v13 = vmul.f32 %v2528_v18, %v2526_v39  ;;  %4603 = vrcp.f32 %v2495_v3 }
 0x59c   :  { %v4598_v1 = vpop.eup %4597  ;;  %v2491_v43 = vmul.f32 %v4596_v41, %v5690_v37  ;;  %4605 = vrcp.f32 %v2496_v60 }
 0x59d   :  { %v2532_v61 = vpack.c.bf16 %v2530_v13, %v2530_v13  ;;  %v2493_v19 = vmul.f32 %v4598_v1, %v5692_v16  ;;  %v2524_v10 = vmul.f32 %v2522_v26, %v5980_v58  ;;  %v4600_v40 = vpop.eup %4599 }
 0x59e   :  { %v4602_v6 = vpop.eup %4601  ;;  %v2484_v8 = vmul.f32 %v4600_v40, %v5690_v37 }
 0x59f   :  { %v2534_v59 = vunpack.c.l.bf16 %v2532_v61  ;;  %v2494_v49 = vpack.c.bf16 %v2491_v43, %v2493_v19  ;;  %v2486_v41 = vmul.f32 %v4602_v6, %v5692_v16 }
 0x5a1   :  { %v6048_v38 = vadd.f32 %v2534_v59, %v2524_v10  ;;  %v2519_v44 = vrot.slane %v2494_v49, 4  ;;  %v2527_v12 = vunpack.c.l.bf16 %v2494_v49  ;;  %v4604_v26 = vpop.eup %4603  ;;  %v2487_v43 = vpack.c.bf16 %v2484_v8, %v2486_v41 }
 0x5a2   :  { %v4606_v1 = vpop.eup %4605  ;;  %v2498_v10 = vmul.f32 %v4604_v26, %v5690_v37 }
 0x5a3   :  { %v2538_v50 = vpack.c.bf16 %v6048_v38, %v6048_v38  ;;  %v2523_v51 = vunpack.c.l.bf16 %v2519_v44  ;;  %v2531_v21 = vmul.f32 %v2529_v4, %v2527_v12  ;;  %v2546_v19 = vunpack.c.l.bf16 %v2487_v43 }
 0x5a4   :  { %v2500_v59 = vmul.f32 %v4606_v1, %v5692_v16  ;;  %v2563_v12 = vstv %s4236_s26  ;;  %v6569_v1 = vld [vmem:[#allocation43_spill] sm:$0xff] }
 0x5a5   :  { %v2540_v39 = vunpack.c.l.bf16 %v2538_v50  ;;  %v2533_v18 = vpack.c.bf16 %v2531_v21, %v2531_v21  ;;  %v2525_v58 = vmul.f32 %v2523_v51, %v5987_v25 }
 0x5a6   :  { %v2501_v3 = vpack.c.bf16 %v2498_v10, %v2500_v59 }
 0x5a7   :  { %4607 = vtanh.f32 %v2540_v39  ;;  %v2535_v5 = vunpack.c.l.bf16 %v2533_v18 }
 0x5a8   :  { %v2547_v21 = vunpack.c.l.bf16 %v2501_v3 }
 0x5a9   :  { %v6055_v42 = vadd.f32 %v2535_v5, %v2525_v58 }
 0x5ab   :  { %v2539_v13 = vpack.c.bf16 %v6055_v42, %v6055_v42 }
 0x5ad   :  { %v4608_v48 = vpop.eup %4607  ;;  %v2541_v61 = vunpack.c.l.bf16 %v2539_v13  ;;  %v6568_v13 = vld [vmem:[#allocation9_spill] sm:$0xff] }
 0x5ae   :  { %v2544_v47 = vpack.c.bf16 %v4608_v48, %v4608_v48  ;;  %v610_v43 = vadd.f32 %v6569_v1, %v6568_v13  ;;  %v6570_v48 = vld [vmem:[#allocation10_spill] sm:$0xff] }
 0x5af   :  { %4609 = vtanh.f32 %v2541_v61  ;;  %v6571_v61 = vld [vmem:[#allocation44_spill] sm:$0xff] }
 0x5b0   :  { %v2548_v25 = vunpack.c.l.bf16 %v2544_v47  ;;  %v624_v47 = vadd.f32 %v6571_v61, %v6570_v48 }
 0x5b2   :  { %v2550_v49 = vmul.f32 %v2548_v25, %v2546_v19  ;;  %v6572_v19 = vld [vmem:[#allocation42_spill] sm:$0xff] }
 0x5b3   :  { %v2638_v25 = vunpack.c.l.bf16 %v6572_v19  ;;  %v2639_v10 = vunpack.c.h.bf16 %v6572_v19 }
 0x5b4   :  { %v2552_v4 = vpack.c.bf16 %v2550_v49, %v2550_v49 }
 0x5b5   :  { %v4610_v44 = vpop.eup %4609 }
 0x5b6   :  { %v2561_v60 = vunpack.c.l.bf16 %v2552_v4  ;;  %v2545_v50 = vpack.c.bf16 %v4610_v44, %v4610_v44  ;;  %v656_v44 = vpack.c.bf16 %v624_v47, %v610_v43 }
 0x5b8   :  { %v2564_v51 = vmul.f32 %v2563_v12, %v2561_v60  ;;  %v2549_v40 = vunpack.c.l.bf16 %v2545_v50  ;;  %v6573_v50 = vld [vmem:[#allocation11_spill] sm:$0xff]  ;;  %v2642_v48 = vunpack.c.l.bf16 %v656_v44 }
 0x5ba   :  { %v6062_v6 = vadd.f32 %v2564_v51, %v5994_v15  ;;  %v2551_v39 = vmul.f32 %v2549_v40, %v2547_v21  ;;  %v6566_v15 = vld [vmem:[#allocation26_spill] sm:$0xff]  ;;  %v6575_v40 = vld [vmem:[#allocation12_spill] sm:$0xff] }
 0x5bb   :  { %v6574_v51 = vld [vmem:[#allocation46_spill] sm:$0xff] }
 0x5bc   :  { %v2553_v18 = vpack.c.bf16 %v2551_v39, %v2551_v39  ;;  %v4359_v58 = vpack.c.bf16 %v2551_v39, %v2550_v49  ;;  %v638_v21 = vadd.f32 %v6574_v51, %v6573_v50  ;;  %v6576_v39 = vld [vmem:[#allocation47_spill] sm:$0xff] }
 0x5be   :  { %v2562_v5 = vunpack.c.l.bf16 %v2553_v18  ;;  %4360 = vst [vmem:[#allocation3] sm:$0xff] %v4359_v58   ;;  %v652_v18 = vadd.f32 %v6576_v39, %v6575_v40  ;;  %v6577_v58 = vld [vmem:[#allocation45_spill] sm:$0xff] }
 0x5c0   :  { %v2565_v8 = vmul.f32 %v2563_v12, %v2562_v5  ;;  %v2640_v5 = vunpack.c.l.bf16 %v6577_v58  ;;  %v657_v51 = vpack.c.bf16 %v652_v18, %v638_v21 }
 0x5c2   :  { %v6065_v41 = vadd.f32 %v2565_v8, %v5997_v29  ;;  %v6567_v29 = vld [vmem:[#allocation27_spill] sm:$0xff]  ;;  %v2641_v8 = vunpack.c.h.bf16 %v6577_v58  ;;  %v2644_v13 = vunpack.c.l.bf16 %v657_v51 }
 0x5c5   :  { %v4325_v26 = vld [vmem:[#allocation3] sm:$0xff] }
 0x5c6   :  { %2590 = vmatmul.bf16.vlgmr.msra.gmra.mxu0 %v4325_v26  ;;  %2604 = vmatmul.bf16.vlgmr.msra.gmra.mxu1 %v4325_v26 }
 0x5c7   :  { %2618 = vmatmul.bf16.vlgmr.msra.gmra.mxu2 %v4325_v26  ;;  %2632 = vmatmul.bf16.vlgmr.msra.gmra.mxu3 %v4325_v26 }
 0x5c8   :  { %3034 = vmatpush.bf16.msra.mxu0 %v5183_v27  ;;  %3048 = vmatpush.bf16.msra.mxu1 %v5186_v30 }
 0x5c9   :  { %3062 = vmatpush.bf16.msra.mxu2 %v5195_v34  ;;  %3076 = vmatpush.bf16.msra.mxu3 %v5197_v35 }
 0x5cc   :  { %3035 = vmatpush.bf16.msra.mxu0 %v5223_v45  ;;  %3049 = vmatpush.bf16.msra.mxu1 %v5227_v46 }
 0x5cd   :  { %3063 = vmatpush.bf16.msra.mxu2 %v5237_v52  ;;  %3077 = vmatpush.bf16.msra.mxu3 %v5239_v53 }
 0x5d0   :  { %3036 = vmatpush.bf16.msra.mxu0 %v5263_v2  ;;  %3050 = vmatpush.bf16.msra.mxu1 %v5269_v7 }
 0x5d1   :  { %3064 = vmatpush.bf16.msra.mxu2 %v5279_v11  ;;  %3078 = vmatpush.bf16.msra.mxu3 %v5281_v14 }
 0x5d4   :  { %3037 = vmatpush.bf16.msra.mxu0 %v5304_v23  ;;  %3051 = vmatpush.bf16.msra.mxu1 %v5307_v24 }
 0x5d5   :  { %3065 = vmatpush.bf16.msra.mxu2 %v5320_v31  ;;  %3079 = vmatpush.bf16.msra.mxu3 %v5322_v32 }
 0x5d8   :  { %3038 = vmatpush.bf16.msra.mxu0 %v5347_v54  ;;  %3052 = vmatpush.bf16.msra.mxu1 %v5351_v57 }
 0x5d9   :  { %3066 = vmatpush.bf16.msra.mxu2 %v5362_v63  ;;  %3080 = vmatpush.bf16.msra.mxu3 %v5364_v0 }
 0x5dc   :  { %3039 = vmatpush.bf16.msra.mxu0 %v5390_v20  ;;  %3053 = vmatpush.bf16.msra.mxu1 %v5394_v22 }
 0x5dd   :  { %3067 = vmatpush.bf16.msra.mxu2 %v5404_v33  ;;  %3081 = vmatpush.bf16.msra.mxu3 %v5406_v36 }
 0x5e0   :  { %3040 = vmatpush.bf16.msra.mxu0 %v5430_v62  ;;  %3054 = vmatpush.bf16.msra.mxu1 %v5436_v9 }
 0x5e1   :  { %3068 = vmatpush.bf16.msra.mxu2 %v5446_v17  ;;  %3082 = vmatpush.bf16.msra.mxu3 %v5448_v28 }
 0x5e4   :  { %3041 = vmatpush.bf16.msra.mxu0 %v5471_v55  ;;  %3055 = vmatpush.bf16.msra.mxu1 %v5474_v56 }
 0x5e5   :  { %3069 = vmatpush.bf16.msra.mxu2 %v6566_v15  ;;  %3083 = vmatpush.bf16.msra.mxu3 %v6567_v29  ;;  %v2645_v29 = vunpack.c.h.bf16 %v657_v51 }
 0x643   :  { %v2591_v59 = vpop.f32.mrf.mxu0  ;;  %v2605_v49 = vpop.f32.mrf.mxu1 }
 0x644   :  { %v2646_v4 = vadd.f32 %v2638_v25, %v2591_v59  ;;  %v2647_v3 = vadd.f32 %v2639_v10, %v2605_v49  ;;  %v2643_v25 = vunpack.c.h.bf16 %v656_v44 }
 0x646   :  { %v2654_v12 = vpack.c.bf16 %v2647_v3, %v2646_v4 }
 0x648   :  { %v2658_v60 = vxor.u32 2147516416, %v2654_v12 }
 0x64a   :  { %v2662_v26 = vunpack.c.l.bf16 %v2658_v60  ;;  %v2663_v1 = vunpack.c.h.bf16 %v2658_v60  ;;  %v2619_v61 = vpop.f32.mrf.mxu2  ;;  %v2633_v19 = vpop.f32.mrf.mxu3 }
 0x64b   :  { %v2648_v10 = vadd.f32 %v2640_v5, %v2619_v61  ;;  %v2649_v43 = vadd.f32 %v2641_v8, %v2633_v19  ;;  %v2593_v47 = vpop.f32.mrf.mxu0  ;;  %v2607_v59 = vpop.f32.mrf.mxu1 }
 0x64c   :  { %v2668_v49 = vmul.f32 1.442695, %v2662_v26  ;;  %v2670_v4 = vmul.f32 1.442695, %v2663_v1  ;;  %v2650_v3 = vadd.f32 %v2642_v48, %v2593_v47  ;;  %v2651_v12 = vadd.f32 %v2643_v25, %v2607_v59 }
 0x64d   :  { %v2655_v39 = vpack.c.bf16 %v2649_v43, %v2648_v10 }
 0x64e   :  { %4611 = vpow2.f32 %v2668_v49  ;;  %v2656_v40 = vpack.c.bf16 %v2651_v12, %v2650_v3 }
 0x64f   :  { %4613 = vpow2.f32 %v2670_v4  ;;  %v2659_v58 = vxor.u32 2147516416, %v2655_v39  ;;  %v2730_v43 = vrot.slane %v2655_v39, 4 }
 0x650   :  { %v2660_v50 = vxor.u32 2147516416, %v2656_v40 }
 0x651   :  { %v2664_v60 = vunpack.c.l.bf16 %v2659_v58  ;;  %v2734_v12 = vunpack.c.l.bf16 %v2730_v43 }
 0x652   :  { %v2665_v15 = vunpack.c.l.bf16 %v2660_v50  ;;  %v2666_v44 = vunpack.c.h.bf16 %v2660_v50  ;;  %v2621_v5 = vpop.f32.mrf.mxu2  ;;  %v2635_v8 = vpop.f32.mrf.mxu3 }
 0x653   :  { %v2672_v61 = vmul.f32 1.442695, %v2664_v60  ;;  %v2652_v19 = vadd.f32 %v2644_v13, %v2621_v5  ;;  %v2653_v26 = vadd.f32 %v2645_v29, %v2635_v8 }
 0x654   :  { %v4612_v1 = vpop.eup %4611  ;;  %v2674_v48 = vmul.f32 1.442695, %v2665_v15  ;;  %v2676_v25 = vmul.f32 1.442695, %v2666_v44 }
 0x655   :  { %v4614_v21 = vpop.eup %4613  ;;  %4615 = vpow2.f32 %v2672_v61  ;;  %v2657_v18 = vpack.c.bf16 %v2653_v26, %v2652_v19 }
 0x656   :  { %v2680_v10 = vpack.c.bf16 %v4614_v21, %v4612_v1  ;;  %4617 = vpow2.f32 %v2674_v48 }
 0x657   :  { %4619 = vpow2.f32 %v2676_v25  ;;  %v2661_v40 = vxor.u32 2147516416, %v2657_v18  ;;  %v2731_v8 = vrot.slane %v2657_v18, 4 }
 0x658   :  { %v2684_v47 = vunpack.c.l.bf16 %v2680_v10  ;;  %v2685_v59 = vunpack.c.h.bf16 %v2680_v10 }
 0x659   :  { %v2667_v49 = vunpack.c.l.bf16 %v2661_v40  ;;  %v2735_v48 = vunpack.c.l.bf16 %v2731_v8 }
 0x65a   :  { %v2690_v50 = vadd.f32 1.0, %v2684_v47  ;;  %v2691_v4 = vadd.f32 1.0, %v2685_v59 }
 0x65b   :  { %v4616_v3 = vpop.eup %4615  ;;  %v2678_v13 = vmul.f32 1.442695, %v2667_v49 }
 0x65c   :  { %v4618_v29 = vpop.eup %4617  ;;  %v2696_v51 = vpack.c.bf16 %v2691_v4, %v2690_v50  ;;  %v2681_v58 = vpack.c.bf16 %v4616_v3, %v4616_v3 }
 0x65d   :  { %v4620_v15 = vpop.eup %4619  ;;  %4621 = vpow2.f32 %v2678_v13 }
 0x65e   :  { %v2700_v60 = vunpack.c.h.bf16 %v2696_v51  ;;  %v2701_v44 = vunpack.c.l.bf16 %v2696_v51  ;;  %v2682_v5 = vpack.c.bf16 %v4620_v15, %v4618_v29  ;;  %4623 = vtanh.f32 %v2734_v12 }
 0x65f   :  { %v2686_v19 = vunpack.c.l.bf16 %v2681_v58 }
 0x660   :  { %4625 = vrcp.f32 %v2700_v60  ;;  %v2687_v39 = vunpack.c.l.bf16 %v2682_v5  ;;  %v2688_v61 = vunpack.c.h.bf16 %v2682_v5 }
 0x661   :  { %4627 = vrcp.f32 %v2701_v44  ;;  %v2692_v40 = vadd.f32 1.0, %v2686_v19 }
 0x662   :  { %v2693_v26 = vadd.f32 1.0, %v2687_v39  ;;  %v2694_v1 = vadd.f32 1.0, %v2688_v61  ;;  %4629 = vtanh.f32 %v2735_v48 }
 0x663   :  { %v4622_v25 = vpop.eup %4621  ;;  %v2697_v13 = vpack.c.bf16 %v2692_v40, %v2692_v40 }
 0x664   :  { %v2698_v21 = vpack.c.bf16 %v2694_v1, %v2693_v26  ;;  %v2683_v10 = vpack.c.bf16 %v4622_v25, %v4622_v25  ;;  %v4624_v43 = vpop.eup %4623 }
 0x665   :  { %v2738_v3 = vpack.c.bf16 %v4624_v43, %v4624_v43  ;;  %v2707_v5 = vunpack.c.h.bf16 %v2697_v13  ;;  %v2708_v39 = vunpack.c.l.bf16 %v2697_v13 }
 0x666   :  { %v4626_v47 = vpop.eup %4625  ;;  %v2714_v59 = vunpack.c.h.bf16 %v2698_v21  ;;  %v2715_v49 = vunpack.c.l.bf16 %v2698_v21  ;;  %v2689_v12 = vunpack.c.l.bf16 %v2683_v10 }
 0x667   :  { %v4628_v50 = vpop.eup %4627  ;;  %v2703_v18 = vmul.f32 %v4626_v47, %v5690_v37  ;;  %v2754_v60 = vunpack.c.l.bf16 %v2738_v3 }
 0x668   :  { %v2705_v4 = vmul.f32 %v4628_v50, %v5692_v16  ;;  %4631 = vrcp.f32 %v2714_v59  ;;  %v4630_v51 = vpop.eup %4629  ;;  %v2695_v44 = vadd.f32 1.0, %v2689_v12 }
 0x669   :  { %4633 = vrcp.f32 %v2715_v49  ;;  %v2739_v48 = vpack.c.bf16 %v4630_v51, %v4630_v51 }
 0x66a   :  { %v2706_v29 = vpack.c.bf16 %v2703_v18, %v2705_v4  ;;  %v2699_v21 = vpack.c.bf16 %v2695_v44, %v2695_v44  ;;  %4635 = vrcp.f32 %v2707_v5 }
 0x66b   :  { %4637 = vrcp.f32 %v2708_v39  ;;  %v2755_v59 = vunpack.c.l.bf16 %v2739_v48 }
 0x66c   :  { %v2744_v15 = vrot.slane %v2706_v29, 4  ;;  %v2752_v58 = vunpack.c.l.bf16 %v2706_v29  ;;  %v2721_v50 = vunpack.c.h.bf16 %v2699_v21  ;;  %v2722_v3 = vunpack.c.l.bf16 %v2699_v21 }
 0x66e   :  { %v4632_v8 = vpop.eup %4631  ;;  %v2748_v61 = vunpack.c.l.bf16 %v2744_v15  ;;  %v2756_v19 = vmul.f32 %v2754_v60, %v2752_v58  ;;  %4639 = vrcp.f32 %v2721_v50 }
 0x66f   :  { %v4634_v26 = vpop.eup %4633  ;;  %v2717_v1 = vmul.f32 %v4632_v8, %v5690_v37  ;;  %4641 = vrcp.f32 %v2722_v3 }
 0x670   :  { %v2758_v25 = vpack.c.bf16 %v2756_v19, %v2756_v19  ;;  %v2719_v10 = vmul.f32 %v4634_v26, %v5692_v16  ;;  %v2750_v43 = vmul.f32 %v2748_v61, %v6048_v38  ;;  %v4636_v51 = vpop.eup %4635 }
 0x671   :  { %v4638_v15 = vpop.eup %4637  ;;  %v2710_v5 = vmul.f32 %v4636_v51, %v5690_v37 }
 0x672   :  { %v2760_v40 = vunpack.c.l.bf16 %v2758_v25  ;;  %v2720_v47 = vpack.c.bf16 %v2717_v1, %v2719_v10  ;;  %v2712_v8 = vmul.f32 %v4638_v15, %v5692_v16 }
 0x674   :  { %v6116_v49 = vadd.f32 %v2760_v40, %v2750_v43  ;;  %v2745_v18 = vrot.slane %v2720_v47, 4  ;;  %v2753_v4 = vunpack.c.l.bf16 %v2720_v47  ;;  %v4640_v61 = vpop.eup %4639  ;;  %v2713_v1 = vpack.c.bf16 %v2710_v5, %v2712_v8 }
 0x675   :  { %v4642_v26 = vpop.eup %4641  ;;  %v2724_v43 = vmul.f32 %v4640_v61, %v5690_v37 }
 0x676   :  { %v2764_v12 = vpack.c.bf16 %v6116_v49, %v6116_v49  ;;  %v2749_v13 = vunpack.c.l.bf16 %v2745_v18  ;;  %v2757_v29 = vmul.f32 %v2755_v59, %v2753_v4  ;;  %v2772_v10 = vunpack.c.l.bf16 %v2713_v1 }
 0x677   :  { %v2726_v40 = vmul.f32 %v4642_v26, %v5692_v16  ;;  %v2789_v4 = vstv %s4241_s27  ;;  %v6581_v26 = vld [vmem:[#allocation49_spill] sm:$0xff] }
 0x678   :  { %v2766_v58 = vunpack.c.l.bf16 %v2764_v12  ;;  %v2759_v60 = vpack.c.bf16 %v2757_v29, %v2757_v29  ;;  %v2751_v38 = vmul.f32 %v2749_v13, %v6055_v42 }
 0x679   :  { %v2727_v50 = vpack.c.bf16 %v2724_v43, %v2726_v40 }
 0x67a   :  { %4643 = vtanh.f32 %v2766_v58  ;;  %v2761_v44 = vunpack.c.l.bf16 %v2759_v60 }
 0x67b   :  { %v2773_v29 = vunpack.c.l.bf16 %v2727_v50 }
 0x67c   :  { %v6123_v39 = vadd.f32 %v2761_v44, %v2751_v38 }
 0x67e   :  { %v2765_v19 = vpack.c.bf16 %v6123_v39, %v6123_v39 }
 0x680   :  { %v4644_v48 = vpop.eup %4643  ;;  %v2767_v25 = vunpack.c.l.bf16 %v2765_v19  ;;  %v6580_v19 = vld [vmem:[#allocation9_spill] sm:$0xff] }
 0x681   :  { %v2770_v21 = vpack.c.bf16 %v4644_v48, %v4644_v48  ;;  %v686_v1 = vadd.f32 %v6581_v26, %v6580_v19  ;;  %v6582_v48 = vld [vmem:[#allocation10_spill] sm:$0xff] }
 0x682   :  { %4645 = vtanh.f32 %v2767_v25  ;;  %v6583_v25 = vld [vmem:[#allocation50_spill] sm:$0xff] }
 0x683   :  { %v2774_v42 = vunpack.c.l.bf16 %v2770_v21  ;;  %v700_v21 = vadd.f32 %v6583_v25, %v6582_v48 }
 0x685   :  { %v2776_v47 = vmul.f32 %v2774_v42, %v2772_v10  ;;  %v6584_v10 = vld [vmem:[#allocation48_spill] sm:$0xff] }
 0x686   :  { %v2864_v42 = vunpack.c.l.bf16 %v6584_v10  ;;  %v2865_v43 = vunpack.c.h.bf16 %v6584_v10 }
 0x687   :  { %v2778_v59 = vpack.c.bf16 %v2776_v47, %v2776_v47 }
 0x688   :  { %v4646_v18 = vpop.eup %4645 }
 0x689   :  { %v2787_v3 = vunpack.c.l.bf16 %v2778_v59  ;;  %v2771_v12 = vpack.c.bf16 %v4646_v18, %v4646_v18  ;;  %v732_v18 = vpack.c.bf16 %v700_v21, %v686_v1 }
 0x68b   :  { %v2790_v13 = vmul.f32 %v2789_v4, %v2787_v3  ;;  %v2775_v51 = vunpack.c.l.bf16 %v2771_v12  ;;  %v6585_v12 = vld [vmem:[#allocation11_spill] sm:$0xff]  ;;  %v2868_v48 = vunpack.c.l.bf16 %v732_v18 }
 0x68d   :  { %v6130_v15 = vadd.f32 %v2790_v13, %v6062_v6  ;;  %v2777_v58 = vmul.f32 %v2775_v51, %v2773_v29  ;;  %v6578_v6 = vld [vmem:[#allocation26_spill] sm:$0xff]  ;;  %v6586_v13 = vld [vmem:[#allocation52_spill] sm:$0xff] }
 0x68e   :  { %v714_v29 = vadd.f32 %v6586_v13, %v6585_v12  ;;  %v6587_v51 = vld [vmem:[#allocation12_spill] sm:$0xff] }
 0x68f   :  { %v2779_v60 = vpack.c.bf16 %v2777_v58, %v2777_v58  ;;  %v4364_v38 = vpack.c.bf16 %v2777_v58, %v2776_v47  ;;  %v6588_v58 = vld [vmem:[#allocation53_spill] sm:$0xff] }
 0x691   :  { %v2788_v44 = vunpack.c.l.bf16 %v2779_v60  ;;  %4365 = vst [vmem:[#allocation3] sm:$0xff] %v4364_v38   ;;  %v728_v60 = vadd.f32 %v6588_v58, %v6587_v51  ;;  %v6589_v38 = vld [vmem:[#allocation51_spill] sm:$0xff] }
 0x693   :  { %v2791_v5 = vmul.f32 %v2789_v4, %v2788_v44  ;;  %v2866_v44 = vunpack.c.l.bf16 %v6589_v38  ;;  %v733_v13 = vpack.c.bf16 %v728_v60, %v714_v29 }
 0x695   :  { %v6133_v8 = vadd.f32 %v2791_v5, %v6065_v41  ;;  %v6579_v41 = vld [vmem:[#allocation27_spill] sm:$0xff]  ;;  %v2867_v5 = vunpack.c.h.bf16 %v6589_v38  ;;  %v2870_v19 = vunpack.c.l.bf16 %v733_v13 }
 0x698   :  { %v4326_v61 = vld [vmem:[#allocation3] sm:$0xff] }
 0x699   :  { %2816 = vmatmul.bf16.vlgmr.msrb.gmra.mxu0 %v4326_v61  ;;  %2830 = vmatmul.bf16.vlgmr.msrb.gmra.mxu1 %v4326_v61 }
 0x69a   :  { %2844 = vmatmul.bf16.vlgmr.msrb.gmra.mxu2 %v4326_v61  ;;  %2858 = vmatmul.bf16.vlgmr.msrb.gmra.mxu3 %v4326_v61 }
 0x69b   :  { %3260 = vmatpush.bf16.msrb.mxu0 %v5183_v27  ;;  %3274 = vmatpush.bf16.msrb.mxu1 %v5186_v30 }
 0x69c   :  { %3288 = vmatpush.bf16.msrb.mxu2 %v5195_v34  ;;  %3302 = vmatpush.bf16.msrb.mxu3 %v5197_v35 }
 0x69f   :  { %3261 = vmatpush.bf16.msrb.mxu0 %v5223_v45  ;;  %3275 = vmatpush.bf16.msrb.mxu1 %v5227_v46 }
 0x6a0   :  { %3289 = vmatpush.bf16.msrb.mxu2 %v5237_v52  ;;  %3303 = vmatpush.bf16.msrb.mxu3 %v5239_v53 }
 0x6a3   :  { %3262 = vmatpush.bf16.msrb.mxu0 %v5263_v2  ;;  %3276 = vmatpush.bf16.msrb.mxu1 %v5269_v7 }
 0x6a4   :  { %3290 = vmatpush.bf16.msrb.mxu2 %v5279_v11  ;;  %3304 = vmatpush.bf16.msrb.mxu3 %v5281_v14 }
 0x6a7   :  { %3263 = vmatpush.bf16.msrb.mxu0 %v5304_v23  ;;  %3277 = vmatpush.bf16.msrb.mxu1 %v5307_v24 }
 0x6a8   :  { %3291 = vmatpush.bf16.msrb.mxu2 %v5320_v31  ;;  %3305 = vmatpush.bf16.msrb.mxu3 %v5322_v32 }
 0x6ab   :  { %3264 = vmatpush.bf16.msrb.mxu0 %v5347_v54  ;;  %3278 = vmatpush.bf16.msrb.mxu1 %v5351_v57 }
 0x6ac   :  { %3292 = vmatpush.bf16.msrb.mxu2 %v5362_v63  ;;  %3306 = vmatpush.bf16.msrb.mxu3 %v5364_v0 }
 0x6af   :  { %3265 = vmatpush.bf16.msrb.mxu0 %v5390_v20  ;;  %3279 = vmatpush.bf16.msrb.mxu1 %v5394_v22 }
 0x6b0   :  { %3293 = vmatpush.bf16.msrb.mxu2 %v5404_v33  ;;  %3307 = vmatpush.bf16.msrb.mxu3 %v5406_v36 }
 0x6b3   :  { %3266 = vmatpush.bf16.msrb.mxu0 %v5430_v62  ;;  %3280 = vmatpush.bf16.msrb.mxu1 %v5436_v9 }
 0x6b4   :  { %3294 = vmatpush.bf16.msrb.mxu2 %v5446_v17  ;;  %3308 = vmatpush.bf16.msrb.mxu3 %v5448_v28 }
 0x6b7   :  { %3267 = vmatpush.bf16.msrb.mxu0 %v5471_v55  ;;  %3281 = vmatpush.bf16.msrb.mxu1 %v5474_v56 }
 0x6b8   :  { %3295 = vmatpush.bf16.msrb.mxu2 %v6578_v6  ;;  %3309 = vmatpush.bf16.msrb.mxu3 %v6579_v41  ;;  %v2871_v41 = vunpack.c.h.bf16 %v733_v13 }
 0x716   :  { %v2817_v40 = vpop.f32.mrf.mxu0  ;;  %v2831_v47 = vpop.f32.mrf.mxu1 }
 0x717   :  { %v2872_v59 = vadd.f32 %v2864_v42, %v2817_v40  ;;  %v2873_v50 = vadd.f32 %v2865_v43, %v2831_v47  ;;  %v2869_v42 = vunpack.c.h.bf16 %v732_v18 }
 0x719   :  { %v2880_v4 = vpack.c.bf16 %v2873_v50, %v2872_v59 }
 0x71b   :  { %v2884_v3 = vxor.u32 2147516416, %v2880_v4 }
 0x71d   :  { %v2888_v61 = vunpack.c.l.bf16 %v2884_v3  ;;  %v2889_v26 = vunpack.c.h.bf16 %v2884_v3  ;;  %v2845_v25 = vpop.f32.mrf.mxu2  ;;  %v2859_v10 = vpop.f32.mrf.mxu3 }
 0x71e   :  { %v2874_v43 = vadd.f32 %v2866_v44, %v2845_v25  ;;  %v2875_v1 = vadd.f32 %v2867_v5, %v2859_v10  ;;  %v2819_v21 = vpop.f32.mrf.mxu0  ;;  %v2833_v40 = vpop.f32.mrf.mxu1 }
 0x71f   :  { %v2894_v47 = vmul.f32 1.442695, %v2888_v61  ;;  %v2896_v59 = vmul.f32 1.442695, %v2889_v26  ;;  %v2876_v50 = vadd.f32 %v2868_v48, %v2819_v21  ;;  %v2877_v4 = vadd.f32 %v2869_v42, %v2833_v40 }
 0x720   :  { %v2881_v58 = vpack.c.bf16 %v2875_v1, %v2874_v43 }
 0x721   :  { %4647 = vpow2.f32 %v2894_v47  ;;  %v2882_v51 = vpack.c.bf16 %v2877_v4, %v2876_v50 }
 0x722   :  { %4649 = vpow2.f32 %v2896_v59  ;;  %v2885_v38 = vxor.u32 2147516416, %v2881_v58  ;;  %v2956_v1 = vrot.slane %v2881_v58, 4 }
 0x723   :  { %v2886_v12 = vxor.u32 2147516416, %v2882_v51 }
 0x724   :  { %v2890_v3 = vunpack.c.l.bf16 %v2885_v38  ;;  %v2960_v4 = vunpack.c.l.bf16 %v2956_v1 }
 0x725   :  { %v2891_v6 = vunpack.c.l.bf16 %v2886_v12  ;;  %v2892_v18 = vunpack.c.h.bf16 %v2886_v12  ;;  %v2847_v44 = vpop.f32.mrf.mxu2  ;;  %v2861_v5 = vpop.f32.mrf.mxu3 }
 0x726   :  { %v2898_v25 = vmul.f32 1.442695, %v2890_v3  ;;  %v2878_v10 = vadd.f32 %v2870_v19, %v2847_v44  ;;  %v2879_v61 = vadd.f32 %v2871_v41, %v2861_v5 }
 0x727   :  { %v4648_v26 = vpop.eup %4647  ;;  %v2900_v48 = vmul.f32 1.442695, %v2891_v6  ;;  %v2902_v42 = vmul.f32 1.442695, %v2892_v18 }
 0x728   :  { %v4650_v29 = vpop.eup %4649  ;;  %4651 = vpow2.f32 %v2898_v25  ;;  %v2883_v60 = vpack.c.bf16 %v2879_v61, %v2878_v10 }
 0x729   :  { %v2906_v43 = vpack.c.bf16 %v4650_v29, %v4648_v26  ;;  %4653 = vpow2.f32 %v2900_v48 }
 0x72a   :  { %4655 = vpow2.f32 %v2902_v42  ;;  %v2887_v51 = vxor.u32 2147516416, %v2883_v60  ;;  %v2957_v5 = vrot.slane %v2883_v60, 4 }
 0x72b   :  { %v2910_v21 = vunpack.c.l.bf16 %v2906_v43  ;;  %v2911_v40 = vunpack.c.h.bf16 %v2906_v43 }
 0x72c   :  { %v2893_v47 = vunpack.c.l.bf16 %v2887_v51  ;;  %v2961_v48 = vunpack.c.l.bf16 %v2957_v5 }
 0x72d   :  { %v2916_v12 = vadd.f32 1.0, %v2910_v21  ;;  %v2917_v59 = vadd.f32 1.0, %v2911_v40 }
 0x72e   :  { %v4652_v50 = vpop.eup %4651  ;;  %v2904_v19 = vmul.f32 1.442695, %v2893_v47 }
 0x72f   :  { %v4654_v41 = vpop.eup %4653  ;;  %v2922_v13 = vpack.c.bf16 %v2917_v59, %v2916_v12  ;;  %v2907_v38 = vpack.c.bf16 %v4652_v50, %v4652_v50 }
 0x730   :  { %v4656_v6 = vpop.eup %4655  ;;  %4657 = vpow2.f32 %v2904_v19 }
 0x731   :  { %v2926_v3 = vunpack.c.h.bf16 %v2922_v13  ;;  %v2927_v18 = vunpack.c.l.bf16 %v2922_v13  ;;  %v2908_v44 = vpack.c.bf16 %v4656_v6, %v4654_v41  ;;  %4659 = vtanh.f32 %v2960_v4 }
 0x732   :  { %v2912_v10 = vunpack.c.l.bf16 %v2907_v38 }
 0x733   :  { %4661 = vrcp.f32 %v2926_v3  ;;  %v2913_v58 = vunpack.c.l.bf16 %v2908_v44  ;;  %v2914_v25 = vunpack.c.h.bf16 %v2908_v44 }
 0x734   :  { %4663 = vrcp.f32 %v2927_v18  ;;  %v2918_v51 = vadd.f32 1.0, %v2912_v10 }
 0x735   :  { %v2919_v61 = vadd.f32 1.0, %v2913_v58  ;;  %v2920_v26 = vadd.f32 1.0, %v2914_v25  ;;  %4665 = vtanh.f32 %v2961_v48 }
 0x736   :  { %v4658_v42 = vpop.eup %4657  ;;  %v2923_v19 = vpack.c.bf16 %v2918_v51, %v2918_v51 }
 0x737   :  { %v2924_v29 = vpack.c.bf16 %v2920_v26, %v2919_v61  ;;  %v2909_v43 = vpack.c.bf16 %v4658_v42, %v4658_v42  ;;  %v4660_v1 = vpop.eup %4659 }
 0x738   :  { %v2964_v50 = vpack.c.bf16 %v4660_v1, %v4660_v1  ;;  %v2933_v44 = vunpack.c.h.bf16 %v2923_v19  ;;  %v2934_v58 = vunpack.c.l.bf16 %v2923_v19 }
 0x739   :  { %v4662_v21 = vpop.eup %4661  ;;  %v2940_v40 = vunpack.c.h.bf16 %v2924_v29  ;;  %v2941_v47 = vunpack.c.l.bf16 %v2924_v29  ;;  %v2915_v4 = vunpack.c.l.bf16 %v2909_v43 }
 0x73a   :  { %v4664_v12 = vpop.eup %4663  ;;  %v2929_v60 = vmul.f32 %v4662_v21, %v5690_v37  ;;  %v2980_v3 = vunpack.c.l.bf16 %v2964_v50 }
 0x73b   :  { %v2931_v59 = vmul.f32 %v4664_v12, %v5692_v16  ;;  %4667 = vrcp.f32 %v2940_v40  ;;  %v4666_v13 = vpop.eup %4665  ;;  %v2921_v18 = vadd.f32 1.0, %v2915_v4 }
 0x73c   :  { %4669 = vrcp.f32 %v2941_v47  ;;  %v2965_v48 = vpack.c.bf16 %v4666_v13, %v4666_v13 }
 0x73d   :  { %v2932_v41 = vpack.c.bf16 %v2929_v60, %v2931_v59  ;;  %v2925_v29 = vpack.c.bf16 %v2921_v18, %v2921_v18  ;;  %4671 = vrcp.f32 %v2933_v44 }
 0x73e   :  { %4673 = vrcp.f32 %v2934_v58  ;;  %v2981_v40 = vunpack.c.l.bf16 %v2965_v48 }
 0x73f   :  { %v2970_v6 = vrot.slane %v2932_v41, 4  ;;  %v2978_v38 = vunpack.c.l.bf16 %v2932_v41  ;;  %v2947_v12 = vunpack.c.h.bf16 %v2925_v29  ;;  %v2948_v50 = vunpack.c.l.bf16 %v2925_v29 }
 0x741   :  { %v4668_v5 = vpop.eup %4667  ;;  %v2974_v25 = vunpack.c.l.bf16 %v2970_v6  ;;  %v2982_v10 = vmul.f32 %v2980_v3, %v2978_v38  ;;  %4675 = vrcp.f32 %v2947_v12 }
 0x742   :  { %v4670_v61 = vpop.eup %4669  ;;  %v2943_v26 = vmul.f32 %v4668_v5, %v5690_v37  ;;  %4677 = vrcp.f32 %v2948_v50 }
 0x743   :  { %v2984_v42 = vpack.c.bf16 %v2982_v10, %v2982_v10  ;;  %v2945_v43 = vmul.f32 %v4670_v61, %v5692_v16  ;;  %v2976_v1 = vmul.f32 %v2974_v25, %v6116_v49  ;;  %v4672_v13 = vpop.eup %4671 }
 0x744   :  { %v4674_v6 = vpop.eup %4673  ;;  %v2936_v44 = vmul.f32 %v4672_v13, %v5690_v37 }
 0x745   :  { %v2986_v51 = vunpack.c.l.bf16 %v2984_v42  ;;  %v2946_v21 = vpack.c.bf16 %v2943_v26, %v2945_v43  ;;  %v2938_v5 = vmul.f32 %v4674_v6, %v5692_v16 }
 0x747   :  { %v6184_v47 = vadd.f32 %v2986_v51, %v2976_v1  ;;  %v2971_v60 = vrot.slane %v2946_v21, 4  ;;  %v2979_v59 = vunpack.c.l.bf16 %v2946_v21  ;;  %v4676_v25 = vpop.eup %4675  ;;  %v2939_v26 = vpack.c.bf16 %v2936_v44, %v2938_v5 }
 0x748   :  { %v4678_v61 = vpop.eup %4677  ;;  %v2950_v1 = vmul.f32 %v4676_v25, %v5690_v37 }
 0x749   :  { %v2990_v4 = vpack.c.bf16 %v6184_v47, %v6184_v47  ;;  %v2975_v19 = vunpack.c.l.bf16 %v2971_v60  ;;  %v2983_v41 = vmul.f32 %v2981_v40, %v2979_v59  ;;  %v2998_v43 = vunpack.c.l.bf16 %v2939_v26 }
 0x74a   :  { %v2952_v51 = vmul.f32 %v4678_v61, %v5692_v16  ;;  %v3015_v59 = vstv %s4246_s28  ;;  %v6593_v61 = vld [vmem:[#allocation55_spill] sm:$0xff] }
 0x74b   :  { %v2992_v38 = vunpack.c.l.bf16 %v2990_v4  ;;  %v2985_v3 = vpack.c.bf16 %v2983_v41, %v2983_v41  ;;  %v2977_v49 = vmul.f32 %v2975_v19, %v6123_v39 }
 0x74c   :  { %v2953_v12 = vpack.c.bf16 %v2950_v1, %v2952_v51 }
 0x74d   :  { %4679 = vtanh.f32 %v2992_v38  ;;  %v2987_v18 = vunpack.c.l.bf16 %v2985_v3 }
 0x74e   :  { %v2999_v41 = vunpack.c.l.bf16 %v2953_v12 }
 0x74f   :  { %v6191_v58 = vadd.f32 %v2987_v18, %v2977_v49 }
 0x751   :  { %v2991_v10 = vpack.c.bf16 %v6191_v58, %v6191_v58 }
 0x753   :  { %v4680_v48 = vpop.eup %4679  ;;  %v2993_v42 = vunpack.c.l.bf16 %v2991_v10  ;;  %v6592_v10 = vld [vmem:[#allocation9_spill] sm:$0xff] }
 0x754   :  { %v2996_v29 = vpack.c.bf16 %v4680_v48, %v4680_v48  ;;  %v762_v26 = vadd.f32 %v6593_v61, %v6592_v10  ;;  %v6594_v48 = vld [vmem:[#allocation10_spill] sm:$0xff] }
 0x755   :  { %4681 = vtanh.f32 %v2993_v42  ;;  %v6595_v42 = vld [vmem:[#allocation56_spill] sm:$0xff] }
 0x756   :  { %v3000_v39 = vunpack.c.l.bf16 %v2996_v29  ;;  %v776_v29 = vadd.f32 %v6595_v42, %v6594_v48 }
 0x758   :  { %v3002_v21 = vmul.f32 %v3000_v39, %v2998_v43  ;;  %v6596_v43 = vld [vmem:[#allocation54_spill] sm:$0xff] }
 0x759   :  { %v3090_v39 = vunpack.c.l.bf16 %v6596_v43  ;;  %v3091_v1 = vunpack.c.h.bf16 %v6596_v43 }
 0x75a   :  { %v3004_v40 = vpack.c.bf16 %v3002_v21, %v3002_v21 }
 0x75b   :  { %v4682_v60 = vpop.eup %4681 }
 0x75c   :  { %v3013_v50 = vunpack.c.l.bf16 %v3004_v40  ;;  %v2997_v4 = vpack.c.bf16 %v4682_v60, %v4682_v60  ;;  %v808_v60 = vpack.c.bf16 %v776_v29, %v762_v26 }
 0x75e   :  { %v3016_v19 = vmul.f32 %v3015_v59, %v3013_v50  ;;  %v3001_v13 = vunpack.c.l.bf16 %v2997_v4  ;;  %v6597_v4 = vld [vmem:[#allocation11_spill] sm:$0xff]  ;;  %v3094_v48 = vunpack.c.l.bf16 %v808_v60 }
 0x760   :  { %v6198_v6 = vadd.f32 %v3016_v19, %v6130_v15  ;;  %v3003_v38 = vmul.f32 %v3001_v13, %v2999_v41  ;;  %v6590_v15 = vld [vmem:[#allocation26_spill] sm:$0xff]  ;;  %v6599_v13 = vld [vmem:[#allocation12_spill] sm:$0xff] }
 0x761   :  { %v6598_v19 = vld [vmem:[#allocation58_spill] sm:$0xff] }
 0x762   :  { %v3005_v3 = vpack.c.bf16 %v3003_v38, %v3003_v38  ;;  %v4369_v49 = vpack.c.bf16 %v3003_v38, %v3002_v21  ;;  %v790_v41 = vadd.f32 %v6598_v19, %v6597_v4  ;;  %v6600_v38 = vld [vmem:[#allocation59_spill] sm:$0xff] }
 0x764   :  { %v3014_v18 = vunpack.c.l.bf16 %v3005_v3  ;;  %4370 = vst [vmem:[#allocation3] sm:$0xff] %v4369_v49   ;;  %v804_v3 = vadd.f32 %v6600_v38, %v6599_v13  ;;  %v6601_v49 = vld [vmem:[#allocation57_spill] sm:$0xff] }
 0x766   :  { %v3017_v44 = vmul.f32 %v3015_v59, %v3014_v18  ;;  %v3092_v18 = vunpack.c.l.bf16 %v6601_v49  ;;  %v809_v19 = vpack.c.bf16 %v804_v3, %v790_v41 }
 0x768   :  { %v6201_v5 = vadd.f32 %v3017_v44, %v6133_v8  ;;  %v6591_v8 = vld [vmem:[#allocation27_spill] sm:$0xff]  ;;  %v3093_v44 = vunpack.c.h.bf16 %v6601_v49  ;;  %v3096_v10 = vunpack.c.l.bf16 %v809_v19 }
 0x76b   :  { %v4327_v25 = vld [vmem:[#allocation3] sm:$0xff] }
 0x76c   :  { %3042 = vmatmul.bf16.vlgmr.msra.gmra.mxu0 %v4327_v25  ;;  %3056 = vmatmul.bf16.vlgmr.msra.gmra.mxu1 %v4327_v25 }
 0x76d   :  { %3070 = vmatmul.bf16.vlgmr.msra.gmra.mxu2 %v4327_v25  ;;  %3084 = vmatmul.bf16.vlgmr.msra.gmra.mxu3 %v4327_v25 }
 0x76e   :  { %3486 = vmatpush.bf16.msra.mxu0 %v5183_v27  ;;  %3500 = vmatpush.bf16.msra.mxu1 %v5186_v30 }
 0x76f   :  { %3514 = vmatpush.bf16.msra.mxu2 %v5195_v34  ;;  %3528 = vmatpush.bf16.msra.mxu3 %v5197_v35 }
 0x772   :  { %3487 = vmatpush.bf16.msra.mxu0 %v5223_v45  ;;  %3501 = vmatpush.bf16.msra.mxu1 %v5227_v46 }
 0x773   :  { %3515 = vmatpush.bf16.msra.mxu2 %v5237_v52  ;;  %3529 = vmatpush.bf16.msra.mxu3 %v5239_v53 }
 0x776   :  { %3488 = vmatpush.bf16.msra.mxu0 %v5263_v2  ;;  %3502 = vmatpush.bf16.msra.mxu1 %v5269_v7 }
 0x777   :  { %3516 = vmatpush.bf16.msra.mxu2 %v5279_v11  ;;  %3530 = vmatpush.bf16.msra.mxu3 %v5281_v14 }
 0x77a   :  { %3489 = vmatpush.bf16.msra.mxu0 %v5304_v23  ;;  %3503 = vmatpush.bf16.msra.mxu1 %v5307_v24 }
 0x77b   :  { %3517 = vmatpush.bf16.msra.mxu2 %v5320_v31  ;;  %3531 = vmatpush.bf16.msra.mxu3 %v5322_v32 }
 0x77e   :  { %3490 = vmatpush.bf16.msra.mxu0 %v5347_v54  ;;  %3504 = vmatpush.bf16.msra.mxu1 %v5351_v57 }
 0x77f   :  { %3518 = vmatpush.bf16.msra.mxu2 %v5362_v63  ;;  %3532 = vmatpush.bf16.msra.mxu3 %v5364_v0 }
 0x782   :  { %3491 = vmatpush.bf16.msra.mxu0 %v5390_v20  ;;  %3505 = vmatpush.bf16.msra.mxu1 %v5394_v22 }
 0x783   :  { %3519 = vmatpush.bf16.msra.mxu2 %v5404_v33  ;;  %3533 = vmatpush.bf16.msra.mxu3 %v5406_v36 }
 0x786   :  { %3492 = vmatpush.bf16.msra.mxu0 %v5430_v62  ;;  %3506 = vmatpush.bf16.msra.mxu1 %v5436_v9 }
 0x787   :  { %3520 = vmatpush.bf16.msra.mxu2 %v5446_v17  ;;  %3534 = vmatpush.bf16.msra.mxu3 %v5448_v28 }
 0x78a   :  { %3493 = vmatpush.bf16.msra.mxu0 %v5471_v55  ;;  %3507 = vmatpush.bf16.msra.mxu1 %v5474_v56 }
 0x78b   :  { %3521 = vmatpush.bf16.msra.mxu2 %v6590_v15  ;;  %3535 = vmatpush.bf16.msra.mxu3 %v6591_v8  ;;  %v3097_v8 = vunpack.c.h.bf16 %v809_v19 }
 0x7e9   :  { %v3043_v51 = vpop.f32.mrf.mxu0  ;;  %v3057_v21 = vpop.f32.mrf.mxu1 }
 0x7ea   :  { %v3098_v40 = vadd.f32 %v3090_v39, %v3043_v51  ;;  %v3099_v12 = vadd.f32 %v3091_v1, %v3057_v21  ;;  %v3095_v39 = vunpack.c.h.bf16 %v808_v60 }
 0x7ec   :  { %v3106_v59 = vpack.c.bf16 %v3099_v12, %v3098_v40 }
 0x7ee   :  { %v3110_v50 = vxor.u32 2147516416, %v3106_v59 }
 0x7f0   :  { %v3114_v25 = vunpack.c.l.bf16 %v3110_v50  ;;  %v3115_v61 = vunpack.c.h.bf16 %v3110_v50  ;;  %v3071_v42 = vpop.f32.mrf.mxu2  ;;  %v3085_v43 = vpop.f32.mrf.mxu3 }
 0x7f1   :  { %v3100_v1 = vadd.f32 %v3092_v18, %v3071_v42  ;;  %v3101_v26 = vadd.f32 %v3093_v44, %v3085_v43  ;;  %v3045_v29 = vpop.f32.mrf.mxu0  ;;  %v3059_v51 = vpop.f32.mrf.mxu1 }
 0x7f2   :  { %v3120_v21 = vmul.f32 1.442695, %v3114_v25  ;;  %v3122_v40 = vmul.f32 1.442695, %v3115_v61  ;;  %v3102_v12 = vadd.f32 %v3094_v48, %v3045_v29  ;;  %v3103_v59 = vadd.f32 %v3095_v39, %v3059_v51 }
 0x7f3   :  { %v3107_v38 = vpack.c.bf16 %v3101_v26, %v3100_v1 }
 0x7f4   :  { %4683 = vpow2.f32 %v3120_v21  ;;  %v3108_v13 = vpack.c.bf16 %v3103_v59, %v3102_v12 }
 0x7f5   :  { %4685 = vpow2.f32 %v3122_v40  ;;  %v3111_v49 = vxor.u32 2147516416, %v3107_v38  ;;  %v3182_v26 = vrot.slane %v3107_v38, 4 }
 0x7f6   :  { %v3112_v4 = vxor.u32 2147516416, %v3108_v13 }
 0x7f7   :  { %v3116_v50 = vunpack.c.l.bf16 %v3111_v49  ;;  %v3186_v59 = vunpack.c.l.bf16 %v3182_v26 }
 0x7f8   :  { %v3117_v15 = vunpack.c.l.bf16 %v3112_v4  ;;  %v3118_v60 = vunpack.c.h.bf16 %v3112_v4  ;;  %v3073_v18 = vpop.f32.mrf.mxu2  ;;  %v3087_v44 = vpop.f32.mrf.mxu3 }
 0x7f9   :  { %v3124_v42 = vmul.f32 1.442695, %v3116_v50  ;;  %v3104_v43 = vadd.f32 %v3096_v10, %v3073_v18  ;;  %v3105_v25 = vadd.f32 %v3097_v8, %v3087_v44 }
 0x7fa   :  { %v4684_v61 = vpop.eup %4683  ;;  %v3126_v48 = vmul.f32 1.442695, %v3117_v15  ;;  %v3128_v39 = vmul.f32 1.442695, %v3118_v60 }
 0x7fb   :  { %v4686_v41 = vpop.eup %4685  ;;  %4687 = vpow2.f32 %v3124_v42  ;;  %v3109_v3 = vpack.c.bf16 %v3105_v25, %v3104_v43 }
 0x7fc   :  { %v3132_v1 = vpack.c.bf16 %v4686_v41, %v4684_v61  ;;  %4689 = vpow2.f32 %v3126_v48 }
 0x7fd   :  { %4691 = vpow2.f32 %v3128_v39  ;;  %v3113_v13 = vxor.u32 2147516416, %v3109_v3  ;;  %v3183_v44 = vrot.slane %v3109_v3, 4 }
 0x7fe   :  { %v3136_v29 = vunpack.c.l.bf16 %v3132_v1  ;;  %v3137_v51 = vunpack.c.h.bf16 %v3132_v1 }
 0x7ff   :  { %v3119_v21 = vunpack.c.l.bf16 %v3113_v13  ;;  %v3187_v48 = vunpack.c.l.bf16 %v3183_v44 }
 0x800   :  { %v3142_v4 = vadd.f32 1.0, %v3136_v29  ;;  %v3143_v40 = vadd.f32 1.0, %v3137_v51 }
 0x801   :  { %v4688_v12 = vpop.eup %4687  ;;  %v3130_v10 = vmul.f32 1.442695, %v3119_v21 }
 0x802   :  { %v4690_v8 = vpop.eup %4689  ;;  %v3148_v19 = vpack.c.bf16 %v3143_v40, %v3142_v4  ;;  %v3133_v49 = vpack.c.bf16 %v4688_v12, %v4688_v12 }
 0x803   :  { %v4692_v15 = vpop.eup %4691  ;;  %4693 = vpow2.f32 %v3130_v10 }
 0x804   :  { %v3152_v50 = vunpack.c.h.bf16 %v3148_v19  ;;  %v3153_v60 = vunpack.c.l.bf16 %v3148_v19  ;;  %v3134_v18 = vpack.c.bf16 %v4692_v15, %v4690_v8  ;;  %4695 = vtanh.f32 %v3186_v59 }
 0x805   :  { %v3138_v43 = vunpack.c.l.bf16 %v3133_v49 }
 0x806   :  { %4697 = vrcp.f32 %v3152_v50  ;;  %v3139_v38 = vunpack.c.l.bf16 %v3134_v18  ;;  %v3140_v42 = vunpack.c.h.bf16 %v3134_v18 }
 0x807   :  { %4699 = vrcp.f32 %v3153_v60  ;;  %v3144_v13 = vadd.f32 1.0, %v3138_v43 }
 0x808   :  { %v3145_v25 = vadd.f32 1.0, %v3139_v38  ;;  %v3146_v61 = vadd.f32 1.0, %v3140_v42  ;;  %4701 = vtanh.f32 %v3187_v48 }
 0x809   :  { %v4694_v39 = vpop.eup %4693  ;;  %v3149_v10 = vpack.c.bf16 %v3144_v13, %v3144_v13 }
 0x80a   :  { %v3150_v41 = vpack.c.bf16 %v3146_v61, %v3145_v25  ;;  %v3135_v1 = vpack.c.bf16 %v4694_v39, %v4694_v39  ;;  %v4696_v26 = vpop.eup %4695 }
 0x80b   :  { %v3190_v12 = vpack.c.bf16 %v4696_v26, %v4696_v26  ;;  %v3159_v18 = vunpack.c.h.bf16 %v3149_v10  ;;  %v3160_v38 = vunpack.c.l.bf16 %v3149_v10 }
 0x80c   :  { %v4698_v29 = vpop.eup %4697  ;;  %v3166_v51 = vunpack.c.h.bf16 %v3150_v41  ;;  %v3167_v21 = vunpack.c.l.bf16 %v3150_v41  ;;  %v3141_v59 = vunpack.c.l.bf16 %v3135_v1 }
 0x80d   :  { %v4700_v4 = vpop.eup %4699  ;;  %v3155_v3 = vmul.f32 %v4698_v29, %v5690_v37  ;;  %v3206_v50 = vunpack.c.l.bf16 %v3190_v12 }
 0x80e   :  { %v3157_v40 = vmul.f32 %v4700_v4, %v5692_v16  ;;  %4703 = vrcp.f32 %v3166_v51  ;;  %v4702_v19 = vpop.eup %4701  ;;  %v3147_v60 = vadd.f32 1.0, %v3141_v59 }
 0x80f   :  { %4705 = vrcp.f32 %v3167_v21  ;;  %v3191_v48 = vpack.c.bf16 %v4702_v19, %v4702_v19 }
 0x810   :  { %v3158_v8 = vpack.c.bf16 %v3155_v3, %v3157_v40  ;;  %v3151_v41 = vpack.c.bf16 %v3147_v60, %v3147_v60  ;;  %4707 = vrcp.f32 %v3159_v18 }
 0x811   :  { %4709 = vrcp.f32 %v3160_v38  ;;  %v3207_v51 = vunpack.c.l.bf16 %v3191_v48 }
 0x812   :  { %v3196_v15 = vrot.slane %v3158_v8, 4  ;;  %v3204_v49 = vunpack.c.l.bf16 %v3158_v8  ;;  %v3173_v4 = vunpack.c.h.bf16 %v3151_v41  ;;  %v3174_v12 = vunpack.c.l.bf16 %v3151_v41 }
 0x814   :  { %v4704_v44 = vpop.eup %4703  ;;  %v3200_v42 = vunpack.c.l.bf16 %v3196_v15  ;;  %v3208_v43 = vmul.f32 %v3206_v50, %v3204_v49  ;;  %4711 = vrcp.f32 %v3173_v4 }
 0x815   :  { %v4706_v25 = vpop.eup %4705  ;;  %v3169_v61 = vmul.f32 %v4704_v44, %v5690_v37  ;;  %4713 = vrcp.f32 %v3174_v12 }
 0x816   :  { %v3210_v39 = vpack.c.bf16 %v3208_v43, %v3208_v43  ;;  %v3171_v1 = vmul.f32 %v4706_v25, %v5692_v16  ;;  %v3202_v26 = vmul.f32 %v3200_v42, %v6184_v47  ;;  %v4708_v19 = vpop.eup %4707 }
 0x817   :  { %v4710_v15 = vpop.eup %4709  ;;  %v3162_v18 = vmul.f32 %v4708_v19, %v5690_v37 }
 0x818   :  { %v3212_v13 = vunpack.c.l.bf16 %v3210_v39  ;;  %v3172_v29 = vpack.c.bf16 %v3169_v61, %v3171_v1  ;;  %v3164_v44 = vmul.f32 %v4710_v15, %v5692_v16 }
 0x81a   :  { %v6252_v21 = vadd.f32 %v3212_v13, %v3202_v26  ;;  %v3197_v3 = vrot.slane %v3172_v29, 4  ;;  %v3205_v40 = vunpack.c.l.bf16 %v3172_v29  ;;  %v4712_v42 = vpop.eup %4711  ;;  %v3165_v61 = vpack.c.bf16 %v3162_v18, %v3164_v44 }
 0x81b   :  { %v4714_v25 = vpop.eup %4713  ;;  %v3176_v26 = vmul.f32 %v4712_v42, %v5690_v37 }
 0x81c   :  { %v3216_v59 = vpack.c.bf16 %v6252_v21, %v6252_v21  ;;  %v3201_v10 = vunpack.c.l.bf16 %v3197_v3  ;;  %v3209_v8 = vmul.f32 %v3207_v51, %v3205_v40  ;;  %v3224_v1 = vunpack.c.l.bf16 %v3165_v61 }
 0x81d   :  { %v3178_v13 = vmul.f32 %v4714_v25, %v5692_v16  ;;  %v3241_v40 = vstv %s4251_s29 }
 0x81e   :  { %v3218_v49 = vunpack.c.l.bf16 %v3216_v59  ;;  %v3211_v50 = vpack.c.bf16 %v3209_v8, %v3209_v8  ;;  %v3203_v47 = vmul.f32 %v3201_v10, %v6191_v58 }
 0x81f   :  { %v3179_v4 = vpack.c.bf16 %v3176_v26, %v3178_v13 }
 0x820   :  { %4715 = vtanh.f32 %v3218_v49  ;;  %v3213_v60 = vunpack.c.l.bf16 %v3211_v50 }
 0x821   :  { %v3225_v8 = vunpack.c.l.bf16 %v3179_v4 }
 0x822   :  { %v6259_v38 = vadd.f32 %v3213_v60, %v3203_v47 }
 0x824   :  { %v3217_v43 = vpack.c.bf16 %v6259_v38, %v6259_v38 }
 0x826   :  { %v4716_v48 = vpop.eup %4715  ;;  %v3219_v39 = vunpack.c.l.bf16 %v3217_v43 }
 0x827   :  { %v3222_v41 = vpack.c.bf16 %v4716_v48, %v4716_v48 }
 0x828   :  { %4717 = vtanh.f32 %v3219_v39 }
 0x829   :  { %v3226_v58 = vunpack.c.l.bf16 %v3222_v41 }
 0x82b   :  { %v3228_v29 = vmul.f32 %v3226_v58, %v3224_v1 }
 0x82d   :  { %v3230_v51 = vpack.c.bf16 %v3228_v29, %v3228_v29 }
 0x82e   :  { %v4718_v3 = vpop.eup %4717 }
 0x82f   :  { %v3239_v12 = vunpack.c.l.bf16 %v3230_v51  ;;  %v3223_v59 = vpack.c.bf16 %v4718_v3, %v4718_v3 }
 0x831   :  { %v3242_v10 = vmul.f32 %v3241_v40, %v3239_v12  ;;  %v3227_v19 = vunpack.c.l.bf16 %v3223_v59 }
 0x833   :  { %v6266_v15 = vadd.f32 %v3242_v10, %v6198_v6  ;;  %v3229_v49 = vmul.f32 %v3227_v19, %v3225_v8 }
 0x835   :  { %v3231_v50 = vpack.c.bf16 %v3229_v49, %v3229_v49  ;;  %v4374_v47 = vpack.c.bf16 %v3229_v49, %v3228_v29 }
 0x837   :  { %v3240_v60 = vunpack.c.l.bf16 %v3231_v50  ;;  %4375 = vst [vmem:[#allocation3] sm:$0xff] %v4374_v47  }
 0x839   :  { %v3243_v18 = vmul.f32 %v3241_v40, %v3240_v60 }
 0x83b   :  { %v6269_v44 = vadd.f32 %v3243_v18, %v6201_v5 }
 0x83e   :  { %v4328_v42 = vld [vmem:[#allocation3] sm:$0xff] }
 0x83f   :  { %3268 = vmatmul.bf16.vlgmr.msrb.gmra.mxu0 %v4328_v42  ;;  %3282 = vmatmul.bf16.vlgmr.msrb.gmra.mxu1 %v4328_v42 }
 0x840   :  { %3296 = vmatmul.bf16.vlgmr.msrb.gmra.mxu2 %v4328_v42  ;;  %3310 = vmatmul.bf16.vlgmr.msrb.gmra.mxu3 %v4328_v42 }
 0x841   :  { %3712 = vmatpush.bf16.msrb.mxu0 %v5183_v27  ;;  %3726 = vmatpush.bf16.msrb.mxu1 %v5186_v30  ;;  %v6602_v27 = vld [vmem:[#allocation26_spill] sm:$0xff]  ;;  %v6603_v30 = vld [vmem:[#allocation27_spill] sm:$0xff] }
 0x842   :  { %3740 = vmatpush.bf16.msrb.mxu2 %v5195_v34  ;;  %3754 = vmatpush.bf16.msrb.mxu3 %v5197_v35  ;;  %v6604_v34 = vld [vmem:[#allocation9_spill] sm:$0xff] }
 0x843   :  { %v6605_v35 = vld [vmem:[#allocation61_spill] sm:$0xff] }
 0x845   :  { %3713 = vmatpush.bf16.msrb.mxu0 %v5223_v45  ;;  %3727 = vmatpush.bf16.msrb.mxu1 %v5227_v46  ;;  %v838_v45 = vadd.f32 %v6605_v35, %v6604_v34  ;;  %v6606_v46 = vld [vmem:[#allocation10_spill] sm:$0xff] }
 0x846   :  { %3741 = vmatpush.bf16.msrb.mxu2 %v5237_v52  ;;  %3755 = vmatpush.bf16.msrb.mxu3 %v5239_v53  ;;  %v6607_v52 = vld [vmem:[#allocation62_spill] sm:$0xff] }
 0x847   :  { %v852_v53 = vadd.f32 %v6607_v52, %v6606_v46 }
 0x849   :  { %3714 = vmatpush.bf16.msrb.mxu0 %v5263_v2  ;;  %3728 = vmatpush.bf16.msrb.mxu1 %v5269_v7  ;;  %v6608_v2 = vld [vmem:[#allocation60_spill] sm:$0xff] }
 0x84a   :  { %3742 = vmatpush.bf16.msrb.mxu2 %v5279_v11  ;;  %3756 = vmatpush.bf16.msrb.mxu3 %v5281_v14  ;;  %v3316_v7 = vunpack.c.l.bf16 %v6608_v2  ;;  %v3317_v11 = vunpack.c.h.bf16 %v6608_v2 }
 0x84d   :  { %3715 = vmatpush.bf16.msrb.mxu0 %v5304_v23  ;;  %3729 = vmatpush.bf16.msrb.mxu1 %v5307_v24 }
 0x84e   :  { %3743 = vmatpush.bf16.msrb.mxu2 %v5320_v31  ;;  %3757 = vmatpush.bf16.msrb.mxu3 %v5322_v32  ;;  %v884_v32 = vpack.c.bf16 %v852_v53, %v838_v45 }
 0x850   :  { %v3320_v5 = vunpack.c.l.bf16 %v884_v32  ;;  %v3321_v43 = vunpack.c.h.bf16 %v884_v32 }
 0x851   :  { %3716 = vmatpush.bf16.msrb.mxu0 %v5347_v54  ;;  %3730 = vmatpush.bf16.msrb.mxu1 %v5351_v57 }
 0x852   :  { %3744 = vmatpush.bf16.msrb.mxu2 %v5362_v63  ;;  %3758 = vmatpush.bf16.msrb.mxu3 %v5364_v0  ;;  %v6609_v63 = vld [vmem:[#allocation11_spill] sm:$0xff]  ;;  %v6610_v0 = vld [vmem:[#allocation64_spill] sm:$0xff] }
 0x855   :  { %3717 = vmatpush.bf16.msrb.mxu0 %v5390_v20  ;;  %3731 = vmatpush.bf16.msrb.mxu1 %v5394_v22  ;;  %v866_v20 = vadd.f32 %v6610_v0, %v6609_v63  ;;  %v6611_v22 = vld [vmem:[#allocation12_spill] sm:$0xff] }
 0x856   :  { %3745 = vmatpush.bf16.msrb.mxu2 %v5404_v33  ;;  %3759 = vmatpush.bf16.msrb.mxu3 %v5406_v36  ;;  %v6612_v33 = vld [vmem:[#allocation65_spill] sm:$0xff] }
 0x857   :  { %v880_v36 = vadd.f32 %v6612_v33, %v6611_v22 }
 0x859   :  { %3718 = vmatpush.bf16.msrb.mxu0 %v5430_v62  ;;  %3732 = vmatpush.bf16.msrb.mxu1 %v5436_v9  ;;  %v6613_v62 = vld [vmem:[#allocation63_spill] sm:$0xff]  ;;  %v885_v13 = vpack.c.bf16 %v880_v36, %v866_v20 }
 0x85a   :  { %3746 = vmatpush.bf16.msrb.mxu2 %v5446_v17  ;;  %3760 = vmatpush.bf16.msrb.mxu3 %v5448_v28  ;;  %v3318_v9 = vunpack.c.l.bf16 %v6613_v62  ;;  %v3319_v17 = vunpack.c.h.bf16 %v6613_v62 }
 0x85b   :  { %v3322_v12 = vunpack.c.l.bf16 %v885_v13  ;;  %v3323_v59 = vunpack.c.h.bf16 %v885_v13 }
 0x85d   :  { %3719 = vmatpush.bf16.msrb.mxu0 %v5471_v55  ;;  %3733 = vmatpush.bf16.msrb.mxu1 %v5474_v56 }
 0x85e   :  { %3747 = vmatpush.bf16.msrb.mxu2 %v6602_v27  ;;  %3761 = vmatpush.bf16.msrb.mxu3 %v6603_v30 }
 0x8bc   :  { %v3269_v14 = vpop.f32.mrf.mxu0  ;;  %v3283_v23 = vpop.f32.mrf.mxu1 }
 0x8bd   :  { %v3324_v24 = vadd.f32 %v3316_v7, %v3269_v14  ;;  %v3325_v31 = vadd.f32 %v3317_v11, %v3283_v23 }
 0x8bf   :  { %v3332_v54 = vpack.c.bf16 %v3325_v31, %v3324_v24 }
 0x8c1   :  { %v3336_v57 = vxor.u32 2147516416, %v3332_v54 }
 0x8c3   :  { %v3340_v28 = vunpack.c.l.bf16 %v3336_v57  ;;  %v3341_v55 = vunpack.c.h.bf16 %v3336_v57  ;;  %v3297_v56 = vpop.f32.mrf.mxu2  ;;  %v3311_v6 = vpop.f32.mrf.mxu3 }
 0x8c4   :  { %v3326_v25 = vadd.f32 %v3318_v9, %v3297_v56  ;;  %v3327_v61 = vadd.f32 %v3319_v17, %v3311_v6  ;;  %v3271_v48 = vpop.f32.mrf.mxu0  ;;  %v3285_v39 = vpop.f32.mrf.mxu1 }
 0x8c5   :  { %v3346_v41 = vmul.f32 1.442695, %v3340_v28  ;;  %v3348_v1 = vmul.f32 1.442695, %v3341_v55  ;;  %v3328_v58 = vadd.f32 %v3320_v5, %v3271_v48  ;;  %v3329_v26 = vadd.f32 %v3321_v43, %v3285_v39 }
 0x8c6   :  { %v3333_v29 = vpack.c.bf16 %v3327_v61, %v3326_v25 }
 0x8c7   :  { %4719 = vpow2.f32 %v3346_v41  ;;  %v3334_v51 = vpack.c.bf16 %v3329_v26, %v3328_v58 }
 0x8c8   :  { %4721 = vpow2.f32 %v3348_v1  ;;  %v3337_v4 = vxor.u32 2147516416, %v3333_v29  ;;  %v3408_v52 = vrot.slane %v3333_v29, 4 }
 0x8c9   :  { %v3338_v3 = vxor.u32 2147516416, %v3334_v51 }
 0x8ca   :  { %v3342_v40 = vunpack.c.l.bf16 %v3337_v4  ;;  %v3412_v31 = vunpack.c.l.bf16 %v3408_v52 }
 0x8cb   :  { %v3343_v10 = vunpack.c.l.bf16 %v3338_v3  ;;  %v3344_v8 = vunpack.c.h.bf16 %v3338_v3  ;;  %v3299_v19 = vpop.f32.mrf.mxu2  ;;  %v3313_v49 = vpop.f32.mrf.mxu3 }
 0x8cc   :  { %v3350_v50 = vmul.f32 1.442695, %v3342_v40  ;;  %v3330_v47 = vadd.f32 %v3322_v12, %v3299_v19  ;;  %v3331_v60 = vadd.f32 %v3323_v59, %v3313_v49 }
 0x8cd   :  { %v4720_v18 = vpop.eup %4719  ;;  %v3352_v42 = vmul.f32 1.442695, %v3343_v10  ;;  %v3354_v27 = vmul.f32 1.442695, %v3344_v8 }
 0x8ce   :  { %v4722_v30 = vpop.eup %4721  ;;  %4723 = vpow2.f32 %v3350_v50  ;;  %v3335_v35 = vpack.c.bf16 %v3331_v60, %v3330_v47 }
 0x8cf   :  { %v3358_v45 = vpack.c.bf16 %v4722_v30, %v4720_v18  ;;  %4725 = vpow2.f32 %v3352_v42 }
 0x8d0   :  { %4727 = vpow2.f32 %v3354_v27  ;;  %v3339_v53 = vxor.u32 2147516416, %v3335_v35  ;;  %v3409_v9 = vrot.slane %v3335_v35, 4 }
 0x8d1   :  { %v3362_v2 = vunpack.c.l.bf16 %v3358_v45  ;;  %v3363_v7 = vunpack.c.h.bf16 %v3358_v45 }
 0x8d2   :  { %v3345_v11 = vunpack.c.l.bf16 %v3339_v53  ;;  %v3413_v5 = vunpack.c.l.bf16 %v3409_v9 }
 0x8d3   :  { %v3368_v14 = vadd.f32 1.0, %v3362_v2  ;;  %v3369_v23 = vadd.f32 1.0, %v3363_v7 }
 0x8d4   :  { %v4724_v24 = vpop.eup %4723  ;;  %v3356_v32 = vmul.f32 1.442695, %v3345_v11 }
 0x8d5   :  { %v4726_v54 = vpop.eup %4725  ;;  %v3374_v57 = vpack.c.bf16 %v3369_v23, %v3368_v14  ;;  %v3359_v20 = vpack.c.bf16 %v4724_v24, %v4724_v24 }
 0x8d6   :  { %v4728_v0 = vpop.eup %4727  ;;  %4729 = vpow2.f32 %v3356_v32 }
 0x8d7   :  { %v3378_v33 = vunpack.c.h.bf16 %v3374_v57  ;;  %v3379_v36 = vunpack.c.l.bf16 %v3374_v57  ;;  %v3360_v62 = vpack.c.bf16 %v4728_v0, %v4726_v54  ;;  %4731 = vtanh.f32 %v3412_v31 }
 0x8d8   :  { %v3364_v55 = vunpack.c.l.bf16 %v3359_v20 }
 0x8d9   :  { %4733 = vrcp.f32 %v3378_v33  ;;  %v3365_v17 = vunpack.c.l.bf16 %v3360_v62  ;;  %v3366_v28 = vunpack.c.h.bf16 %v3360_v62 }
 0x8da   :  { %4735 = vrcp.f32 %v3379_v36  ;;  %v3370_v39 = vadd.f32 1.0, %v3364_v55 }
 0x8db   :  { %v3371_v56 = vadd.f32 1.0, %v3365_v17  ;;  %v3372_v6 = vadd.f32 1.0, %v3366_v28  ;;  %4737 = vtanh.f32 %v3413_v5 }
 0x8dc   :  { %v4730_v43 = vpop.eup %4729  ;;  %v3375_v3 = vpack.c.bf16 %v3370_v39, %v3370_v39 }
 0x8dd   :  { %v3376_v25 = vpack.c.bf16 %v3372_v6, %v3371_v56  ;;  %v3361_v61 = vpack.c.bf16 %v4730_v43, %v4730_v43  ;;  %v4732_v48 = vpop.eup %4731 }
 0x8de   :  { %v3416_v51 = vpack.c.bf16 %v4732_v48, %v4732_v48  ;;  %v3385_v49 = vunpack.c.h.bf16 %v3375_v3  ;;  %v3386_v47 = vunpack.c.l.bf16 %v3375_v3 }
 0x8df   :  { %v4734_v41 = vpop.eup %4733  ;;  %v3392_v1 = vunpack.c.h.bf16 %v3376_v25  ;;  %v3393_v58 = vunpack.c.l.bf16 %v3376_v25  ;;  %v3367_v4 = vunpack.c.l.bf16 %v3361_v61 }
 0x8e0   :  { %v4736_v26 = vpop.eup %4735  ;;  %v3381_v13 = vmul.f32 %v4734_v41, %v5690_v37  ;;  %v3432_v8 = vunpack.c.l.bf16 %v3416_v51  ;;  %v3467_v51 = vstv %s4256_s30 }
 0x8e1   :  { %v3383_v29 = vmul.f32 %v4736_v26, %v5692_v16  ;;  %4739 = vrcp.f32 %v3392_v1  ;;  %v4738_v12 = vpop.eup %4737  ;;  %v3373_v19 = vadd.f32 1.0, %v3367_v4 }
 0x8e2   :  { %4741 = vrcp.f32 %v3393_v58  ;;  %v3417_v30 = vpack.c.bf16 %v4738_v12, %v4738_v12 }
 0x8e3   :  { %v3384_v40 = vpack.c.bf16 %v3381_v13, %v3383_v29  ;;  %v3377_v45 = vpack.c.bf16 %v3373_v19, %v3373_v19  ;;  %4743 = vrcp.f32 %v3385_v49 }
 0x8e4   :  { %4745 = vrcp.f32 %v3386_v47  ;;  %v3433_v11 = vunpack.c.l.bf16 %v3417_v30 }
 0x8e5   :  { %v3422_v59 = vrot.slane %v3384_v40, 4  ;;  %v3430_v10 = vunpack.c.l.bf16 %v3384_v40  ;;  %v3399_v23 = vunpack.c.h.bf16 %v3377_v45  ;;  %v3400_v32 = vunpack.c.l.bf16 %v3377_v45 }
 0x8e7   :  { %v4740_v50 = vpop.eup %4739  ;;  %v3426_v60 = vunpack.c.l.bf16 %v3422_v59  ;;  %v3434_v18 = vmul.f32 %v3432_v8, %v3430_v10  ;;  %4747 = vrcp.f32 %v3399_v23 }
 0x8e8   :  { %v4742_v42 = vpop.eup %4741  ;;  %v3395_v27 = vmul.f32 %v4740_v50, %v5690_v37  ;;  %4749 = vrcp.f32 %v3400_v32 }
 0x8e9   :  { %v3436_v35 = vpack.c.bf16 %v3434_v18, %v3434_v18  ;;  %v3397_v52 = vmul.f32 %v4742_v42, %v5692_v16  ;;  %v3428_v53 = vmul.f32 %v3426_v60, %v6252_v21  ;;  %v4744_v20 = vpop.eup %4743  ;;  %v6614_v42 = vld [vmem:[#allocation67_spill] sm:$0xff] }
 0x8ea   :  { %v4746_v33 = vpop.eup %4745  ;;  %v3388_v17 = vmul.f32 %v4744_v20, %v5690_v37 }
 0x8eb   :  { %v3438_v2 = vunpack.c.l.bf16 %v3436_v35  ;;  %v3398_v7 = vpack.c.bf16 %v3395_v27, %v3397_v52  ;;  %v3390_v28 = vmul.f32 %v4746_v33, %v5692_v16  ;;  %v914_v27 = vadd.f32 %v6614_v42, %v6604_v34  ;;  %v6616_v35 = vld [vmem:[#allocation66_spill] sm:$0xff] }
 0x8ec   :  { %v3542_v45 = vunpack.c.l.bf16 %v6616_v35  ;;  %v3543_v52 = vunpack.c.h.bf16 %v6616_v35 }
 0x8ed   :  { %v6320_v14 = vadd.f32 %v3438_v2, %v3428_v53  ;;  %v3423_v24 = vrot.slane %v3398_v7, 4  ;;  %v3431_v31 = vunpack.c.l.bf16 %v3398_v7  ;;  %v4748_v56 = vpop.eup %4747  ;;  %v3391_v43 = vpack.c.bf16 %v3388_v17, %v3390_v28 }
 0x8ee   :  { %v4750_v5 = vpop.eup %4749  ;;  %v3402_v41 = vmul.f32 %v4748_v56, %v5690_v37 }
 0x8ef   :  { %v3442_v54 = vpack.c.bf16 %v6320_v14, %v6320_v14  ;;  %v3427_v57 = vunpack.c.l.bf16 %v3423_v24  ;;  %v3435_v0 = vmul.f32 %v3433_v11, %v3431_v31  ;;  %v3450_v39 = vunpack.c.l.bf16 %v3391_v43  ;;  %v6617_v31 = vld [vmem:[#allocation70_spill] sm:$0xff] }
 0x8f0   :  { %v3404_v1 = vmul.f32 %v4750_v5, %v5692_v16  ;;  %v942_v32 = vadd.f32 %v6617_v31, %v6609_v63 }
 0x8f1   :  { %v3444_v36 = vunpack.c.l.bf16 %v3442_v54  ;;  %v3437_v62 = vpack.c.bf16 %v3435_v0, %v3435_v0  ;;  %v3429_v21 = vmul.f32 %v3427_v57, %v6259_v38  ;;  %v6618_v54 = vld [vmem:[#allocation71_spill] sm:$0xff]  ;;  %v6619_v0 = vld [vmem:[#allocation69_spill] sm:$0xff] }
 0x8f2   :  { %v3405_v13 = vpack.c.bf16 %v3402_v41, %v3404_v1  ;;  %v956_v57 = vadd.f32 %v6618_v54, %v6611_v22  ;;  %v3544_v20 = vunpack.c.l.bf16 %v6619_v0  ;;  %v3545_v33 = vunpack.c.h.bf16 %v6619_v0 }
 0x8f3   :  { %4751 = vtanh.f32 %v3444_v36  ;;  %v3439_v9 = vunpack.c.l.bf16 %v3437_v62 }
 0x8f4   :  { %v3451_v12 = vunpack.c.l.bf16 %v3405_v13 }
 0x8f5   :  { %v6327_v55 = vadd.f32 %v3439_v9, %v3429_v21 }
 0x8f7   :  { %v3443_v6 = vpack.c.bf16 %v6327_v55, %v6327_v55 }
 0x8f9   :  { %v4752_v25 = vpop.eup %4751  ;;  %v3445_v61 = vunpack.c.l.bf16 %v3443_v6 }
 0x8fa   :  { %v3448_v48 = vpack.c.bf16 %v4752_v25, %v4752_v25 }
 0x8fb   :  { %4753 = vtanh.f32 %v3445_v61 }
 0x8fc   :  { %v3452_v38 = vunpack.c.l.bf16 %v3448_v48 }
 0x8fe   :  { %v3454_v58 = vmul.f32 %v3452_v38, %v3450_v39  ;;  %v961_v38 = vpack.c.bf16 %v956_v57, %v942_v32 }
 0x900   :  { %v3456_v26 = vpack.c.bf16 %v3454_v58, %v3454_v58 }
 0x901   :  { %v4754_v29 = vpop.eup %4753 }
 0x902   :  { %v3465_v4 = vunpack.c.l.bf16 %v3456_v26  ;;  %v3449_v3 = vpack.c.bf16 %v4754_v29, %v4754_v29  ;;  %v3548_v29 = vunpack.c.l.bf16 %v961_v38 }
 0x904   :  { %v3468_v40 = vmul.f32 %v3467_v51, %v3465_v4  ;;  %v3453_v59 = vunpack.c.l.bf16 %v3449_v3 }
 0x906   :  { %v6334_v10 = vadd.f32 %v3468_v40, %v6266_v15  ;;  %v3455_v8 = vmul.f32 %v3453_v59, %v3451_v12  ;;  %v6615_v15 = vld [vmem:[#allocation68_spill] sm:$0xff] }
 0x907   :  { %v928_v30 = vadd.f32 %v6615_v15, %v6606_v46 }
 0x908   :  { %v3457_v19 = vpack.c.bf16 %v3455_v8, %v3455_v8  ;;  %v4379_v49 = vpack.c.bf16 %v3455_v8, %v3454_v58 }
 0x909   :  { %v960_v11 = vpack.c.bf16 %v928_v30, %v914_v27 }
 0x90a   :  { %v3466_v50 = vunpack.c.l.bf16 %v3457_v19  ;;  %4380 = vst [vmem:[#allocation3] sm:$0xff] %v4379_v49  }
 0x90b   :  { %v3546_v17 = vunpack.c.l.bf16 %v960_v11  ;;  %v3547_v28 = vunpack.c.h.bf16 %v960_v11 }
 0x90c   :  { %v3469_v47 = vmul.f32 %v3467_v51, %v3466_v50  ;;  %v3549_v51 = vunpack.c.h.bf16 %v961_v38 }
 0x90e   :  { %v6337_v60 = vadd.f32 %v3469_v47, %v6269_v44 }
 0x911   :  { %v4329_v18 = vld [vmem:[#allocation3] sm:$0xff] }
 0x912   :  { %3494 = vmatmul.bf16.vlgmr.msra.gmra.mxu0 %v4329_v18  ;;  %3508 = vmatmul.bf16.vlgmr.msra.gmra.mxu1 %v4329_v18 }
 0x913   :  { %3522 = vmatmul.bf16.vlgmr.msra.gmra.mxu2 %v4329_v18  ;;  %3536 = vmatmul.bf16.vlgmr.msra.gmra.mxu3 %v4329_v18 }
 0x98f   :  { %v3495_v53 = vpop.f32.mrf.mxu0  ;;  %v3509_v2 = vpop.f32.mrf.mxu1 }
 0x990   :  { %v3550_v7 = vadd.f32 %v3542_v45, %v3495_v53  ;;  %v3551_v44 = vadd.f32 %v3543_v52, %v3509_v2 }
 0x992   :  { %v3558_v23 = vpack.c.bf16 %v3551_v44, %v3550_v7 }
 0x994   :  { %v3562_v24 = vxor.u32 2147516416, %v3558_v23 }
 0x996   :  { %v3566_v36 = vunpack.c.l.bf16 %v3562_v24  ;;  %v3567_v62 = vunpack.c.h.bf16 %v3562_v24  ;;  %v3523_v21 = vpop.f32.mrf.mxu2  ;;  %v3537_v9 = vpop.f32.mrf.mxu3 }
 0x997   :  { %v3552_v56 = vadd.f32 %v3544_v20, %v3523_v21  ;;  %v3553_v6 = vadd.f32 %v3545_v33, %v3537_v9  ;;  %v3497_v5 = vpop.f32.mrf.mxu0  ;;  %v3511_v43 = vpop.f32.mrf.mxu1 }
 0x998   :  { %v3572_v25 = vmul.f32 1.442695, %v3566_v36  ;;  %v3574_v61 = vmul.f32 1.442695, %v3567_v62  ;;  %v3554_v48 = vadd.f32 %v3546_v17, %v3497_v5  ;;  %v3555_v39 = vadd.f32 %v3547_v28, %v3511_v43 }
 0x999   :  { %v3559_v41 = vpack.c.bf16 %v3553_v6, %v3552_v56 }
 0x99a   :  { %4755 = vpow2.f32 %v3572_v25  ;;  %v3560_v1 = vpack.c.bf16 %v3555_v39, %v3554_v48 }
 0x99b   :  { %4757 = vpow2.f32 %v3574_v61  ;;  %v3563_v58 = vxor.u32 2147516416, %v3559_v41  ;;  %v3634_v15 = vrot.slane %v3559_v41, 4 }
 0x99c   :  { %v3564_v26 = vxor.u32 2147516416, %v3560_v1 }
 0x99d   :  { %v3568_v13 = vunpack.c.l.bf16 %v3563_v58  ;;  %v3638_v44 = vunpack.c.l.bf16 %v3634_v15 }
 0x99e   :  { %v3569_v4 = vunpack.c.l.bf16 %v3564_v26  ;;  %v3570_v3 = vunpack.c.h.bf16 %v3564_v26  ;;  %v3525_v40 = vpop.f32.mrf.mxu2  ;;  %v3539_v12 = vpop.f32.mrf.mxu3 }
 0x99f   :  { %v3576_v59 = vmul.f32 1.442695, %v3568_v13  ;;  %v3556_v8 = vadd.f32 %v3548_v29, %v3525_v40  ;;  %v3557_v19 = vadd.f32 %v3549_v51, %v3539_v12 }
 0x9a0   :  { %v4756_v49 = vpop.eup %4755  ;;  %v3578_v50 = vmul.f32 1.442695, %v3569_v4  ;;  %v3580_v47 = vmul.f32 1.442695, %v3570_v3 }
 0x9a1   :  { %v4758_v18 = vpop.eup %4757  ;;  %4759 = vpow2.f32 %v3576_v59  ;;  %v3561_v42 = vpack.c.bf16 %v3557_v19, %v3556_v8 }
 0x9a2   :  { %v3584_v27 = vpack.c.bf16 %v4758_v18, %v4756_v49  ;;  %4761 = vpow2.f32 %v3578_v50 }
 0x9a3   :  { %4763 = vpow2.f32 %v3580_v47  ;;  %v3565_v30 = vxor.u32 2147516416, %v3561_v42  ;;  %v3635_v20 = vrot.slane %v3561_v42, 4 }
 0x9a4   :  { %v3588_v35 = vunpack.c.l.bf16 %v3584_v27  ;;  %v3589_v45 = vunpack.c.h.bf16 %v3584_v27 }
 0x9a5   :  { %v3571_v52 = vunpack.c.l.bf16 %v3565_v30  ;;  %v3639_v17 = vunpack.c.l.bf16 %v3635_v20 }
 0x9a6   :  { %v3594_v53 = vadd.f32 1.0, %v3588_v35  ;;  %v3595_v2 = vadd.f32 1.0, %v3589_v45 }
 0x9a7   :  { %v4760_v7 = vpop.eup %4759  ;;  %v3582_v11 = vmul.f32 1.442695, %v3571_v52 }
 0x9a8   :  { %v4762_v23 = vpop.eup %4761  ;;  %v3600_v24 = vpack.c.bf16 %v3595_v2, %v3594_v53  ;;  %v3585_v32 = vpack.c.bf16 %v4760_v7, %v4760_v7 }
 0x9a9   :  { %v4764_v31 = vpop.eup %4763  ;;  %4765 = vpow2.f32 %v3582_v11 }
 0x9aa   :  { %v3604_v54 = vunpack.c.h.bf16 %v3600_v24  ;;  %v3605_v57 = vunpack.c.l.bf16 %v3600_v24  ;;  %v3586_v0 = vpack.c.bf16 %v4764_v31, %v4762_v23  ;;  %4767 = vtanh.f32 %v3638_v44 }
 0x9ab   :  { %v3590_v62 = vunpack.c.l.bf16 %v3585_v32 }
 0x9ac   :  { %4769 = vrcp.f32 %v3604_v54  ;;  %v3591_v33 = vunpack.c.l.bf16 %v3586_v0  ;;  %v3592_v36 = vunpack.c.h.bf16 %v3586_v0 }
 0x9ad   :  { %4771 = vrcp.f32 %v3605_v57  ;;  %v3596_v43 = vadd.f32 1.0, %v3590_v62 }
 0x9ae   :  { %v3597_v21 = vadd.f32 1.0, %v3591_v33  ;;  %v3598_v9 = vadd.f32 1.0, %v3592_v36  ;;  %4773 = vtanh.f32 %v3639_v17 }
 0x9af   :  { %v4766_v28 = vpop.eup %4765  ;;  %v3601_v26 = vpack.c.bf16 %v3596_v43, %v3596_v43 }
 0x9b0   :  { %v3602_v56 = vpack.c.bf16 %v3598_v9, %v3597_v21  ;;  %v3587_v6 = vpack.c.bf16 %v4766_v28, %v4766_v28  ;;  %v4768_v5 = vpop.eup %4767 }
 0x9b1   :  { %v3642_v1 = vpack.c.bf16 %v4768_v5, %v4768_v5  ;;  %v3611_v12 = vunpack.c.h.bf16 %v3601_v26  ;;  %v3612_v8 = vunpack.c.l.bf16 %v3601_v26 }
 0x9b2   :  { %v4770_v25 = vpop.eup %4769  ;;  %v3618_v61 = vunpack.c.h.bf16 %v3602_v56  ;;  %v3619_v48 = vunpack.c.l.bf16 %v3602_v56  ;;  %v3593_v58 = vunpack.c.l.bf16 %v3587_v6 }
 0x9b3   :  { %v4772_v39 = vpop.eup %4771  ;;  %v3607_v38 = vmul.f32 %v4770_v25, %v5690_v37  ;;  %v3658_v3 = vunpack.c.l.bf16 %v3642_v1  ;;  %v3693_v1 = vstv %s4261_s0 }
 0x9b4   :  { %v3609_v41 = vmul.f32 %v4772_v39, %v5692_v16  ;;  %4775 = vrcp.f32 %v3618_v61  ;;  %v4774_v29 = vpop.eup %4773  ;;  %v3599_v40 = vadd.f32 1.0, %v3593_v58 }
 0x9b5   :  { %4777 = vrcp.f32 %v3619_v48  ;;  %v3643_v18 = vpack.c.bf16 %v4774_v29, %v4774_v29 }
 0x9b6   :  { %v3610_v13 = vpack.c.bf16 %v3607_v38, %v3609_v41  ;;  %v3603_v27 = vpack.c.bf16 %v3599_v40, %v3599_v40  ;;  %4779 = vrcp.f32 %v3611_v12 }
 0x9b7   :  { %4781 = vrcp.f32 %v3612_v8  ;;  %v3659_v52 = vunpack.c.l.bf16 %v3643_v18 }
 0x9b8   :  { %v3648_v51 = vrot.slane %v3610_v13, 4  ;;  %v3656_v4 = vunpack.c.l.bf16 %v3610_v13  ;;  %v3625_v2 = vunpack.c.h.bf16 %v3603_v27  ;;  %v3626_v11 = vunpack.c.l.bf16 %v3603_v27 }
 0x9ba   :  { %v4776_v59 = vpop.eup %4775  ;;  %v3652_v19 = vunpack.c.l.bf16 %v3648_v51  ;;  %v3660_v49 = vmul.f32 %v3658_v3, %v3656_v4  ;;  %4783 = vrcp.f32 %v3625_v2 }
 0x9bb   :  { %v4778_v50 = vpop.eup %4777  ;;  %v3621_v47 = vmul.f32 %v4776_v59, %v5690_v37  ;;  %4785 = vrcp.f32 %v3626_v11 }
 0x9bc   :  { %v3662_v42 = vpack.c.bf16 %v3660_v49, %v3660_v49  ;;  %v3623_v15 = vmul.f32 %v4778_v50, %v5692_v16  ;;  %v3654_v30 = vmul.f32 %v3652_v19, %v6320_v14  ;;  %v4780_v32 = vpop.eup %4779  ;;  %v6620_v50 = vld [vmem:[#allocation73_spill] sm:$0xff] }
 0x9bd   :  { %v4782_v54 = vpop.eup %4781  ;;  %v3614_v33 = vmul.f32 %v4780_v32, %v5690_v37 }
 0x9be   :  { %v3664_v35 = vunpack.c.l.bf16 %v3662_v42  ;;  %v3624_v45 = vpack.c.bf16 %v3621_v47, %v3623_v15  ;;  %v3616_v36 = vmul.f32 %v4782_v54, %v5692_v16  ;;  %v990_v47 = vadd.f32 %v6620_v50, %v6604_v34  ;;  %v6622_v42 = vld [vmem:[#allocation72_spill] sm:$0xff] }
 0x9bf   :  { %v3768_v27 = vunpack.c.l.bf16 %v6622_v42  ;;  %v3769_v15 = vunpack.c.h.bf16 %v6622_v42 }
 0x9c0   :  { %v6356_v53 = vadd.f32 %v3664_v35, %v3654_v30  ;;  %v3649_v7 = vrot.slane %v3624_v45, 4  ;;  %v3657_v44 = vunpack.c.l.bf16 %v3624_v45  ;;  %v4784_v21 = vpop.eup %4783  ;;  %v3617_v28 = vpack.c.bf16 %v3614_v33, %v3616_v36 }
 0x9c1   :  { %v4786_v17 = vpop.eup %4785  ;;  %v3628_v25 = vmul.f32 %v4784_v21, %v5690_v37 }
 0x9c2   :  { %v3668_v23 = vpack.c.bf16 %v6356_v53, %v6356_v53  ;;  %v3653_v24 = vunpack.c.l.bf16 %v3649_v7  ;;  %v3661_v31 = vmul.f32 %v3659_v52, %v3657_v44  ;;  %v3676_v43 = vunpack.c.l.bf16 %v3617_v28  ;;  %v6623_v44 = vld [vmem:[#allocation76_spill] sm:$0xff] }
 0x9c3   :  { %v3630_v61 = vmul.f32 %v4786_v17, %v5692_v16  ;;  %v1018_v11 = vadd.f32 %v6623_v44, %v6609_v63 }
 0x9c4   :  { %v3670_v57 = vunpack.c.l.bf16 %v3668_v23  ;;  %v3663_v0 = vpack.c.bf16 %v3661_v31, %v3661_v31  ;;  %v3655_v14 = vmul.f32 %v3653_v24, %v6327_v55  ;;  %v6624_v23 = vld [vmem:[#allocation77_spill] sm:$0xff]  ;;  %v6625_v24 = vld [vmem:[#allocation75_spill] sm:$0xff] }
 0x9c5   :  { %v3631_v38 = vpack.c.bf16 %v3628_v25, %v3630_v61  ;;  %v1032_v34 = vadd.f32 %v6624_v23, %v6611_v22  ;;  %v3770_v31 = vunpack.c.l.bf16 %v6625_v24 }
 0x9c6   :  { %4787 = vtanh.f32 %v3670_v57  ;;  %v3665_v20 = vunpack.c.l.bf16 %v3663_v0 }
 0x9c7   :  { %v3677_v29 = vunpack.c.l.bf16 %v3631_v38 }
 0x9c8   :  { %v6363_v62 = vadd.f32 %v3665_v20, %v3655_v14 }
 0x9ca   :  { %v3669_v9 = vpack.c.bf16 %v6363_v62, %v6363_v62 }
 0x9cc   :  { %v4788_v56 = vpop.eup %4787  ;;  %v3671_v6 = vunpack.c.l.bf16 %v3669_v9 }
 0x9cd   :  { %v3674_v5 = vpack.c.bf16 %v4788_v56, %v4788_v56 }
 0x9ce   :  { %4789 = vtanh.f32 %v3671_v6  ;;  %v1037_v6 = vpack.c.bf16 %v1032_v34, %v1018_v11 }
 0x9cf   :  { %v3678_v55 = vunpack.c.l.bf16 %v3674_v5 }
 0x9d0   :  { %v3774_v61 = vunpack.c.l.bf16 %v1037_v6 }
 0x9d1   :  { %v3680_v48 = vmul.f32 %v3678_v55, %v3676_v43 }
 0x9d3   :  { %v3682_v39 = vpack.c.bf16 %v3680_v48, %v3680_v48 }
 0x9d4   :  { %v4790_v41 = vpop.eup %4789 }
 0x9d5   :  { %v3691_v58 = vunpack.c.l.bf16 %v3682_v39  ;;  %v3675_v26 = vpack.c.bf16 %v4790_v41, %v4790_v41 }
 0x9d7   :  { %v3694_v13 = vmul.f32 %v3693_v1, %v3691_v58  ;;  %v3679_v51 = vunpack.c.l.bf16 %v3675_v26 }
 0x9d9   :  { %v6370_v4 = vadd.f32 %v3694_v13, %v6334_v10  ;;  %v3681_v3 = vmul.f32 %v3679_v51, %v3677_v29  ;;  %v6621_v10 = vld [vmem:[#allocation74_spill] sm:$0xff] }
 0x9da   :  { %v1004_v18 = vadd.f32 %v6621_v10, %v6606_v46  ;;  %v3771_v46 = vunpack.c.h.bf16 %v6625_v24 }
 0x9db   :  { %v3683_v40 = vpack.c.bf16 %v3681_v3, %v3681_v3  ;;  %v4384_v12 = vpack.c.bf16 %v3681_v3, %v3680_v48  ;;  %v3775_v48 = vunpack.c.h.bf16 %v1037_v6 }
 0x9dc   :  { %v1036_v52 = vpack.c.bf16 %v1004_v18, %v990_v47 }
 0x9dd   :  { %v3692_v59 = vunpack.c.l.bf16 %v3683_v40  ;;  %4385 = vst [vmem:[#allocation3] sm:$0xff] %v4384_v12  }
 0x9de   :  { %v3772_v14 = vunpack.c.l.bf16 %v1036_v52  ;;  %v3773_v20 = vunpack.c.h.bf16 %v1036_v52 }
 0x9df   :  { %v3695_v8 = vmul.f32 %v3693_v1, %v3692_v59 }
 0x9e1   :  { %v6373_v19 = vadd.f32 %v3695_v8, %v6337_v60 }
 0x9e4   :  { %v4330_v49 = vld [vmem:[#allocation3] sm:$0xff] }
 0x9e5   :  { %3720 = vmatmul.bf16.vlgmr.msrb.gmra.mxu0 %v4330_v49  ;;  %3734 = vmatmul.bf16.vlgmr.msrb.gmra.mxu1 %v4330_v49 }
 0x9e6   :  { %3748 = vmatmul.bf16.vlgmr.msrb.gmra.mxu2 %v4330_v49  ;;  %3762 = vmatmul.bf16.vlgmr.msrb.gmra.mxu3 %v4330_v49 }
 0xa62   :  { %v3721_v30 = vpop.f32.mrf.mxu0  ;;  %v3735_v35 = vpop.f32.mrf.mxu1 }
 0xa63   :  { %v3776_v45 = vadd.f32 %v3768_v27, %v3721_v30  ;;  %v3777_v60 = vadd.f32 %v3769_v15, %v3735_v35 }
 0xa65   :  { %v3784_v2 = vpack.c.bf16 %v3777_v60, %v3776_v45 }
 0xa67   :  { %v3788_v7 = vxor.u32 2147516416, %v3784_v2 }
 0xa69   :  { %v3792_v32 = vunpack.c.l.bf16 %v3788_v7  ;;  %v3793_v54 = vunpack.c.h.bf16 %v3788_v7  ;;  %v3749_v57 = vpop.f32.mrf.mxu2  ;;  %v3763_v0 = vpop.f32.mrf.mxu3 }
 0xa6a   :  { %v3778_v33 = vadd.f32 %v3770_v31, %v3749_v57  ;;  %v3779_v36 = vadd.f32 %v3771_v46, %v3763_v0  ;;  %v3723_v21 = vpop.f32.mrf.mxu0  ;;  %v3737_v9 = vpop.f32.mrf.mxu1 }
 0xa6b   :  { %v3798_v17 = vmul.f32 1.442695, %v3792_v32  ;;  %v3800_v28 = vmul.f32 1.442695, %v3793_v54  ;;  %v3780_v63 = vadd.f32 %v3772_v14, %v3723_v21  ;;  %v3781_v56 = vadd.f32 %v3773_v20, %v3737_v9 }
 0xa6c   :  { %v3785_v22 = vpack.c.bf16 %v3779_v36, %v3778_v33 }
 0xa6d   :  { %4791 = vpow2.f32 %v3798_v17  ;;  %v3786_v5 = vpack.c.bf16 %v3781_v56, %v3780_v63 }
 0xa6e   :  { %4793 = vpow2.f32 %v3800_v28  ;;  %v3789_v43 = vxor.u32 2147516416, %v3785_v22  ;;  %v3860_v8 = vrot.slane %v3785_v22, 4 }
 0xa6f   :  { %v3790_v55 = vxor.u32 2147516416, %v3786_v5 }
 0xa70   :  { %v3794_v25 = vunpack.c.l.bf16 %v3789_v43  ;;  %v3864_v15 = vunpack.c.l.bf16 %v3860_v8 }
 0xa71   :  { %v3795_v39 = vunpack.c.l.bf16 %v3790_v55  ;;  %v3796_v38 = vunpack.c.h.bf16 %v3790_v55  ;;  %v3751_v41 = vpop.f32.mrf.mxu2  ;;  %v3765_v1 = vpop.f32.mrf.mxu3 }
 0xa72   :  { %v3802_v58 = vmul.f32 1.442695, %v3794_v25  ;;  %v3782_v26 = vadd.f32 %v3774_v61, %v3751_v41  ;;  %v3783_v13 = vadd.f32 %v3775_v48, %v3765_v1 }
 0xa73   :  { %v4792_v29 = vpop.eup %4791  ;;  %v3804_v51 = vmul.f32 1.442695, %v3795_v39  ;;  %v3806_v3 = vmul.f32 1.442695, %v3796_v38 }
 0xa74   :  { %v4794_v40 = vpop.eup %4793  ;;  %4795 = vpow2.f32 %v3802_v58  ;;  %v3787_v12 = vpack.c.bf16 %v3783_v13, %v3782_v26 }
 0xa75   :  { %v3810_v59 = vpack.c.bf16 %v4794_v40, %v4792_v29  ;;  %4797 = vpow2.f32 %v3804_v51 }
 0xa76   :  { %4799 = vpow2.f32 %v3806_v3  ;;  %v3791_v49 = vxor.u32 2147516416, %v3787_v12  ;;  %v3861_v11 = vrot.slane %v3787_v12, 4 }
 0xa77   :  { %v3814_v50 = vunpack.c.l.bf16 %v3810_v59  ;;  %v3815_v47 = vunpack.c.h.bf16 %v3810_v59 }
 0xa78   :  { %v3797_v10 = vunpack.c.l.bf16 %v3791_v49  ;;  %v3865_v32 = vunpack.c.l.bf16 %v3861_v11 }
 0xa79   :  { %v3820_v18 = vadd.f32 1.0, %v3814_v50  ;;  %v3821_v42 = vadd.f32 1.0, %v3815_v47 }
 0xa7a   :  { %v4796_v27 = vpop.eup %4795  ;;  %v3808_v30 = vmul.f32 1.442695, %v3797_v10 }
 0xa7b   :  { %v4798_v35 = vpop.eup %4797  ;;  %v3826_v45 = vpack.c.bf16 %v3821_v42, %v3820_v18  ;;  %v3811_v52 = vpack.c.bf16 %v4796_v27, %v4796_v27 }
 0xa7c   :  { %v4800_v60 = vpop.eup %4799  ;;  %4801 = vpow2.f32 %v3808_v30 }
 0xa7d   :  { %v3830_v2 = vunpack.c.h.bf16 %v3826_v45  ;;  %v3831_v7 = vunpack.c.l.bf16 %v3826_v45  ;;  %v3812_v44 = vpack.c.bf16 %v4800_v60, %v4798_v35  ;;  %4803 = vtanh.f32 %v3864_v15 }
 0xa7e   :  { %v3816_v24 = vunpack.c.l.bf16 %v3811_v52 }
 0xa7f   :  { %4805 = vrcp.f32 %v3830_v2  ;;  %v3817_v23 = vunpack.c.l.bf16 %v3812_v44  ;;  %v3818_v34 = vunpack.c.h.bf16 %v3812_v44 }
 0xa80   :  { %4807 = vrcp.f32 %v3831_v7  ;;  %v3822_v20 = vadd.f32 1.0, %v3816_v24 }
 0xa81   :  { %v3823_v31 = vadd.f32 1.0, %v3817_v23  ;;  %v3824_v46 = vadd.f32 1.0, %v3818_v34  ;;  %4809 = vtanh.f32 %v3865_v32 }
 0xa82   :  { %v4802_v54 = vpop.eup %4801  ;;  %v3827_v6 = vpack.c.bf16 %v3822_v20, %v3822_v20 }
 0xa83   :  { %v3828_v57 = vpack.c.bf16 %v3824_v46, %v3823_v31  ;;  %v3813_v0 = vpack.c.bf16 %v4802_v54, %v4802_v54  ;;  %v4804_v14 = vpop.eup %4803 }
 0xa84   :  { %v3868_v63 = vpack.c.bf16 %v4804_v14, %v4804_v14  ;;  %v3837_v48 = vunpack.c.h.bf16 %v3827_v6  ;;  %v3838_v38 = vunpack.c.l.bf16 %v3827_v6 }
 0xa85   :  { %v4806_v33 = vpop.eup %4805  ;;  %v3844_v36 = vunpack.c.h.bf16 %v3828_v57  ;;  %v3845_v21 = vunpack.c.l.bf16 %v3828_v57  ;;  %v3819_v56 = vunpack.c.l.bf16 %v3813_v0 }
 0xa86   :  { %v4808_v9 = vpop.eup %4807  ;;  %v3833_v17 = vmul.f32 %v4806_v33, %v5690_v37  ;;  %v3884_v25 = vunpack.c.l.bf16 %v3868_v63 }
 0xa87   :  { %v3835_v28 = vmul.f32 %v4808_v9, %v5692_v16  ;;  %4811 = vrcp.f32 %v3844_v36  ;;  %v4810_v5 = vpop.eup %4809  ;;  %v3825_v61 = vadd.f32 1.0, %v3819_v56 }
 0xa88   :  { %4813 = vrcp.f32 %v3845_v21  ;;  %v3869_v13 = vpack.c.bf16 %v4810_v5, %v4810_v5  ;;  %v3919_v21 = vstv %s4266_s7 }
 0xa89   :  { %v3836_v22 = vpack.c.bf16 %v3833_v17, %v3835_v28  ;;  %v3829_v51 = vpack.c.bf16 %v3825_v61, %v3825_v61  ;;  %4815 = vrcp.f32 %v3837_v48 }
 0xa8a   :  { %4817 = vrcp.f32 %v3838_v38  ;;  %v3885_v8 = vunpack.c.l.bf16 %v3869_v13 }
 0xa8b   :  { %v3874_v43 = vrot.slane %v3836_v22, 4  ;;  %v3882_v55 = vunpack.c.l.bf16 %v3836_v22  ;;  %v3851_v50 = vunpack.c.h.bf16 %v3829_v51  ;;  %v3852_v18 = vunpack.c.l.bf16 %v3829_v51 }
 0xa8d   :  { %v4812_v39 = vpop.eup %4811  ;;  %v3878_v41 = vunpack.c.l.bf16 %v3874_v43  ;;  %v3886_v1 = vmul.f32 %v3884_v25, %v3882_v55  ;;  %4819 = vrcp.f32 %v3851_v50 }
 0xa8e   :  { %v4814_v58 = vpop.eup %4813  ;;  %v3847_v26 = vmul.f32 %v4812_v39, %v5690_v37  ;;  %4821 = vrcp.f32 %v3852_v18 }
 0xa8f   :  { %v3888_v29 = vpack.c.bf16 %v3886_v1, %v3886_v1  ;;  %v3849_v3 = vmul.f32 %v4814_v58, %v5692_v16  ;;  %v3880_v40 = vmul.f32 %v3878_v41, %v6356_v53  ;;  %v4816_v30 = vpop.eup %4815 }
 0xa90   :  { %v4818_v35 = vpop.eup %4817  ;;  %v3840_v2 = vmul.f32 %v4816_v30, %v5690_v37 }
 0xa91   :  { %v3890_v12 = vunpack.c.l.bf16 %v3888_v29  ;;  %v3850_v59 = vpack.c.bf16 %v3847_v26, %v3849_v3  ;;  %v3842_v7 = vmul.f32 %v4818_v35, %v5692_v16 }
 0xa93   :  { %v3892_v49 = vadd.f32 %v3890_v12, %v3880_v40  ;;  %v3875_v47 = vrot.slane %v3850_v59, 4  ;;  %v3883_v10 = vunpack.c.l.bf16 %v3850_v59  ;;  %v4820_v11 = vpop.eup %4819  ;;  %v3843_v24 = vpack.c.bf16 %v3840_v2, %v3842_v7 }
 0xa94   :  { %v4822_v34 = vpop.eup %4821  ;;  %v3854_v0 = vmul.f32 %v4820_v11, %v5690_v37 }
 0xa95   :  { %v3894_v42 = vpack.c.bf16 %v3892_v49, %v3892_v49  ;;  %v3879_v27 = vunpack.c.l.bf16 %v3875_v47  ;;  %v3887_v15 = vmul.f32 %v3885_v8, %v3883_v10  ;;  %v3902_v54 = vunpack.c.l.bf16 %v3843_v24 }
 0xa97   :  { %v3896_v45 = vunpack.c.l.bf16 %v3894_v42  ;;  %v3889_v60 = vpack.c.bf16 %v3887_v15, %v3887_v15  ;;  %v3881_v53 = vmul.f32 %v3879_v27, %v6363_v62  ;;  %v3856_v62 = vmul.f32 %v4822_v34, %v5692_v16 }
 0xa99   :  { %4823 = vtanh.f32 %v3896_v45  ;;  %v3891_v52 = vunpack.c.l.bf16 %v3889_v60  ;;  %v3857_v33 = vpack.c.bf16 %v3854_v0, %v3856_v62 }
 0xa9b   :  { %v3893_v44 = vadd.f32 %v3891_v52, %v3881_v53  ;;  %v3903_v63 = vunpack.c.l.bf16 %v3857_v33 }
 0xa9d   :  { %v3895_v23 = vpack.c.bf16 %v3893_v44, %v3893_v44 }
 0xa9f   :  { %v4824_v31 = vpop.eup %4823  ;;  %v3897_v46 = vunpack.c.l.bf16 %v3895_v23 }
 0xaa0   :  { %v3900_v32 = vpack.c.bf16 %v4824_v31, %v4824_v31 }
 0xaa1   :  { %4825 = vtanh.f32 %v3897_v46 }
 0xaa2   :  { %v3904_v57 = vunpack.c.l.bf16 %v3900_v32 }
 0xaa4   :  { %v3906_v14 = vmul.f32 %v3904_v57, %v3902_v54 }
 0xaa6   :  { %v3908_v20 = vpack.c.bf16 %v3906_v14, %v3906_v14 }
 0xaa7   :  { %v4826_v36 = vpop.eup %4825 }
 0xaa8   :  { %v3917_v9 = vunpack.c.l.bf16 %v3908_v20  ;;  %v3901_v17 = vpack.c.bf16 %v4826_v36, %v4826_v36 }
 0xaaa   :  { %v3920_v28 = vmul.f32 %v3919_v21, %v3917_v9  ;;  %v3905_v56 = vunpack.c.l.bf16 %v3901_v17 }
 0xaac   :  { %v3922_v6 = vadd.f32 %v3920_v28, %v6370_v4  ;;  %v3907_v22 = vmul.f32 %v3905_v56, %v3903_v63 }
 0xaae   :  { %3924 = vst [vmem:[%s6411_s6] sm:$0xff] %v3922_v6  ;;  %v3909_v37 = vpack.c.bf16 %v3907_v22, %v3907_v22  ;;  %v4389_v5 = vpack.c.bf16 %v3907_v22, %v3906_v14 }
 0xab0   :  { %4390 = vst [vmem:[#allocation3] sm:$0xff] %v4389_v5   ;;  %v3918_v16 = vunpack.c.l.bf16 %v3909_v37 }
 0xab2   :  { %v3921_v43 = vmul.f32 %v3919_v21, %v3918_v16 }
 0xab4   :  { %v3923_v55 = vadd.f32 %v3921_v43, %v6373_v19 }
 0xab6   :  { %3925 = vst [vmem:[%s6411_s6 + $0x8] sm:$0xff] %v3923_v55 }

</bundles_post_ra>
